<compile_context>
chip_gen: v7x
topology: tpu7x:2x2x1
jax: 0.10.0
libtpu: 0.0.40
codegen_flags: <defaults>
</compile_context>

<pallas_src>
import numpy as np
import jax
import jax.numpy as jnp
from jax.experimental import pallas as pl
from jax.experimental.pallas import tpu as pltpu


# ---------------------------------------------------------------------------
# Host-side (numpy) construction of the small spatial operators.
# ---------------------------------------------------------------------------
def adaptive_pool_matrix(out_size, in_size):
    """Row matrix implementing torch AdaptiveAvgPool semantics along one axis."""
    P = np.zeros((out_size, in_size), np.float32)
    for i in range(out_size):
        start = (i * in_size) // out_size
        end = -(-((i + 1) * in_size) // out_size)  # ceil
        P[i, start:end] = 1.0 / (end - start)
    return P


def bilinear_matrix(out_size, in_size, align_corners=True):
    """F.interpolate(mode='bilinear', align_corners=True) along one axis."""
    U = np.zeros((out_size, in_size), np.float32)
    for i in range(out_size):
        if out_size == 1:
            s = 0.0
        elif align_corners:
            s = i * (in_size - 1) / (out_size - 1)
        else:
            s = max((i + 0.5) * in_size / out_size - 0.5, 0.0)
        i0 = min(int(np.floor(s)), in_size - 1)
        i1 = min(i0 + 1, in_size - 1)
        w = s - i0
        U[i, i0] += 1.0 - w
        U[i, i1] += w
    return U


def shift_matrix(size, pad, tap):
    S = np.zeros((size, size), np.float32)
    for i in range(size):
        j = i + tap - pad
        if 0 <= j < size:
            S[i, j] = 1.0
    return S


def conv3x3_masks(H, W):
    """(9, H*W) 0/1 masks: mask[t, p]==1 iff 3x3 tap t has a valid source at p."""
    m = np.zeros((9, H * W), np.float32)
    for t in range(9):
        ty, tx = divmod(t, 3)
        for p in range(H * W):
            h, w_ = divmod(p, W)
            if 0 <= h + ty - 1 < H and 0 <= w_ + tx - 1 < W:
                m[t, p] = 1.0
    return m


def _branch_mats(H, W, ph, pw, kh, kw, py, px):
    """Pool-first factoring of one pooled branch.

    Returns P^T (HW, pp) and a list over conv taps of (U @ S_t)^T (pp, HW) so
    that  up(conv_t(pool(x)))  ==  (x @ P^T) @ (U @ S_t)^T  per channel row.
    """
    P = np.kron(adaptive_pool_matrix(ph, H), adaptive_pool_matrix(pw, W))
    U = np.kron(bilinear_matrix(H, ph), bilinear_matrix(W, pw))
    MTs = []
    for ty in range(kh):
        Sy = shift_matrix(ph, py, ty)
        for tx in range(kw):
            Sx = shift_matrix(pw, px, tx)
            MTs.append((U @ np.kron(Sy, Sx)).T)
    return P.T, MTs


def _strip_group(H, W, pools, kh, kw, py, px):
    """Fuse a group of branches that share the same conv weights."""
    PTs, branch_MTs = [], []
    for (ph, pw) in pools:
        PT, MTs = _branch_mats(H, W, ph, pw, kh, kw, py, px)
        PTs.append(PT)
        branch_MTs.append(MTs)
    T = kh * kw
    PT_cat = np.concatenate(PTs, axis=1)                       # (HW, sum_pp)
    McatT = np.concatenate(
        [np.concatenate([mts[t] for mts in branch_MTs], axis=0) for t in range(T)],
        axis=1)                                                # (sum_pp, T*HW)
    return PT_cat, McatT


# ---------------------------------------------------------------------------
# BN folding + conv-tap stacking.
# ---------------------------------------------------------------------------
def _fold(w, scale):
    return np.asarray(w, np.float32) * np.asarray(scale, np.float32)[:, None, None, None]


def _taps_stack(w, scale):
    wf = _fold(w, scale)
    _, _, kh, kw = wf.shape
    return np.stack([wf[:, :, ty, tx] for ty in range(kh) for tx in range(kw)], axis=0)


def _taps_vstack_padded(w, scale, cpad):
    """Vertically stack per-tap (Co, Ci) weights with sublane-aligned padding."""
    wf = _fold(w, scale)
    co, ci, kh, kw = wf.shape
    out = np.zeros((kh * kw * cpad, ci), np.float32)
    t = 0
    for ty in range(kh):
        for tx in range(kw):
            out[t * cpad:t * cpad + co, :] = wf[:, :, ty, tx]
            t += 1
    return out


def build_kernel_params(L, C, Cm, H, W, pool_size):
    p1, p2 = pool_size
    cpad = -(-Cm // 8) * 8
    bf16, f32 = jnp.bfloat16, jnp.float32

    def n32(a):
        return np.asarray(a, np.float32)

    P = {}

    # conv1_1 / conv1_2 (1x1 conv + folded BN)
    for name, key in (('c11', '1'), ('c12', '2')):
        w, s, b = L[name]
        P['w1' + key] = jnp.asarray(n32(w)[:, :, 0, 0] * n32(s)[:, None], bf16)
        P['b1' + key] = jnp.asarray(n32(b).reshape(Cm, 1), f32)

    # full-resolution 3x3 convs: padded per-tap channel weights + border masks
    P['mask3'] = jnp.asarray(conv3x3_masks(H, W), f32)
    P['w20'] = jnp.asarray(_taps_vstack_padded(L['c20'][0], L['c20'][1], cpad), bf16)
    P['w25'] = jnp.asarray(_taps_vstack_padded(L['c25'][0], L['c25'][1], cpad), bf16)
    P['w26'] = jnp.asarray(_taps_vstack_padded(L['c26'][0], L['c26'][1], cpad), bf16)
    P['bA'] = jnp.asarray(
        (n32(L['c20'][2]) + n32(L['c21'][2]) + n32(L['c22'][2])).reshape(Cm, 1), f32)
    P['b25'] = jnp.asarray(n32(L['c25'][2]).reshape(Cm, 1), f32)
    P['b26'] = jnp.asarray(n32(L['c26'][2]).reshape(Cm, 1), f32)

    # x1 pathway pooled branches (square adaptive pools, 3x3 convs)
    for pool, cname, pkey, mkey, wkey in ((p1, 'c21', 'p1T', 'm1catT', 'w21'),
                                          (p2, 'c22', 'p2T', 'm2catT', 'w22')):
        pT, mts = _branch_mats(H, W, pool, pool, 3, 3, 1, 1)
        P[pkey] = jnp.asarray(pT, bf16)
        P[mkey] = jnp.asarray(np.concatenate(mts, axis=1), bf16)
        P[wkey] = jnp.asarray(_taps_stack(L[cname][0], L[cname][1]), bf16)

    # x2 pathway strip branches, grouped by shared conv (conv2_3 / conv2_4)
    phT, mh = _strip_group(H, W, [(1, W), (2, W), (3, W)], 1, 3, 0, 1)
    pvT, mv = _strip_group(H, W, [(H, 1), (H, 2), (H, 3)], 3, 1, 1, 0)
    P['phT'], P['mhcatT'] = jnp.asarray(phT, bf16), jnp.asarray(mh, bf16)
    P['pvT'], P['mvcatT'] = jnp.asarray(pvT, bf16), jnp.asarray(mv, bf16)
    P['w23'] = jnp.asarray(_taps_stack(L['c23'][0], L['c23'][1]), bf16)
    P['w24'] = jnp.asarray(_taps_stack(L['c24'][0], L['c24'][1]), bf16)
    P['bB'] = jnp.asarray(3.0 * (n32(L['c23'][2]) + n32(L['c24'][2])).reshape(Cm, 1), f32)

    # conv3 (1x1 on concat) split into the y1 / y2 halves
    w3, s3, b3 = L['c3']
    w3f = n32(w3)[:, :, 0, 0] * n32(s3)[:, None]
    P['w3a'] = jnp.asarray(w3f[:, :Cm], bf16)
    P['w3b'] = jnp.asarray(w3f[:, Cm:], bf16)
    P['b3'] = jnp.asarray(n32(b3).reshape(C, 1), f32)
    return P


# ---------------------------------------------------------------------------
# Pallas kernel + wrapper.
# ---------------------------------------------------------------------------
def strip_pooling_multi_pallas(x_nchw, P):
    N, C, H, W = x_nchw.shape
    HW = H * W
    x_flat = x_nchw.reshape(N, C, HW).astype(jnp.float32)
    bf16, f32 = jnp.bfloat16, jnp.float32

    def mm(a, b):
        return jnp.dot(a, b, preferred_element_type=f32)

    def kernel(x_ref,
               w11_ref, b11_ref, w12_ref, b12_ref,
               mask3_ref,
               w20_ref, bA_ref,
               p1_ref, m1_ref, w21_ref,
               p2_ref, m2_ref, w22_ref,
               w25_ref, b25_ref,
               ph_ref, mh_ref, w23_ref,
               pv_ref, mv_ref, w24_ref,
               bB_ref,
               w26_ref, b26_ref,
               w3a_ref, w3b_ref, b3_ref,
               o_ref):
        Cm = w11_ref.shape[0]
        cpad = w20_ref.shape[0] // 9
        x = x_ref[0]                      # (C, HW) f32
        mask3 = mask3_ref[...]            # (9, HW) f32

        # conv1_1 / conv1_2: 1x1 conv + folded BN + ReLU (elementwise in f32)
        x_bf = x.astype(bf16)
        x1 = jnp.maximum(mm(w11_ref[...], x_bf) + b11_ref[...], 0.0)
        x2 = jnp.maximum(mm(w12_ref[...], x_bf) + b12_ref[...], 0.0)
        x1_bf, x2_bf = x1.astype(bf16), x2.astype(bf16)

        def conv3x3(act_bf, wpad_ref):
            # Full-resolution 3x3 conv (pad 1): ONE fused channel-mix matmul,
            # then per-tap lane rolls + precomputed border masks
            # (W_t @ roll(x) == roll(W_t @ x); the mask is per-column).
            v = mm(wpad_ref[...], act_bf)             # (9*cpad, HW) f32
            out = None
            for t in range(9):
                ty, tx = divmod(t, 3)
                shift = (-((ty - 1) * W + (tx - 1))) % HW
                piece = v[t * cpad:(t + 1) * cpad, :]  # sublane-aligned slice
                if shift:
                    piece = pltpu.roll(piece, shift, axis=1)
                piece = piece * mask3[t:t + 1, :]
                out = piece if out is None else out + piece
            return out[:Cm, :]

        def pooled_group(act_bf, pT_ref, mcatT_ref, wtaps_ref):
            # pool -> fused (shift -> bilinear-up) wide matmul over all taps
            # (and over all branches sharing the conv) -> tiny per-tap mixes.
            n_taps = wtaps_ref.shape[0]
            xp = mm(act_bf, pT_ref[...]).astype(bf16)      # (Cm, sum_pp)
            y = mm(xp, mcatT_ref[...]).astype(bf16)        # (Cm, T*HW)
            out = mm(wtaps_ref[0], y[:, :HW])
            for t in range(1, n_taps):
                out = out + mm(wtaps_ref[t], y[:, t * HW:(t + 1) * HW])
            return out

        # x1 pathway: conv2_0 + up(conv2_1(pool1)) + up(conv2_2(pool2)), ReLU,
        # then conv2_5 (3x3 + BN + ReLU).
        accA = (conv3x3(x1_bf, w20_ref)
                + pooled_group(x1_bf, p1_ref, m1_ref, w21_ref)
                + pooled_group(x1_bf, p2_ref, m2_ref, w22_ref))
        pre1 = jnp.maximum(accA + bA_ref[...], 0.0)
        y1 = jnp.maximum(conv3x3(pre1.astype(bf16), w25_ref) + b25_ref[...], 0.0)

        # x2 pathway: six strip-pool branches (3 share conv2_3, 3 share
        # conv2_4), ReLU, then conv2_6 (3x3 + BN + ReLU).
        accB = (pooled_group(x2_bf, ph_ref, mh_ref, w23_ref)
                + pooled_group(x2_bf, pv_ref, mv_ref, w24_ref))
        pre2 = jnp.maximum(accB + bB_ref[...], 0.0)
        y2 = jnp.maximum(conv3x3(pre2.astype(bf16), w26_ref) + b26_ref[...], 0.0)

        # conv3 (1x1 on [y1, y2]) + residual + final ReLU (residual in f32)
        out = (mm(w3a_ref[...], y1.astype(bf16))
               + mm(w3b_ref[...], y2.astype(bf16)) + b3_ref[...])
        o_ref[0] = jnp.maximum(x + out, 0.0)

    ins = (x_flat,
           P['w11'], P['b11'], P['w12'], P['b12'],
           P['mask3'],
           P['w20'], P['bA'],
           P['p1T'], P['m1catT'], P['w21'],
           P['p2T'], P['m2catT'], P['w22'],
           P['w25'], P['b25'],
           P['phT'], P['mhcatT'], P['w23'],
           P['pvT'], P['mvcatT'], P['w24'],
           P['bB'],
           P['w26'], P['b26'],
           P['w3a'], P['w3b'], P['b3'])

    in_specs = [pl.BlockSpec((1, C, HW), lambda n: (n, 0, 0))]
    for a in ins[1:]:
        in_specs.append(pl.BlockSpec(a.shape, lambda n, _nd=a.ndim: (0,) * _nd))

    out = pl.pallas_call(
        kernel,
        out_shape=jax.ShapeDtypeStruct((N, C, HW), jnp.float32),
        grid=(N,),
        in_specs=in_specs,
        out_specs=pl.BlockSpec((1, C, HW), lambda n: (n, 0, 0)),
        compiler_params=pltpu.CompilerParams(
            dimension_semantics=("parallel",),
            vmem_limit_bytes=32 * 1024 * 1024),   # generation-safe (v7x: 64 MiB)
    )(*ins)
    return out.reshape(N, C, H, W)


# ---------------------------------------------------------------------------
# Pure-JAX reference (lax.conv path) for correctness check.
# ---------------------------------------------------------------------------
def _conv_bn(x, w, scale, bias, pad, relu=False):
    y = jax.lax.conv_general_dilated(
        x, w, (1, 1), ((pad[0], pad[0]), (pad[1], pad[1])),
        dimension_numbers=('NCHW', 'OIHW', 'NCHW'))
    y = y * scale[None, :, None, None] + bias[None, :, None, None]
    return jnp.maximum(y, 0.0) if relu else y


def _adaptive_pool(x, oh, ow):
    H, W = x.shape[2], x.shape[3]
    Ph = jnp.asarray(adaptive_pool_matrix(oh, H))
    Pw = jnp.asarray(adaptive_pool_matrix(ow, W))
    return jnp.einsum('ah,nchw,bw->ncab', Ph, x, Pw)


def _bilinear_up(x, oh, ow):
    Hi, Wi = x.shape[2], x.shape[3]
    Uh = jnp.asarray(bilinear_matrix(oh, Hi))
    Uw = jnp.asarray(bilinear_matrix(ow, Wi))
    return jnp.einsum('ha,ncab,wb->nchw', Uh, x, Uw)


def reference_forward(x, L, pool_size):
    H, W = x.shape[2], x.shape[3]
    p1, p2 = pool_size
    x1 = _conv_bn(x, *L['c11'], (0, 0), relu=True)
    x2 = _conv_bn(x, *L['c12'], (0, 0), relu=True)
    x2_1 = _conv_bn(x1, *L['c20'], (1, 1))
    x2_2 = _bilinear_up(_conv_bn(_adaptive_pool(x1, p1, p1), *L['c21'], (1, 1)), H, W)
    x2_3 = _bilinear_up(_conv_bn(_adaptive_pool(x1, p2, p2), *L['c22'], (1, 1)), H, W)
    x2_4 = _bilinear_up(_conv_bn(_adaptive_pool(x2, 1, W), *L['c23'], (0, 1)), H, W)
    x2_5 = _bilinear_up(_conv_bn(_adaptive_pool(x2, H, 1), *L['c24'], (1, 0)), H, W)
    x2_6 = _bilinear_up(_conv_bn(_adaptive_pool(x2, 2, W), *L['c23'], (0, 1)), H, W)
    x2_7 = _bilinear_up(_conv_bn(_adaptive_pool(x2, H, 2), *L['c24'], (1, 0)), H, W)
    x2_8 = _bilinear_up(_conv_bn(_adaptive_pool(x2, 3, W), *L['c23'], (0, 1)), H, W)
    x2_9 = _bilinear_up(_conv_bn(_adaptive_pool(x2, H, 3), *L['c24'], (1, 0)), H, W)
    y1 = _conv_bn(jnp.maximum(x2_1 + x2_2 + x2_3, 0.0), *L['c25'], (1, 1), relu=True)
    y2 = _conv_bn(jnp.maximum(x2_5 + x2_4 + x2_7 + x2_6 + x2_9 + x2_8, 0.0),
                  *L['c26'], (1, 1), relu=True)
    out = _conv_bn(jnp.concatenate([y1, y2], axis=1), *L['c3'], (0, 0))
    return jnp.maximum(x + out, 0.0)


# ---------------------------------------------------------------------------
if __name__ == "__main__":
    N, C, H, W = 2, 16, 16, 16
    Cm = C // 4                       # inter_channels
    pool_size = (4, 8)                # StripPooling_multi(pool_size=...)
    # up_kwargs = {'mode': 'bilinear', 'align_corners': True}

    keys = iter(jax.random.split(jax.random.PRNGKey(0), 64))

    def make_conv(co, ci, kh, kw):
        fan_in = ci * kh * kw
        return (jax.random.normal(next(keys), (co, ci, kh, kw), jnp.float32)
                / np.sqrt(fan_in)).astype(jnp.float32)

    def make_bn(c, eps=1e-5):
        gamma = 1.0 + 0.1 * jax.random.normal(next(keys), (c,), jnp.float32)
        beta = 0.1 * jax.random.normal(next(keys), (c,), jnp.float32)
        mean = 0.1 * jax.random.normal(next(keys), (c,), jnp.float32)
        var = 1.0 + 0.5 * jax.random.uniform(next(keys), (c,), jnp.float32)
        scale = gamma / jnp.sqrt(var + eps)
        bias = beta - mean * scale
        return scale, bias

    L = {}

    def add(name, co, ci, kh, kw):
        w = make_conv(co, ci, kh, kw)
        s, b = make_bn(co)
        L[name] = (w, s, b)

    add('c11', Cm, C, 1, 1)
    add('c12', Cm, C, 1, 1)
    add('c20', Cm, Cm, 3, 3)
    add('c21', Cm, Cm, 3, 3)
    add('c22', Cm, Cm, 3, 3)
    add('c23', Cm, Cm, 1, 3)
    add('c24', Cm, Cm, 3, 1)
    add('c25', Cm, Cm, 3, 3)
    add('c26', Cm, Cm, 3, 3)
    add('c3', C, 2 * Cm, 1, 1)

    x = jax.random.normal(next(keys), (N, C, H, W), jnp.float32)

    params = build_kernel_params(L, C, Cm, H, W, pool_size)
    out = strip_pooling_multi_pallas(x, params)
    out = jax.block_until_ready(out)

    ref = jax.block_until_ready(reference_forward(x, L, pool_size))
    # bf16 MXU operands (f32 accumulation) -> tolerance sized for bf16 rounding.
    np.testing.assert_allclose(np.asarray(out), np.asarray(ref),
                               rtol=2e-2, atol=4e-2)
    print("KERNEL_OK")
</pallas_src>

<mosaic_0001>
module attributes {stable_mosaic.version = 11 : i64} {
  func.func @kernel(%arg0: i32, %arg1: memref<1x16x256xf32, #tpu.memory_space<vmem>>, %arg2: memref<4x16xbf16, #tpu.memory_space<vmem>>, %arg3: memref<4x1xf32, #tpu.memory_space<vmem>>, %arg4: memref<4x16xbf16, #tpu.memory_space<vmem>>, %arg5: memref<4x1xf32, #tpu.memory_space<vmem>>, %arg6: memref<9x256xf32, #tpu.memory_space<vmem>>, %arg7: memref<72x4xbf16, #tpu.memory_space<vmem>>, %arg8: memref<4x1xf32, #tpu.memory_space<vmem>>, %arg9: memref<256x16xbf16, #tpu.memory_space<vmem>>, %arg10: memref<16x2304xbf16, #tpu.memory_space<vmem>>, %arg11: memref<9x4x4xbf16, #tpu.memory_space<vmem>>, %arg12: memref<256x64xbf16, #tpu.memory_space<vmem>>, %arg13: memref<64x2304xbf16, #tpu.memory_space<vmem>>, %arg14: memref<9x4x4xbf16, #tpu.memory_space<vmem>>, %arg15: memref<72x4xbf16, #tpu.memory_space<vmem>>, %arg16: memref<4x1xf32, #tpu.memory_space<vmem>>, %arg17: memref<256x96xbf16, #tpu.memory_space<vmem>>, %arg18: memref<96x768xbf16, #tpu.memory_space<vmem>>, %arg19: memref<3x4x4xbf16, #tpu.memory_space<vmem>>, %arg20: memref<256x96xbf16, #tpu.memory_space<vmem>>, %arg21: memref<96x768xbf16, #tpu.memory_space<vmem>>, %arg22: memref<3x4x4xbf16, #tpu.memory_space<vmem>>, %arg23: memref<4x1xf32, #tpu.memory_space<vmem>>, %arg24: memref<72x4xbf16, #tpu.memory_space<vmem>>, %arg25: memref<4x1xf32, #tpu.memory_space<vmem>>, %arg26: memref<16x4xbf16, #tpu.memory_space<vmem>>, %arg27: memref<16x4xbf16, #tpu.memory_space<vmem>>, %arg28: memref<16x1xf32, #tpu.memory_space<vmem>>, %arg29: memref<1x16x256xf32, #tpu.memory_space<vmem>>) attributes {dimension_semantics = [#tpu.dimension_semantics<parallel>], iteration_bounds = array<i64: 2>, scalar_prefetch = 0 : i64, scratch_operands = 0 : i64, tpu.core_type = #tpu.core_type<tc>, window_params = [{transform_indices = @transform_0, window_bounds = array<i64: 1, 16, 256>}, {pipeline_mode = #tpu.pipeline_mode<synchronous>, transform_indices = @transform_1, window_bounds = array<i64: 4, 16>}, {pipeline_mode = #tpu.pipeline_mode<synchronous>, transform_indices = @transform_2, window_bounds = array<i64: 4, 1>}, {pipeline_mode = #tpu.pipeline_mode<synchronous>, transform_indices = @transform_3, window_bounds = array<i64: 4, 16>}, {pipeline_mode = #tpu.pipeline_mode<synchronous>, transform_indices = @transform_4, window_bounds = array<i64: 4, 1>}, {pipeline_mode = #tpu.pipeline_mode<synchronous>, transform_indices = @transform_5, window_bounds = array<i64: 9, 256>}, {pipeline_mode = #tpu.pipeline_mode<synchronous>, transform_indices = @transform_6, window_bounds = array<i64: 72, 4>}, {pipeline_mode = #tpu.pipeline_mode<synchronous>, transform_indices = @transform_7, window_bounds = array<i64: 4, 1>}, {pipeline_mode = #tpu.pipeline_mode<synchronous>, transform_indices = @transform_8, window_bounds = array<i64: 256, 16>}, {pipeline_mode = #tpu.pipeline_mode<synchronous>, transform_indices = @transform_9, window_bounds = array<i64: 16, 2304>}, {pipeline_mode = #tpu.pipeline_mode<synchronous>, transform_indices = @transform_10, window_bounds = array<i64: 9, 4, 4>}, {pipeline_mode = #tpu.pipeline_mode<synchronous>, transform_indices = @transform_11, window_bounds = array<i64: 256, 64>}, {pipeline_mode = #tpu.pipeline_mode<synchronous>, transform_indices = @transform_12, window_bounds = array<i64: 64, 2304>}, {pipeline_mode = #tpu.pipeline_mode<synchronous>, transform_indices = @transform_13, window_bounds = array<i64: 9, 4, 4>}, {pipeline_mode = #tpu.pipeline_mode<synchronous>, transform_indices = @transform_14, window_bounds = array<i64: 72, 4>}, {pipeline_mode = #tpu.pipeline_mode<synchronous>, transform_indices = @transform_15, window_bounds = array<i64: 4, 1>}, {pipeline_mode = #tpu.pipeline_mode<synchronous>, transform_indices = @transform_16, window_bounds = array<i64: 256, 96>}, {pipeline_mode = #tpu.pipeline_mode<synchronous>, transform_indices = @transform_17, window_bounds = array<i64: 96, 768>}, {pipeline_mode = #tpu.pipeline_mode<synchronous>, transform_indices = @transform_18, window_bounds = array<i64: 3, 4, 4>}, {pipeline_mode = #tpu.pipeline_mode<synchronous>, transform_indices = @transform_19, window_bounds = array<i64: 256, 96>}, {pipeline_mode = #tpu.pipeline_mode<synchronous>, transform_indices = @transform_20, window_bounds = array<i64: 96, 768>}, {pipeline_mode = #tpu.pipeline_mode<synchronous>, transform_indices = @transform_21, window_bounds = array<i64: 3, 4, 4>}, {pipeline_mode = #tpu.pipeline_mode<synchronous>, transform_indices = @transform_22, window_bounds = array<i64: 4, 1>}, {pipeline_mode = #tpu.pipeline_mode<synchronous>, transform_indices = @transform_23, window_bounds = array<i64: 72, 4>}, {pipeline_mode = #tpu.pipeline_mode<synchronous>, transform_indices = @transform_24, window_bounds = array<i64: 4, 1>}, {pipeline_mode = #tpu.pipeline_mode<synchronous>, transform_indices = @transform_25, window_bounds = array<i64: 16, 4>}, {pipeline_mode = #tpu.pipeline_mode<synchronous>, transform_indices = @transform_26, window_bounds = array<i64: 16, 4>}, {pipeline_mode = #tpu.pipeline_mode<synchronous>, transform_indices = @transform_27, window_bounds = array<i64: 16, 1>}, {transform_indices = @transform_28, window_bounds = array<i64: 1, 16, 256>}]} {
    %c0 = arith.constant 0 : index
    %c0_0 = arith.constant 0 : index
    %c0_1 = arith.constant 0 : index
    %0 = vector.load %arg1[%c0, %c0_0, %c0_1] : memref<1x16x256xf32, #tpu.memory_space<vmem>>, vector<1x16x256xf32>
    %1 = vector.shape_cast %0 : vector<1x16x256xf32> to vector<16x256xf32>
    %c0_2 = arith.constant 0 : index
    %c0_3 = arith.constant 0 : index
    %2 = vector.load %arg6[%c0_2, %c0_3] : memref<9x256xf32, #tpu.memory_space<vmem>>, vector<9x256xf32>
    %3 = arith.truncf %1 : vector<16x256xf32> to vector<16x256xbf16>
    %c0_4 = arith.constant 0 : index
    %c0_5 = arith.constant 0 : index
    %4 = vector.load %arg2[%c0_4, %c0_5] : memref<4x16xbf16, #tpu.memory_space<vmem>>, vector<4x16xbf16>
    %cst = arith.constant dense<0.000000e+00> : vector<4x256xf32>
    %5 = tpu.matmul %4, %3, %cst {dimension_numbers = #tpu.dot_dimension_numbers<[1], [0], [0], [1], [0, 0, 1, 1], [], []>} : vector<4x16xbf16>, vector<16x256xbf16>, vector<4x256xf32> -> vector<4x256xf32>
    %c0_6 = arith.constant 0 : index
    %c0_7 = arith.constant 0 : index
    %6 = vector.load %arg3[%c0_6, %c0_7] : memref<4x1xf32, #tpu.memory_space<vmem>>, vector<4x1xf32>
    %7 = vector.broadcast %6 : vector<4x1xf32> to vector<4x256xf32>
    %8 = arith.addf %5, %7 : vector<4x256xf32>
    %cst_8 = arith.constant 0.000000e+00 : f32
    %9 = vector.broadcast %cst_8 : f32 to vector<4x256xf32>
    %10 = arith.maximumf %8, %9 : vector<4x256xf32>
    %c0_9 = arith.constant 0 : index
    %c0_10 = arith.constant 0 : index
    %11 = vector.load %arg4[%c0_9, %c0_10] : memref<4x16xbf16, #tpu.memory_space<vmem>>, vector<4x16xbf16>
    %cst_11 = arith.constant dense<0.000000e+00> : vector<4x256xf32>
    %12 = tpu.matmul %11, %3, %cst_11 {dimension_numbers = #tpu.dot_dimension_numbers<[1], [0], [0], [1], [0, 0, 1, 1], [], []>} : vector<4x16xbf16>, vector<16x256xbf16>, vector<4x256xf32> -> vector<4x256xf32>
    %c0_12 = arith.constant 0 : index
    %c0_13 = arith.constant 0 : index
    %13 = vector.load %arg5[%c0_12, %c0_13] : memref<4x1xf32, #tpu.memory_space<vmem>>, vector<4x1xf32>
    %14 = vector.broadcast %13 : vector<4x1xf32> to vector<4x256xf32>
    %15 = arith.addf %12, %14 : vector<4x256xf32>
    %cst_14 = arith.constant 0.000000e+00 : f32
    %16 = vector.broadcast %cst_14 : f32 to vector<4x256xf32>
    %17 = arith.maximumf %15, %16 : vector<4x256xf32>
    %18 = arith.truncf %10 : vector<4x256xf32> to vector<4x256xbf16>
    %19 = arith.truncf %17 : vector<4x256xf32> to vector<4x256xbf16>
    %c0_15 = arith.constant 0 : index
    %c0_16 = arith.constant 0 : index
    %20 = vector.load %arg7[%c0_15, %c0_16] : memref<72x4xbf16, #tpu.memory_space<vmem>>, vector<72x4xbf16>
    %cst_17 = arith.constant dense<0.000000e+00> : vector<72x256xf32>
    %21 = tpu.matmul %20, %18, %cst_17 {dimension_numbers = #tpu.dot_dimension_numbers<[1], [0], [0], [1], [0, 0, 1, 1], [], []>} : vector<72x4xbf16>, vector<4x256xbf16>, vector<72x256xf32> -> vector<72x256xf32>
    %22 = vector.extract_strided_slice %21 {offsets = [0, 0], sizes = [8, 256], strides = [1, 1]} : vector<72x256xf32> to vector<8x256xf32>
    %c17_i32 = arith.constant 17 : i32
    %23 = tpu.dynamic_rotate %22 by %c17_i32 dim 1 : vector<8x256xf32>, i32 -> vector<8x256xf32>
    %24 = vector.extract_strided_slice %2 {offsets = [0, 0], sizes = [1, 256], strides = [1, 1]} : vector<9x256xf32> to vector<1x256xf32>
    %25 = vector.broadcast %24 : vector<1x256xf32> to vector<8x256xf32>
    %26 = arith.mulf %23, %25 : vector<8x256xf32>
    %27 = vector.extract_strided_slice %21 {offsets = [8, 0], sizes = [8, 256], strides = [1, 1]} : vector<72x256xf32> to vector<8x256xf32>
    %c16_i32 = arith.constant 16 : i32
    %28 = tpu.dynamic_rotate %27 by %c16_i32 dim 1 : vector<8x256xf32>, i32 -> vector<8x256xf32>
    %29 = vector.extract_strided_slice %2 {offsets = [1, 0], sizes = [1, 256], strides = [1, 1]} : vector<9x256xf32> to vector<1x256xf32>
    %30 = vector.broadcast %29 : vector<1x256xf32> to vector<8x256xf32>
    %31 = arith.mulf %28, %30 : vector<8x256xf32>
    %32 = arith.addf %26, %31 : vector<8x256xf32>
    %33 = vector.extract_strided_slice %21 {offsets = [16, 0], sizes = [8, 256], strides = [1, 1]} : vector<72x256xf32> to vector<8x256xf32>
    %c15_i32 = arith.constant 15 : i32
    %34 = tpu.dynamic_rotate %33 by %c15_i32 dim 1 : vector<8x256xf32>, i32 -> vector<8x256xf32>
    %35 = vector.extract_strided_slice %2 {offsets = [2, 0], sizes = [1, 256], strides = [1, 1]} : vector<9x256xf32> to vector<1x256xf32>
    %36 = vector.broadcast %35 : vector<1x256xf32> to vector<8x256xf32>
    %37 = arith.mulf %34, %36 : vector<8x256xf32>
    %38 = arith.addf %32, %37 : vector<8x256xf32>
    %39 = vector.extract_strided_slice %21 {offsets = [24, 0], sizes = [8, 256], strides = [1, 1]} : vector<72x256xf32> to vector<8x256xf32>
    %c1_i32 = arith.constant 1 : i32
    %40 = tpu.dynamic_rotate %39 by %c1_i32 dim 1 : vector<8x256xf32>, i32 -> vector<8x256xf32>
    %41 = vector.extract_strided_slice %2 {offsets = [3, 0], sizes = [1, 256], strides = [1, 1]} : vector<9x256xf32> to vector<1x256xf32>
    %42 = vector.broadcast %41 : vector<1x256xf32> to vector<8x256xf32>
    %43 = arith.mulf %40, %42 : vector<8x256xf32>
    %44 = arith.addf %38, %43 : vector<8x256xf32>
    %45 = vector.extract_strided_slice %21 {offsets = [32, 0], sizes = [8, 256], strides = [1, 1]} : vector<72x256xf32> to vector<8x256xf32>
    %46 = vector.extract_strided_slice %2 {offsets = [4, 0], sizes = [1, 256], strides = [1, 1]} : vector<9x256xf32> to vector<1x256xf32>
    %47 = vector.broadcast %46 : vector<1x256xf32> to vector<8x256xf32>
    %48 = arith.mulf %45, %47 : vector<8x256xf32>
    %49 = arith.addf %44, %48 : vector<8x256xf32>
    %50 = vector.extract_strided_slice %21 {offsets = [40, 0], sizes = [8, 256], strides = [1, 1]} : vector<72x256xf32> to vector<8x256xf32>
    %c255_i32 = arith.constant 255 : i32
    %51 = tpu.dynamic_rotate %50 by %c255_i32 dim 1 : vector<8x256xf32>, i32 -> vector<8x256xf32>
    %52 = vector.extract_strided_slice %2 {offsets = [5, 0], sizes = [1, 256], strides = [1, 1]} : vector<9x256xf32> to vector<1x256xf32>
    %53 = vector.broadcast %52 : vector<1x256xf32> to vector<8x256xf32>
    %54 = arith.mulf %51, %53 : vector<8x256xf32>
    %55 = arith.addf %49, %54 : vector<8x256xf32>
    %56 = vector.extract_strided_slice %21 {offsets = [48, 0], sizes = [8, 256], strides = [1, 1]} : vector<72x256xf32> to vector<8x256xf32>
    %c241_i32 = arith.constant 241 : i32
    %57 = tpu.dynamic_rotate %56 by %c241_i32 dim 1 : vector<8x256xf32>, i32 -> vector<8x256xf32>
    %58 = vector.extract_strided_slice %2 {offsets = [6, 0], sizes = [1, 256], strides = [1, 1]} : vector<9x256xf32> to vector<1x256xf32>
    %59 = vector.broadcast %58 : vector<1x256xf32> to vector<8x256xf32>
    %60 = arith.mulf %57, %59 : vector<8x256xf32>
    %61 = arith.addf %55, %60 : vector<8x256xf32>
    %62 = vector.extract_strided_slice %21 {offsets = [56, 0], sizes = [8, 256], strides = [1, 1]} : vector<72x256xf32> to vector<8x256xf32>
    %c240_i32 = arith.constant 240 : i32
    %63 = tpu.dynamic_rotate %62 by %c240_i32 dim 1 : vector<8x256xf32>, i32 -> vector<8x256xf32>
    %64 = vector.extract_strided_slice %2 {offsets = [7, 0], sizes = [1, 256], strides = [1, 1]} : vector<9x256xf32> to vector<1x256xf32>
    %65 = vector.broadcast %64 : vector<1x256xf32> to vector<8x256xf32>
    %66 = arith.mulf %63, %65 : vector<8x256xf32>
    %67 = arith.addf %61, %66 : vector<8x256xf32>
    %68 = vector.extract_strided_slice %21 {offsets = [64, 0], sizes = [8, 256], strides = [1, 1]} : vector<72x256xf32> to vector<8x256xf32>
    %c239_i32 = arith.constant 239 : i32
    %69 = tpu.dynamic_rotate %68 by %c239_i32 dim 1 : vector<8x256xf32>, i32 -> vector<8x256xf32>
    %70 = vector.extract_strided_slice %2 {offsets = [8, 0], sizes = [1, 256], strides = [1, 1]} : vector<9x256xf32> to vector<1x256xf32>
    %71 = vector.broadcast %70 : vector<1x256xf32> to vector<8x256xf32>
    %72 = arith.mulf %69, %71 : vector<8x256xf32>
    %73 = arith.addf %67, %72 : vector<8x256xf32>
    %74 = vector.extract_strided_slice %73 {offsets = [0, 0], sizes = [4, 256], strides = [1, 1]} : vector<8x256xf32> to vector<4x256xf32>
    %c0_18 = arith.constant 0 : index
    %c0_19 = arith.constant 0 : index
    %75 = vector.load %arg9[%c0_18, %c0_19] : memref<256x16xbf16, #tpu.memory_space<vmem>>, vector<256x16xbf16>
    %cst_20 = arith.constant dense<0.000000e+00> : vector<4x16xf32>
    %76 = tpu.matmul %18, %75, %cst_20 {dimension_numbers = #tpu.dot_dimension_numbers<[1], [0], [0], [1], [0, 0, 1, 1], [], []>} : vector<4x256xbf16>, vector<256x16xbf16>, vector<4x16xf32> -> vector<4x16xf32>
    %77 = arith.truncf %76 : vector<4x16xf32> to vector<4x16xbf16>
    %c0_21 = arith.constant 0 : index
    %c0_22 = arith.constant 0 : index
    %78 = vector.load %arg10[%c0_21, %c0_22] : memref<16x2304xbf16, #tpu.memory_space<vmem>>, vector<16x2304xbf16>
    %cst_23 = arith.constant dense<0.000000e+00> : vector<4x2304xf32>
    %79 = tpu.matmul %77, %78, %cst_23 {dimension_numbers = #tpu.dot_dimension_numbers<[1], [0], [0], [1], [0, 0, 1, 1], [], []>} : vector<4x16xbf16>, vector<16x2304xbf16>, vector<4x2304xf32> -> vector<4x2304xf32>
    %80 = arith.truncf %79 : vector<4x2304xf32> to vector<4x2304xbf16>
    %c0_24 = arith.constant 0 : index
    %c0_25 = arith.constant 0 : index
    %c0_26 = arith.constant 0 : index
    %81 = vector.load %arg11[%c0_24, %c0_25, %c0_26] : memref<9x4x4xbf16, #tpu.memory_space<vmem>>, vector<1x4x4xbf16>
    %82 = vector.shape_cast %81 : vector<1x4x4xbf16> to vector<4x4xbf16>
    %83 = vector.extract_strided_slice %80 {offsets = [0, 0], sizes = [4, 256], strides = [1, 1]} : vector<4x2304xbf16> to vector<4x256xbf16>
    %cst_27 = arith.constant dense<0.000000e+00> : vector<4x256xf32>
    %84 = tpu.matmul %82, %83, %cst_27 {dimension_numbers = #tpu.dot_dimension_numbers<[1], [0], [0], [1], [0, 0, 1, 1], [], []>} : vector<4x4xbf16>, vector<4x256xbf16>, vector<4x256xf32> -> vector<4x256xf32>
    %c1 = arith.constant 1 : index
    %c0_28 = arith.constant 0 : index
    %c0_29 = arith.constant 0 : index
    %85 = vector.load %arg11[%c1, %c0_28, %c0_29] : memref<9x4x4xbf16, #tpu.memory_space<vmem>>, vector<1x4x4xbf16>
    %86 = vector.shape_cast %85 : vector<1x4x4xbf16> to vector<4x4xbf16>
    %87 = vector.extract_strided_slice %80 {offsets = [0, 256], sizes = [4, 256], strides = [1, 1]} : vector<4x2304xbf16> to vector<4x256xbf16>
    %cst_30 = arith.constant dense<0.000000e+00> : vector<4x256xf32>
    %88 = tpu.matmul %86, %87, %cst_30 {dimension_numbers = #tpu.dot_dimension_numbers<[1], [0], [0], [1], [0, 0, 1, 1], [], []>} : vector<4x4xbf16>, vector<4x256xbf16>, vector<4x256xf32> -> vector<4x256xf32>
    %89 = arith.addf %84, %88 : vector<4x256xf32>
    %c2 = arith.constant 2 : index
    %c0_31 = arith.constant 0 : index
    %c0_32 = arith.constant 0 : index
    %90 = vector.load %arg11[%c2, %c0_31, %c0_32] : memref<9x4x4xbf16, #tpu.memory_space<vmem>>, vector<1x4x4xbf16>
    %91 = vector.shape_cast %90 : vector<1x4x4xbf16> to vector<4x4xbf16>
    %92 = vector.extract_strided_slice %80 {offsets = [0, 512], sizes = [4, 256], strides = [1, 1]} : vector<4x2304xbf16> to vector<4x256xbf16>
    %cst_33 = arith.constant dense<0.000000e+00> : vector<4x256xf32>
    %93 = tpu.matmul %91, %92, %cst_33 {dimension_numbers = #tpu.dot_dimension_numbers<[1], [0], [0], [1], [0, 0, 1, 1], [], []>} : vector<4x4xbf16>, vector<4x256xbf16>, vector<4x256xf32> -> vector<4x256xf32>
    %94 = arith.addf %89, %93 : vector<4x256xf32>
    %c3 = arith.constant 3 : index
    %c0_34 = arith.constant 0 : index
    %c0_35 = arith.constant 0 : index
    %95 = vector.load %arg11[%c3, %c0_34, %c0_35] : memref<9x4x4xbf16, #tpu.memory_space<vmem>>, vector<1x4x4xbf16>
    %96 = vector.shape_cast %95 : vector<1x4x4xbf16> to vector<4x4xbf16>
    %97 = vector.extract_strided_slice %80 {offsets = [0, 768], sizes = [4, 256], strides = [1, 1]} : vector<4x2304xbf16> to vector<4x256xbf16>
    %cst_36 = arith.constant dense<0.000000e+00> : vector<4x256xf32>
    %98 = tpu.matmul %96, %97, %cst_36 {dimension_numbers = #tpu.dot_dimension_numbers<[1], [0], [0], [1], [0, 0, 1, 1], [], []>} : vector<4x4xbf16>, vector<4x256xbf16>, vector<4x256xf32> -> vector<4x256xf32>
    %99 = arith.addf %94, %98 : vector<4x256xf32>
    %c4 = arith.constant 4 : index
    %c0_37 = arith.constant 0 : index
    %c0_38 = arith.constant 0 : index
    %100 = vector.load %arg11[%c4, %c0_37, %c0_38] : memref<9x4x4xbf16, #tpu.memory_space<vmem>>, vector<1x4x4xbf16>
    %101 = vector.shape_cast %100 : vector<1x4x4xbf16> to vector<4x4xbf16>
    %102 = vector.extract_strided_slice %80 {offsets = [0, 1024], sizes = [4, 256], strides = [1, 1]} : vector<4x2304xbf16> to vector<4x256xbf16>
    %cst_39 = arith.constant dense<0.000000e+00> : vector<4x256xf32>
    %103 = tpu.matmul %101, %102, %cst_39 {dimension_numbers = #tpu.dot_dimension_numbers<[1], [0], [0], [1], [0, 0, 1, 1], [], []>} : vector<4x4xbf16>, vector<4x256xbf16>, vector<4x256xf32> -> vector<4x256xf32>
    %104 = arith.addf %99, %103 : vector<4x256xf32>
    %c5 = arith.constant 5 : index
    %c0_40 = arith.constant 0 : index
    %c0_41 = arith.constant 0 : index
    %105 = vector.load %arg11[%c5, %c0_40, %c0_41] : memref<9x4x4xbf16, #tpu.memory_space<vmem>>, vector<1x4x4xbf16>
    %106 = vector.shape_cast %105 : vector<1x4x4xbf16> to vector<4x4xbf16>
    %107 = vector.extract_strided_slice %80 {offsets = [0, 1280], sizes = [4, 256], strides = [1, 1]} : vector<4x2304xbf16> to vector<4x256xbf16>
    %cst_42 = arith.constant dense<0.000000e+00> : vector<4x256xf32>
    %108 = tpu.matmul %106, %107, %cst_42 {dimension_numbers = #tpu.dot_dimension_numbers<[1], [0], [0], [1], [0, 0, 1, 1], [], []>} : vector<4x4xbf16>, vector<4x256xbf16>, vector<4x256xf32> -> vector<4x256xf32>
    %109 = arith.addf %104, %108 : vector<4x256xf32>
    %c6 = arith.constant 6 : index
    %c0_43 = arith.constant 0 : index
    %c0_44 = arith.constant 0 : index
    %110 = vector.load %arg11[%c6, %c0_43, %c0_44] : memref<9x4x4xbf16, #tpu.memory_space<vmem>>, vector<1x4x4xbf16>
    %111 = vector.shape_cast %110 : vector<1x4x4xbf16> to vector<4x4xbf16>
    %112 = vector.extract_strided_slice %80 {offsets = [0, 1536], sizes = [4, 256], strides = [1, 1]} : vector<4x2304xbf16> to vector<4x256xbf16>
    %cst_45 = arith.constant dense<0.000000e+00> : vector<4x256xf32>
    %113 = tpu.matmul %111, %112, %cst_45 {dimension_numbers = #tpu.dot_dimension_numbers<[1], [0], [0], [1], [0, 0, 1, 1], [], []>} : vector<4x4xbf16>, vector<4x256xbf16>, vector<4x256xf32> -> vector<4x256xf32>
    %114 = arith.addf %109, %113 : vector<4x256xf32>
    %c7 = arith.constant 7 : index
    %c0_46 = arith.constant 0 : index
    %c0_47 = arith.constant 0 : index
    %115 = vector.load %arg11[%c7, %c0_46, %c0_47] : memref<9x4x4xbf16, #tpu.memory_space<vmem>>, vector<1x4x4xbf16>
    %116 = vector.shape_cast %115 : vector<1x4x4xbf16> to vector<4x4xbf16>
    %117 = vector.extract_strided_slice %80 {offsets = [0, 1792], sizes = [4, 256], strides = [1, 1]} : vector<4x2304xbf16> to vector<4x256xbf16>
    %cst_48 = arith.constant dense<0.000000e+00> : vector<4x256xf32>
    %118 = tpu.matmul %116, %117, %cst_48 {dimension_numbers = #tpu.dot_dimension_numbers<[1], [0], [0], [1], [0, 0, 1, 1], [], []>} : vector<4x4xbf16>, vector<4x256xbf16>, vector<4x256xf32> -> vector<4x256xf32>
    %119 = arith.addf %114, %118 : vector<4x256xf32>
    %c8 = arith.constant 8 : index
    %c0_49 = arith.constant 0 : index
    %c0_50 = arith.constant 0 : index
    %120 = vector.load %arg11[%c8, %c0_49, %c0_50] : memref<9x4x4xbf16, #tpu.memory_space<vmem>>, vector<1x4x4xbf16>
    %121 = vector.shape_cast %120 : vector<1x4x4xbf16> to vector<4x4xbf16>
    %122 = vector.extract_strided_slice %80 {offsets = [0, 2048], sizes = [4, 256], strides = [1, 1]} : vector<4x2304xbf16> to vector<4x256xbf16>
    %cst_51 = arith.constant dense<0.000000e+00> : vector<4x256xf32>
    %123 = tpu.matmul %121, %122, %cst_51 {dimension_numbers = #tpu.dot_dimension_numbers<[1], [0], [0], [1], [0, 0, 1, 1], [], []>} : vector<4x4xbf16>, vector<4x256xbf16>, vector<4x256xf32> -> vector<4x256xf32>
    %124 = arith.addf %119, %123 : vector<4x256xf32>
    %125 = arith.addf %74, %124 : vector<4x256xf32>
    %c0_52 = arith.constant 0 : index
    %c0_53 = arith.constant 0 : index
    %126 = vector.load %arg12[%c0_52, %c0_53] : memref<256x64xbf16, #tpu.memory_space<vmem>>, vector<256x64xbf16>
    %cst_54 = arith.constant dense<0.000000e+00> : vector<4x64xf32>
    %127 = tpu.matmul %18, %126, %cst_54 {dimension_numbers = #tpu.dot_dimension_numbers<[1], [0], [0], [1], [0, 0, 1, 1], [], []>} : vector<4x256xbf16>, vector<256x64xbf16>, vector<4x64xf32> -> vector<4x64xf32>
    %128 = arith.truncf %127 : vector<4x64xf32> to vector<4x64xbf16>
    %c0_55 = arith.constant 0 : index
    %c0_56 = arith.constant 0 : index
    %129 = vector.load %arg13[%c0_55, %c0_56] : memref<64x2304xbf16, #tpu.memory_space<vmem>>, vector<64x2304xbf16>
    %cst_57 = arith.constant dense<0.000000e+00> : vector<4x2304xf32>
    %130 = tpu.matmul %128, %129, %cst_57 {dimension_numbers = #tpu.dot_dimension_numbers<[1], [0], [0], [1], [0, 0, 1, 1], [], []>} : vector<4x64xbf16>, vector<64x2304xbf16>, vector<4x2304xf32> -> vector<4x2304xf32>
    %131 = arith.truncf %130 : vector<4x2304xf32> to vector<4x2304xbf16>
    %c0_58 = arith.constant 0 : index
    %c0_59 = arith.constant 0 : index
    %c0_60 = arith.constant 0 : index
    %132 = vector.load %arg14[%c0_58, %c0_59, %c0_60] : memref<9x4x4xbf16, #tpu.memory_space<vmem>>, vector<1x4x4xbf16>
    %133 = vector.shape_cast %132 : vector<1x4x4xbf16> to vector<4x4xbf16>
    %134 = vector.extract_strided_slice %131 {offsets = [0, 0], sizes = [4, 256], strides = [1, 1]} : vector<4x2304xbf16> to vector<4x256xbf16>
    %cst_61 = arith.constant dense<0.000000e+00> : vector<4x256xf32>
    %135 = tpu.matmul %133, %134, %cst_61 {dimension_numbers = #tpu.dot_dimension_numbers<[1], [0], [0], [1], [0, 0, 1, 1], [], []>} : vector<4x4xbf16>, vector<4x256xbf16>, vector<4x256xf32> -> vector<4x256xf32>
    %c1_62 = arith.constant 1 : index
    %c0_63 = arith.constant 0 : index
    %c0_64 = arith.constant 0 : index
    %136 = vector.load %arg14[%c1_62, %c0_63, %c0_64] : memref<9x4x4xbf16, #tpu.memory_space<vmem>>, vector<1x4x4xbf16>
    %137 = vector.shape_cast %136 : vector<1x4x4xbf16> to vector<4x4xbf16>
    %138 = vector.extract_strided_slice %131 {offsets = [0, 256], sizes = [4, 256], strides = [1, 1]} : vector<4x2304xbf16> to vector<4x256xbf16>
    %cst_65 = arith.constant dense<0.000000e+00> : vector<4x256xf32>
    %139 = tpu.matmul %137, %138, %cst_65 {dimension_numbers = #tpu.dot_dimension_numbers<[1], [0], [0], [1], [0, 0, 1, 1], [], []>} : vector<4x4xbf16>, vector<4x256xbf16>, vector<4x256xf32> -> vector<4x256xf32>
    %140 = arith.addf %135, %139 : vector<4x256xf32>
    %c2_66 = arith.constant 2 : index
    %c0_67 = arith.constant 0 : index
    %c0_68 = arith.constant 0 : index
    %141 = vector.load %arg14[%c2_66, %c0_67, %c0_68] : memref<9x4x4xbf16, #tpu.memory_space<vmem>>, vector<1x4x4xbf16>
    %142 = vector.shape_cast %141 : vector<1x4x4xbf16> to vector<4x4xbf16>
    %143 = vector.extract_strided_slice %131 {offsets = [0, 512], sizes = [4, 256], strides = [1, 1]} : vector<4x2304xbf16> to vector<4x256xbf16>
    %cst_69 = arith.constant dense<0.000000e+00> : vector<4x256xf32>
    %144 = tpu.matmul %142, %143, %cst_69 {dimension_numbers = #tpu.dot_dimension_numbers<[1], [0], [0], [1], [0, 0, 1, 1], [], []>} : vector<4x4xbf16>, vector<4x256xbf16>, vector<4x256xf32> -> vector<4x256xf32>
    %145 = arith.addf %140, %144 : vector<4x256xf32>
    %c3_70 = arith.constant 3 : index
    %c0_71 = arith.constant 0 : index
    %c0_72 = arith.constant 0 : index
    %146 = vector.load %arg14[%c3_70, %c0_71, %c0_72] : memref<9x4x4xbf16, #tpu.memory_space<vmem>>, vector<1x4x4xbf16>
    %147 = vector.shape_cast %146 : vector<1x4x4xbf16> to vector<4x4xbf16>
    %148 = vector.extract_strided_slice %131 {offsets = [0, 768], sizes = [4, 256], strides = [1, 1]} : vector<4x2304xbf16> to vector<4x256xbf16>
    %cst_73 = arith.constant dense<0.000000e+00> : vector<4x256xf32>
    %149 = tpu.matmul %147, %148, %cst_73 {dimension_numbers = #tpu.dot_dimension_numbers<[1], [0], [0], [1], [0, 0, 1, 1], [], []>} : vector<4x4xbf16>, vector<4x256xbf16>, vector<4x256xf32> -> vector<4x256xf32>
    %150 = arith.addf %145, %149 : vector<4x256xf32>
    %c4_74 = arith.constant 4 : index
    %c0_75 = arith.constant 0 : index
    %c0_76 = arith.constant 0 : index
    %151 = vector.load %arg14[%c4_74, %c0_75, %c0_76] : memref<9x4x4xbf16, #tpu.memory_space<vmem>>, vector<1x4x4xbf16>
    %152 = vector.shape_cast %151 : vector<1x4x4xbf16> to vector<4x4xbf16>
    %153 = vector.extract_strided_slice %131 {offsets = [0, 1024], sizes = [4, 256], strides = [1, 1]} : vector<4x2304xbf16> to vector<4x256xbf16>
    %cst_77 = arith.constant dense<0.000000e+00> : vector<4x256xf32>
    %154 = tpu.matmul %152, %153, %cst_77 {dimension_numbers = #tpu.dot_dimension_numbers<[1], [0], [0], [1], [0, 0, 1, 1], [], []>} : vector<4x4xbf16>, vector<4x256xbf16>, vector<4x256xf32> -> vector<4x256xf32>
    %155 = arith.addf %150, %154 : vector<4x256xf32>
    %c5_78 = arith.constant 5 : index
    %c0_79 = arith.constant 0 : index
    %c0_80 = arith.constant 0 : index
    %156 = vector.load %arg14[%c5_78, %c0_79, %c0_80] : memref<9x4x4xbf16, #tpu.memory_space<vmem>>, vector<1x4x4xbf16>
    %157 = vector.shape_cast %156 : vector<1x4x4xbf16> to vector<4x4xbf16>
    %158 = vector.extract_strided_slice %131 {offsets = [0, 1280], sizes = [4, 256], strides = [1, 1]} : vector<4x2304xbf16> to vector<4x256xbf16>
    %cst_81 = arith.constant dense<0.000000e+00> : vector<4x256xf32>
    %159 = tpu.matmul %157, %158, %cst_81 {dimension_numbers = #tpu.dot_dimension_numbers<[1], [0], [0], [1], [0, 0, 1, 1], [], []>} : vector<4x4xbf16>, vector<4x256xbf16>, vector<4x256xf32> -> vector<4x256xf32>
    %160 = arith.addf %155, %159 : vector<4x256xf32>
    %c6_82 = arith.constant 6 : index
    %c0_83 = arith.constant 0 : index
    %c0_84 = arith.constant 0 : index
    %161 = vector.load %arg14[%c6_82, %c0_83, %c0_84] : memref<9x4x4xbf16, #tpu.memory_space<vmem>>, vector<1x4x4xbf16>
    %162 = vector.shape_cast %161 : vector<1x4x4xbf16> to vector<4x4xbf16>
    %163 = vector.extract_strided_slice %131 {offsets = [0, 1536], sizes = [4, 256], strides = [1, 1]} : vector<4x2304xbf16> to vector<4x256xbf16>
    %cst_85 = arith.constant dense<0.000000e+00> : vector<4x256xf32>
    %164 = tpu.matmul %162, %163, %cst_85 {dimension_numbers = #tpu.dot_dimension_numbers<[1], [0], [0], [1], [0, 0, 1, 1], [], []>} : vector<4x4xbf16>, vector<4x256xbf16>, vector<4x256xf32> -> vector<4x256xf32>
    %165 = arith.addf %160, %164 : vector<4x256xf32>
    %c7_86 = arith.constant 7 : index
    %c0_87 = arith.constant 0 : index
    %c0_88 = arith.constant 0 : index
    %166 = vector.load %arg14[%c7_86, %c0_87, %c0_88] : memref<9x4x4xbf16, #tpu.memory_space<vmem>>, vector<1x4x4xbf16>
    %167 = vector.shape_cast %166 : vector<1x4x4xbf16> to vector<4x4xbf16>
    %168 = vector.extract_strided_slice %131 {offsets = [0, 1792], sizes = [4, 256], strides = [1, 1]} : vector<4x2304xbf16> to vector<4x256xbf16>
    %cst_89 = arith.constant dense<0.000000e+00> : vector<4x256xf32>
    %169 = tpu.matmul %167, %168, %cst_89 {dimension_numbers = #tpu.dot_dimension_numbers<[1], [0], [0], [1], [0, 0, 1, 1], [], []>} : vector<4x4xbf16>, vector<4x256xbf16>, vector<4x256xf32> -> vector<4x256xf32>
    %170 = arith.addf %165, %169 : vector<4x256xf32>
    %c8_90 = arith.constant 8 : index
    %c0_91 = arith.constant 0 : index
    %c0_92 = arith.constant 0 : index
    %171 = vector.load %arg14[%c8_90, %c0_91, %c0_92] : memref<9x4x4xbf16, #tpu.memory_space<vmem>>, vector<1x4x4xbf16>
    %172 = vector.shape_cast %171 : vector<1x4x4xbf16> to vector<4x4xbf16>
    %173 = vector.extract_strided_slice %131 {offsets = [0, 2048], sizes = [4, 256], strides = [1, 1]} : vector<4x2304xbf16> to vector<4x256xbf16>
    %cst_93 = arith.constant dense<0.000000e+00> : vector<4x256xf32>
    %174 = tpu.matmul %172, %173, %cst_93 {dimension_numbers = #tpu.dot_dimension_numbers<[1], [0], [0], [1], [0, 0, 1, 1], [], []>} : vector<4x4xbf16>, vector<4x256xbf16>, vector<4x256xf32> -> vector<4x256xf32>
    %175 = arith.addf %170, %174 : vector<4x256xf32>
    %176 = arith.addf %125, %175 : vector<4x256xf32>
    %c0_94 = arith.constant 0 : index
    %c0_95 = arith.constant 0 : index
    %177 = vector.load %arg8[%c0_94, %c0_95] : memref<4x1xf32, #tpu.memory_space<vmem>>, vector<4x1xf32>
    %178 = vector.broadcast %177 : vector<4x1xf32> to vector<4x256xf32>
    %179 = arith.addf %176, %178 : vector<4x256xf32>
    %cst_96 = arith.constant 0.000000e+00 : f32
    %180 = vector.broadcast %cst_96 : f32 to vector<4x256xf32>
    %181 = arith.maximumf %179, %180 : vector<4x256xf32>
    %182 = arith.truncf %181 : vector<4x256xf32> to vector<4x256xbf16>
    %c0_97 = arith.constant 0 : index
    %c0_98 = arith.constant 0 : index
    %183 = vector.load %arg15[%c0_97, %c0_98] : memref<72x4xbf16, #tpu.memory_space<vmem>>, vector<72x4xbf16>
    %cst_99 = arith.constant dense<0.000000e+00> : vector<72x256xf32>
    %184 = tpu.matmul %183, %182, %cst_99 {dimension_numbers = #tpu.dot_dimension_numbers<[1], [0], [0], [1], [0, 0, 1, 1], [], []>} : vector<72x4xbf16>, vector<4x256xbf16>, vector<72x256xf32> -> vector<72x256xf32>
    %185 = vector.extract_strided_slice %184 {offsets = [0, 0], sizes = [8, 256], strides = [1, 1]} : vector<72x256xf32> to vector<8x256xf32>
    %c17_i32_100 = arith.constant 17 : i32
    %186 = tpu.dynamic_rotate %185 by %c17_i32_100 dim 1 : vector<8x256xf32>, i32 -> vector<8x256xf32>
    %187 = vector.extract_strided_slice %2 {offsets = [0, 0], sizes = [1, 256], strides = [1, 1]} : vector<9x256xf32> to vector<1x256xf32>
    %188 = vector.broadcast %187 : vector<1x256xf32> to vector<8x256xf32>
    %189 = arith.mulf %186, %188 : vector<8x256xf32>
    %190 = vector.extract_strided_slice %184 {offsets = [8, 0], sizes = [8, 256], strides = [1, 1]} : vector<72x256xf32> to vector<8x256xf32>
    %c16_i32_101 = arith.constant 16 : i32
    %191 = tpu.dynamic_rotate %190 by %c16_i32_101 dim 1 : vector<8x256xf32>, i32 -> vector<8x256xf32>
    %192 = vector.extract_strided_slice %2 {offsets = [1, 0], sizes = [1, 256], strides = [1, 1]} : vector<9x256xf32> to vector<1x256xf32>
    %193 = vector.broadcast %192 : vector<1x256xf32> to vector<8x256xf32>
    %194 = arith.mulf %191, %193 : vector<8x256xf32>
    %195 = arith.addf %189, %194 : vector<8x256xf32>
    %196 = vector.extract_strided_slice %184 {offsets = [16, 0], sizes = [8, 256], strides = [1, 1]} : vector<72x256xf32> to vector<8x256xf32>
    %c15_i32_102 = arith.constant 15 : i32
    %197 = tpu.dynamic_rotate %196 by %c15_i32_102 dim 1 : vector<8x256xf32>, i32 -> vector<8x256xf32>
    %198 = vector.extract_strided_slice %2 {offsets = [2, 0], sizes = [1, 256], strides = [1, 1]} : vector<9x256xf32> to vector<1x256xf32>
    %199 = vector.broadcast %198 : vector<1x256xf32> to vector<8x256xf32>
    %200 = arith.mulf %197, %199 : vector<8x256xf32>
    %201 = arith.addf %195, %200 : vector<8x256xf32>
    %202 = vector.extract_strided_slice %184 {offsets = [24, 0], sizes = [8, 256], strides = [1, 1]} : vector<72x256xf32> to vector<8x256xf32>
    %c1_i32_103 = arith.constant 1 : i32
    %203 = tpu.dynamic_rotate %202 by %c1_i32_103 dim 1 : vector<8x256xf32>, i32 -> vector<8x256xf32>
    %204 = vector.extract_strided_slice %2 {offsets = [3, 0], sizes = [1, 256], strides = [1, 1]} : vector<9x256xf32> to vector<1x256xf32>
    %205 = vector.broadcast %204 : vector<1x256xf32> to vector<8x256xf32>
    %206 = arith.mulf %203, %205 : vector<8x256xf32>
    %207 = arith.addf %201, %206 : vector<8x256xf32>
    %208 = vector.extract_strided_slice %184 {offsets = [32, 0], sizes = [8, 256], strides = [1, 1]} : vector<72x256xf32> to vector<8x256xf32>
    %209 = vector.extract_strided_slice %2 {offsets = [4, 0], sizes = [1, 256], strides = [1, 1]} : vector<9x256xf32> to vector<1x256xf32>
    %210 = vector.broadcast %209 : vector<1x256xf32> to vector<8x256xf32>
    %211 = arith.mulf %208, %210 : vector<8x256xf32>
    %212 = arith.addf %207, %211 : vector<8x256xf32>
    %213 = vector.extract_strided_slice %184 {offsets = [40, 0], sizes = [8, 256], strides = [1, 1]} : vector<72x256xf32> to vector<8x256xf32>
    %c255_i32_104 = arith.constant 255 : i32
    %214 = tpu.dynamic_rotate %213 by %c255_i32_104 dim 1 : vector<8x256xf32>, i32 -> vector<8x256xf32>
    %215 = vector.extract_strided_slice %2 {offsets = [5, 0], sizes = [1, 256], strides = [1, 1]} : vector<9x256xf32> to vector<1x256xf32>
    %216 = vector.broadcast %215 : vector<1x256xf32> to vector<8x256xf32>
    %217 = arith.mulf %214, %216 : vector<8x256xf32>
    %218 = arith.addf %212, %217 : vector<8x256xf32>
    %219 = vector.extract_strided_slice %184 {offsets = [48, 0], sizes = [8, 256], strides = [1, 1]} : vector<72x256xf32> to vector<8x256xf32>
    %c241_i32_105 = arith.constant 241 : i32
    %220 = tpu.dynamic_rotate %219 by %c241_i32_105 dim 1 : vector<8x256xf32>, i32 -> vector<8x256xf32>
    %221 = vector.extract_strided_slice %2 {offsets = [6, 0], sizes = [1, 256], strides = [1, 1]} : vector<9x256xf32> to vector<1x256xf32>
    %222 = vector.broadcast %221 : vector<1x256xf32> to vector<8x256xf32>
    %223 = arith.mulf %220, %222 : vector<8x256xf32>
    %224 = arith.addf %218, %223 : vector<8x256xf32>
    %225 = vector.extract_strided_slice %184 {offsets = [56, 0], sizes = [8, 256], strides = [1, 1]} : vector<72x256xf32> to vector<8x256xf32>
    %c240_i32_106 = arith.constant 240 : i32
    %226 = tpu.dynamic_rotate %225 by %c240_i32_106 dim 1 : vector<8x256xf32>, i32 -> vector<8x256xf32>
    %227 = vector.extract_strided_slice %2 {offsets = [7, 0], sizes = [1, 256], strides = [1, 1]} : vector<9x256xf32> to vector<1x256xf32>
    %228 = vector.broadcast %227 : vector<1x256xf32> to vector<8x256xf32>
    %229 = arith.mulf %226, %228 : vector<8x256xf32>
    %230 = arith.addf %224, %229 : vector<8x256xf32>
    %231 = vector.extract_strided_slice %184 {offsets = [64, 0], sizes = [8, 256], strides = [1, 1]} : vector<72x256xf32> to vector<8x256xf32>
    %c239_i32_107 = arith.constant 239 : i32
    %232 = tpu.dynamic_rotate %231 by %c239_i32_107 dim 1 : vector<8x256xf32>, i32 -> vector<8x256xf32>
    %233 = vector.extract_strided_slice %2 {offsets = [8, 0], sizes = [1, 256], strides = [1, 1]} : vector<9x256xf32> to vector<1x256xf32>
    %234 = vector.broadcast %233 : vector<1x256xf32> to vector<8x256xf32>
    %235 = arith.mulf %232, %234 : vector<8x256xf32>
    %236 = arith.addf %230, %235 : vector<8x256xf32>
    %237 = vector.extract_strided_slice %236 {offsets = [0, 0], sizes = [4, 256], strides = [1, 1]} : vector<8x256xf32> to vector<4x256xf32>
    %c0_108 = arith.constant 0 : index
    %c0_109 = arith.constant 0 : index
    %238 = vector.load %arg16[%c0_108, %c0_109] : memref<4x1xf32, #tpu.memory_space<vmem>>, vector<4x1xf32>
    %239 = vector.broadcast %238 : vector<4x1xf32> to vector<4x256xf32>
    %240 = arith.addf %237, %239 : vector<4x256xf32>
    %cst_110 = arith.constant 0.000000e+00 : f32
    %241 = vector.broadcast %cst_110 : f32 to vector<4x256xf32>
    %242 = arith.maximumf %240, %241 : vector<4x256xf32>
    %c0_111 = arith.constant 0 : index
    %c0_112 = arith.constant 0 : index
    %243 = vector.load %arg17[%c0_111, %c0_112] : memref<256x96xbf16, #tpu.memory_space<vmem>>, vector<256x96xbf16>
    %cst_113 = arith.constant dense<0.000000e+00> : vector<4x96xf32>
    %244 = tpu.matmul %19, %243, %cst_113 {dimension_numbers = #tpu.dot_dimension_numbers<[1], [0], [0], [1], [0, 0, 1, 1], [], []>} : vector<4x256xbf16>, vector<256x96xbf16>, vector<4x96xf32> -> vector<4x96xf32>
    %245 = arith.truncf %244 : vector<4x96xf32> to vector<4x96xbf16>
    %c0_114 = arith.constant 0 : index
    %c0_115 = arith.constant 0 : index
    %246 = vector.load %arg18[%c0_114, %c0_115] : memref<96x768xbf16, #tpu.memory_space<vmem>>, vector<96x768xbf16>
    %cst_116 = arith.constant dense<0.000000e+00> : vector<4x768xf32>
    %247 = tpu.matmul %245, %246, %cst_116 {dimension_numbers = #tpu.dot_dimension_numbers<[1], [0], [0], [1], [0, 0, 1, 1], [], []>} : vector<4x96xbf16>, vector<96x768xbf16>, vector<4x768xf32> -> vector<4x768xf32>
    %248 = arith.truncf %247 : vector<4x768xf32> to vector<4x768xbf16>
    %c0_117 = arith.constant 0 : index
    %c0_118 = arith.constant 0 : index
    %c0_119 = arith.constant 0 : index
    %249 = vector.load %arg19[%c0_117, %c0_118, %c0_119] : memref<3x4x4xbf16, #tpu.memory_space<vmem>>, vector<1x4x4xbf16>
    %250 = vector.shape_cast %249 : vector<1x4x4xbf16> to vector<4x4xbf16>
    %251 = vector.extract_strided_slice %248 {offsets = [0, 0], sizes = [4, 256], strides = [1, 1]} : vector<4x768xbf16> to vector<4x256xbf16>
    %cst_120 = arith.constant dense<0.000000e+00> : vector<4x256xf32>
    %252 = tpu.matmul %250, %251, %cst_120 {dimension_numbers = #tpu.dot_dimension_numbers<[1], [0], [0], [1], [0, 0, 1, 1], [], []>} : vector<4x4xbf16>, vector<4x256xbf16>, vector<4x256xf32> -> vector<4x256xf32>
    %c1_121 = arith.constant 1 : index
    %c0_122 = arith.constant 0 : index
    %c0_123 = arith.constant 0 : index
    %253 = vector.load %arg19[%c1_121, %c0_122, %c0_123] : memref<3x4x4xbf16, #tpu.memory_space<vmem>>, vector<1x4x4xbf16>
    %254 = vector.shape_cast %253 : vector<1x4x4xbf16> to vector<4x4xbf16>
    %255 = vector.extract_strided_slice %248 {offsets = [0, 256], sizes = [4, 256], strides = [1, 1]} : vector<4x768xbf16> to vector<4x256xbf16>
    %cst_124 = arith.constant dense<0.000000e+00> : vector<4x256xf32>
    %256 = tpu.matmul %254, %255, %cst_124 {dimension_numbers = #tpu.dot_dimension_numbers<[1], [0], [0], [1], [0, 0, 1, 1], [], []>} : vector<4x4xbf16>, vector<4x256xbf16>, vector<4x256xf32> -> vector<4x256xf32>
    %257 = arith.addf %252, %256 : vector<4x256xf32>
    %c2_125 = arith.constant 2 : index
    %c0_126 = arith.constant 0 : index
    %c0_127 = arith.constant 0 : index
    %258 = vector.load %arg19[%c2_125, %c0_126, %c0_127] : memref<3x4x4xbf16, #tpu.memory_space<vmem>>, vector<1x4x4xbf16>
    %259 = vector.shape_cast %258 : vector<1x4x4xbf16> to vector<4x4xbf16>
    %260 = vector.extract_strided_slice %248 {offsets = [0, 512], sizes = [4, 256], strides = [1, 1]} : vector<4x768xbf16> to vector<4x256xbf16>
    %cst_128 = arith.constant dense<0.000000e+00> : vector<4x256xf32>
    %261 = tpu.matmul %259, %260, %cst_128 {dimension_numbers = #tpu.dot_dimension_numbers<[1], [0], [0], [1], [0, 0, 1, 1], [], []>} : vector<4x4xbf16>, vector<4x256xbf16>, vector<4x256xf32> -> vector<4x256xf32>
    %262 = arith.addf %257, %261 : vector<4x256xf32>
    %c0_129 = arith.constant 0 : index
    %c0_130 = arith.constant 0 : index
    %263 = vector.load %arg20[%c0_129, %c0_130] : memref<256x96xbf16, #tpu.memory_space<vmem>>, vector<256x96xbf16>
    %cst_131 = arith.constant dense<0.000000e+00> : vector<4x96xf32>
    %264 = tpu.matmul %19, %263, %cst_131 {dimension_numbers = #tpu.dot_dimension_numbers<[1], [0], [0], [1], [0, 0, 1, 1], [], []>} : vector<4x256xbf16>, vector<256x96xbf16>, vector<4x96xf32> -> vector<4x96xf32>
    %265 = arith.truncf %264 : vector<4x96xf32> to vector<4x96xbf16>
    %c0_132 = arith.constant 0 : index
    %c0_133 = arith.constant 0 : index
    %266 = vector.load %arg21[%c0_132, %c0_133] : memref<96x768xbf16, #tpu.memory_space<vmem>>, vector<96x768xbf16>
    %cst_134 = arith.constant dense<0.000000e+00> : vector<4x768xf32>
    %267 = tpu.matmul %265, %266, %cst_134 {dimension_numbers = #tpu.dot_dimension_numbers<[1], [0], [0], [1], [0, 0, 1, 1], [], []>} : vector<4x96xbf16>, vector<96x768xbf16>, vector<4x768xf32> -> vector<4x768xf32>
    %268 = arith.truncf %267 : vector<4x768xf32> to vector<4x768xbf16>
    %c0_135 = arith.constant 0 : index
    %c0_136 = arith.constant 0 : index
    %c0_137 = arith.constant 0 : index
    %269 = vector.load %arg22[%c0_135, %c0_136, %c0_137] : memref<3x4x4xbf16, #tpu.memory_space<vmem>>, vector<1x4x4xbf16>
    %270 = vector.shape_cast %269 : vector<1x4x4xbf16> to vector<4x4xbf16>
    %271 = vector.extract_strided_slice %268 {offsets = [0, 0], sizes = [4, 256], strides = [1, 1]} : vector<4x768xbf16> to vector<4x256xbf16>
    %cst_138 = arith.constant dense<0.000000e+00> : vector<4x256xf32>
    %272 = tpu.matmul %270, %271, %cst_138 {dimension_numbers = #tpu.dot_dimension_numbers<[1], [0], [0], [1], [0, 0, 1, 1], [], []>} : vector<4x4xbf16>, vector<4x256xbf16>, vector<4x256xf32> -> vector<4x256xf32>
    %c1_139 = arith.constant 1 : index
    %c0_140 = arith.constant 0 : index
    %c0_141 = arith.constant 0 : index
    %273 = vector.load %arg22[%c1_139, %c0_140, %c0_141] : memref<3x4x4xbf16, #tpu.memory_space<vmem>>, vector<1x4x4xbf16>
    %274 = vector.shape_cast %273 : vector<1x4x4xbf16> to vector<4x4xbf16>
    %275 = vector.extract_strided_slice %268 {offsets = [0, 256], sizes = [4, 256], strides = [1, 1]} : vector<4x768xbf16> to vector<4x256xbf16>
    %cst_142 = arith.constant dense<0.000000e+00> : vector<4x256xf32>
    %276 = tpu.matmul %274, %275, %cst_142 {dimension_numbers = #tpu.dot_dimension_numbers<[1], [0], [0], [1], [0, 0, 1, 1], [], []>} : vector<4x4xbf16>, vector<4x256xbf16>, vector<4x256xf32> -> vector<4x256xf32>
    %277 = arith.addf %272, %276 : vector<4x256xf32>
    %c2_143 = arith.constant 2 : index
    %c0_144 = arith.constant 0 : index
    %c0_145 = arith.constant 0 : index
    %278 = vector.load %arg22[%c2_143, %c0_144, %c0_145] : memref<3x4x4xbf16, #tpu.memory_space<vmem>>, vector<1x4x4xbf16>
    %279 = vector.shape_cast %278 : vector<1x4x4xbf16> to vector<4x4xbf16>
    %280 = vector.extract_strided_slice %268 {offsets = [0, 512], sizes = [4, 256], strides = [1, 1]} : vector<4x768xbf16> to vector<4x256xbf16>
    %cst_146 = arith.constant dense<0.000000e+00> : vector<4x256xf32>
    %281 = tpu.matmul %279, %280, %cst_146 {dimension_numbers = #tpu.dot_dimension_numbers<[1], [0], [0], [1], [0, 0, 1, 1], [], []>} : vector<4x4xbf16>, vector<4x256xbf16>, vector<4x256xf32> -> vector<4x256xf32>
    %282 = arith.addf %277, %281 : vector<4x256xf32>
    %283 = arith.addf %262, %282 : vector<4x256xf32>
    %c0_147 = arith.constant 0 : index
    %c0_148 = arith.constant 0 : index
    %284 = vector.load %arg23[%c0_147, %c0_148] : memref<4x1xf32, #tpu.memory_space<vmem>>, vector<4x1xf32>
    %285 = vector.broadcast %284 : vector<4x1xf32> to vector<4x256xf32>
    %286 = arith.addf %283, %285 : vector<4x256xf32>
    %cst_149 = arith.constant 0.000000e+00 : f32
    %287 = vector.broadcast %cst_149 : f32 to vector<4x256xf32>
    %288 = arith.maximumf %286, %287 : vector<4x256xf32>
    %289 = arith.truncf %288 : vector<4x256xf32> to vector<4x256xbf16>
    %c0_150 = arith.constant 0 : index
    %c0_151 = arith.constant 0 : index
    %290 = vector.load %arg24[%c0_150, %c0_151] : memref<72x4xbf16, #tpu.memory_space<vmem>>, vector<72x4xbf16>
    %cst_152 = arith.constant dense<0.000000e+00> : vector<72x256xf32>
    %291 = tpu.matmul %290, %289, %cst_152 {dimension_numbers = #tpu.dot_dimension_numbers<[1], [0], [0], [1], [0, 0, 1, 1], [], []>} : vector<72x4xbf16>, vector<4x256xbf16>, vector<72x256xf32> -> vector<72x256xf32>
    %292 = vector.extract_strided_slice %291 {offsets = [0, 0], sizes = [8, 256], strides = [1, 1]} : vector<72x256xf32> to vector<8x256xf32>
    %c17_i32_153 = arith.constant 17 : i32
    %293 = tpu.dynamic_rotate %292 by %c17_i32_153 dim 1 : vector<8x256xf32>, i32 -> vector<8x256xf32>
    %294 = vector.extract_strided_slice %2 {offsets = [0, 0], sizes = [1, 256], strides = [1, 1]} : vector<9x256xf32> to vector<1x256xf32>
    %295 = vector.broadcast %294 : vector<1x256xf32> to vector<8x256xf32>
    %296 = arith.mulf %293, %295 : vector<8x256xf32>
    %297 = vector.extract_strided_slice %291 {offsets = [8, 0], sizes = [8, 256], strides = [1, 1]} : vector<72x256xf32> to vector<8x256xf32>
    %c16_i32_154 = arith.constant 16 : i32
    %298 = tpu.dynamic_rotate %297 by %c16_i32_154 dim 1 : vector<8x256xf32>, i32 -> vector<8x256xf32>
    %299 = vector.extract_strided_slice %2 {offsets = [1, 0], sizes = [1, 256], strides = [1, 1]} : vector<9x256xf32> to vector<1x256xf32>
    %300 = vector.broadcast %299 : vector<1x256xf32> to vector<8x256xf32>
    %301 = arith.mulf %298, %300 : vector<8x256xf32>
    %302 = arith.addf %296, %301 : vector<8x256xf32>
    %303 = vector.extract_strided_slice %291 {offsets = [16, 0], sizes = [8, 256], strides = [1, 1]} : vector<72x256xf32> to vector<8x256xf32>
    %c15_i32_155 = arith.constant 15 : i32
    %304 = tpu.dynamic_rotate %303 by %c15_i32_155 dim 1 : vector<8x256xf32>, i32 -> vector<8x256xf32>
    %305 = vector.extract_strided_slice %2 {offsets = [2, 0], sizes = [1, 256], strides = [1, 1]} : vector<9x256xf32> to vector<1x256xf32>
    %306 = vector.broadcast %305 : vector<1x256xf32> to vector<8x256xf32>
    %307 = arith.mulf %304, %306 : vector<8x256xf32>
    %308 = arith.addf %302, %307 : vector<8x256xf32>
    %309 = vector.extract_strided_slice %291 {offsets = [24, 0], sizes = [8, 256], strides = [1, 1]} : vector<72x256xf32> to vector<8x256xf32>
    %c1_i32_156 = arith.constant 1 : i32
    %310 = tpu.dynamic_rotate %309 by %c1_i32_156 dim 1 : vector<8x256xf32>, i32 -> vector<8x256xf32>
    %311 = vector.extract_strided_slice %2 {offsets = [3, 0], sizes = [1, 256], strides = [1, 1]} : vector<9x256xf32> to vector<1x256xf32>
    %312 = vector.broadcast %311 : vector<1x256xf32> to vector<8x256xf32>
    %313 = arith.mulf %310, %312 : vector<8x256xf32>
    %314 = arith.addf %308, %313 : vector<8x256xf32>
    %315 = vector.extract_strided_slice %291 {offsets = [32, 0], sizes = [8, 256], strides = [1, 1]} : vector<72x256xf32> to vector<8x256xf32>
    %316 = vector.extract_strided_slice %2 {offsets = [4, 0], sizes = [1, 256], strides = [1, 1]} : vector<9x256xf32> to vector<1x256xf32>
    %317 = vector.broadcast %316 : vector<1x256xf32> to vector<8x256xf32>
    %318 = arith.mulf %315, %317 : vector<8x256xf32>
    %319 = arith.addf %314, %318 : vector<8x256xf32>
    %320 = vector.extract_strided_slice %291 {offsets = [40, 0], sizes = [8, 256], strides = [1, 1]} : vector<72x256xf32> to vector<8x256xf32>
    %c255_i32_157 = arith.constant 255 : i32
    %321 = tpu.dynamic_rotate %320 by %c255_i32_157 dim 1 : vector<8x256xf32>, i32 -> vector<8x256xf32>
    %322 = vector.extract_strided_slice %2 {offsets = [5, 0], sizes = [1, 256], strides = [1, 1]} : vector<9x256xf32> to vector<1x256xf32>
    %323 = vector.broadcast %322 : vector<1x256xf32> to vector<8x256xf32>
    %324 = arith.mulf %321, %323 : vector<8x256xf32>
    %325 = arith.addf %319, %324 : vector<8x256xf32>
    %326 = vector.extract_strided_slice %291 {offsets = [48, 0], sizes = [8, 256], strides = [1, 1]} : vector<72x256xf32> to vector<8x256xf32>
    %c241_i32_158 = arith.constant 241 : i32
    %327 = tpu.dynamic_rotate %326 by %c241_i32_158 dim 1 : vector<8x256xf32>, i32 -> vector<8x256xf32>
    %328 = vector.extract_strided_slice %2 {offsets = [6, 0], sizes = [1, 256], strides = [1, 1]} : vector<9x256xf32> to vector<1x256xf32>
    %329 = vector.broadcast %328 : vector<1x256xf32> to vector<8x256xf32>
    %330 = arith.mulf %327, %329 : vector<8x256xf32>
    %331 = arith.addf %325, %330 : vector<8x256xf32>
    %332 = vector.extract_strided_slice %291 {offsets = [56, 0], sizes = [8, 256], strides = [1, 1]} : vector<72x256xf32> to vector<8x256xf32>
    %c240_i32_159 = arith.constant 240 : i32
    %333 = tpu.dynamic_rotate %332 by %c240_i32_159 dim 1 : vector<8x256xf32>, i32 -> vector<8x256xf32>
    %334 = vector.extract_strided_slice %2 {offsets = [7, 0], sizes = [1, 256], strides = [1, 1]} : vector<9x256xf32> to vector<1x256xf32>
    %335 = vector.broadcast %334 : vector<1x256xf32> to vector<8x256xf32>
    %336 = arith.mulf %333, %335 : vector<8x256xf32>
    %337 = arith.addf %331, %336 : vector<8x256xf32>
    %338 = vector.extract_strided_slice %291 {offsets = [64, 0], sizes = [8, 256], strides = [1, 1]} : vector<72x256xf32> to vector<8x256xf32>
    %c239_i32_160 = arith.constant 239 : i32
    %339 = tpu.dynamic_rotate %338 by %c239_i32_160 dim 1 : vector<8x256xf32>, i32 -> vector<8x256xf32>
    %340 = vector.extract_strided_slice %2 {offsets = [8, 0], sizes = [1, 256], strides = [1, 1]} : vector<9x256xf32> to vector<1x256xf32>
    %341 = vector.broadcast %340 : vector<1x256xf32> to vector<8x256xf32>
    %342 = arith.mulf %339, %341 : vector<8x256xf32>
    %343 = arith.addf %337, %342 : vector<8x256xf32>
    %344 = vector.extract_strided_slice %343 {offsets = [0, 0], sizes = [4, 256], strides = [1, 1]} : vector<8x256xf32> to vector<4x256xf32>
    %c0_161 = arith.constant 0 : index
    %c0_162 = arith.constant 0 : index
    %345 = vector.load %arg25[%c0_161, %c0_162] : memref<4x1xf32, #tpu.memory_space<vmem>>, vector<4x1xf32>
    %346 = vector.broadcast %345 : vector<4x1xf32> to vector<4x256xf32>
    %347 = arith.addf %344, %346 : vector<4x256xf32>
    %cst_163 = arith.constant 0.000000e+00 : f32
    %348 = vector.broadcast %cst_163 : f32 to vector<4x256xf32>
    %349 = arith.maximumf %347, %348 : vector<4x256xf32>
    %c0_164 = arith.constant 0 : index
    %c0_165 = arith.constant 0 : index
    %350 = vector.load %arg26[%c0_164, %c0_165] : memref<16x4xbf16, #tpu.memory_space<vmem>>, vector<16x4xbf16>
    %351 = arith.truncf %242 : vector<4x256xf32> to vector<4x256xbf16>
    %cst_166 = arith.constant dense<0.000000e+00> : vector<16x256xf32>
    %352 = tpu.matmul %350, %351, %cst_166 {dimension_numbers = #tpu.dot_dimension_numbers<[1], [0], [0], [1], [0, 0, 1, 1], [], []>} : vector<16x4xbf16>, vector<4x256xbf16>, vector<16x256xf32> -> vector<16x256xf32>
    %c0_167 = arith.constant 0 : index
    %c0_168 = arith.constant 0 : index
    %353 = vector.load %arg27[%c0_167, %c0_168] : memref<16x4xbf16, #tpu.memory_space<vmem>>, vector<16x4xbf16>
    %354 = arith.truncf %349 : vector<4x256xf32> to vector<4x256xbf16>
    %cst_169 = arith.constant dense<0.000000e+00> : vector<16x256xf32>
    %355 = tpu.matmul %353, %354, %cst_169 {dimension_numbers = #tpu.dot_dimension_numbers<[1], [0], [0], [1], [0, 0, 1, 1], [], []>} : vector<16x4xbf16>, vector<4x256xbf16>, vector<16x256xf32> -> vector<16x256xf32>
    %356 = arith.addf %352, %355 : vector<16x256xf32>
    %c0_170 = arith.constant 0 : index
    %c0_171 = arith.constant 0 : index
    %357 = vector.load %arg28[%c0_170, %c0_171] : memref<16x1xf32, #tpu.memory_space<vmem>>, vector<16x1xf32>
    %358 = vector.broadcast %357 : vector<16x1xf32> to vector<16x256xf32>
    %359 = arith.addf %356, %358 : vector<16x256xf32>
    %360 = arith.addf %1, %359 : vector<16x256xf32>
    %cst_172 = arith.constant 0.000000e+00 : f32
    %361 = vector.broadcast %cst_172 : f32 to vector<16x256xf32>
    %362 = arith.maximumf %360, %361 : vector<16x256xf32>
    %c0_173 = arith.constant 0 : index
    %c0_174 = arith.constant 0 : index
    %c0_175 = arith.constant 0 : index
    %363 = vector.load %arg29[%c0_173, %c0_174, %c0_175] : memref<1x16x256xf32, #tpu.memory_space<vmem>>, vector<1x16x256xf32>
    %364 = vector.shape_cast %363 : vector<1x16x256xf32> to vector<16x256xf32>
    %365 = vector.shape_cast %362 : vector<16x256xf32> to vector<1x16x256xf32>
    tpu.vector_store %arg29[%c0_173, %c0_174, %c0_175], %365 {strides = array<i32>} : memref<1x16x256xf32, #tpu.memory_space<vmem>>, vector<1x16x256xf32>,
    return
  }
  func.func @transform_0(%arg0: i32) -> (i32, i32, i32) {
    %c0_i32 = arith.constant 0 : i32
    %c0_i32_0 = arith.constant 0 : i32
    %c0_i32_1 = arith.constant 0 : i32
    return %arg0, %c0_i32, %c0_i32_0 : i32, i32, i32
  }
  func.func @transform_1(%arg0: i32) -> (i32, i32) {
    %c0_i32 = arith.constant 0 : i32
    %c0_i32_0 = arith.constant 0 : i32
    %c0_i32_1 = arith.constant 0 : i32
    return %c0_i32, %c0_i32_0 : i32, i32
  }
  func.func @transform_2(%arg0: i32) -> (i32, i32) {
    %c0_i32 = arith.constant 0 : i32
    %c0_i32_0 = arith.constant 0 : i32
    %c0_i32_1 = arith.constant 0 : i32
    return %c0_i32, %c0_i32_0 : i32, i32
  }
  func.func @transform_3(%arg0: i32) -> (i32, i32) {
    %c0_i32 = arith.constant 0 : i32
    %c0_i32_0 = arith.constant 0 : i32
    %c0_i32_1 = arith.constant 0 : i32
    return %c0_i32, %c0_i32_0 : i32, i32
  }
  func.func @transform_4(%arg0: i32) -> (i32, i32) {
    %c0_i32 = arith.constant 0 : i32
    %c0_i32_0 = arith.constant 0 : i32
    %c0_i32_1 = arith.constant 0 : i32
    return %c0_i32, %c0_i32_0 : i32, i32
  }
  func.func @transform_5(%arg0: i32) -> (i32, i32) {
    %c0_i32 = arith.constant 0 : i32
    %c0_i32_0 = arith.constant 0 : i32
    %c0_i32_1 = arith.constant 0 : i32
    return %c0_i32, %c0_i32_0 : i32, i32
  }
  func.func @transform_6(%arg0: i32) -> (i32, i32) {
    %c0_i32 = arith.constant 0 : i32
    %c0_i32_0 = arith.constant 0 : i32
    %c0_i32_1 = arith.constant 0 : i32
    return %c0_i32, %c0_i32_0 : i32, i32
  }
  func.func @transform_7(%arg0: i32) -> (i32, i32) {
    %c0_i32 = arith.constant 0 : i32
    %c0_i32_0 = arith.constant 0 : i32
    %c0_i32_1 = arith.constant 0 : i32
    return %c0_i32, %c0_i32_0 : i32, i32
  }
  func.func @transform_8(%arg0: i32) -> (i32, i32) {
    %c0_i32 = arith.constant 0 : i32
    %c0_i32_0 = arith.constant 0 : i32
    %c0_i32_1 = arith.constant 0 : i32
    return %c0_i32, %c0_i32_0 : i32, i32
  }
  func.func @transform_9(%arg0: i32) -> (i32, i32) {
    %c0_i32 = arith.constant 0 : i32
    %c0_i32_0 = arith.constant 0 : i32
    %c0_i32_1 = arith.constant 0 : i32
    return %c0_i32, %c0_i32_0 : i32, i32
  }
  func.func @transform_10(%arg0: i32) -> (i32, i32, i32) {
    %c0_i32 = arith.constant 0 : i32
    %c0_i32_0 = arith.constant 0 : i32
    %c0_i32_1 = arith.constant 0 : i32
    %c0_i32_2 = arith.constant 0 : i32
    return %c0_i32, %c0_i32_0, %c0_i32_1 : i32, i32, i32
  }
  func.func @transform_11(%arg0: i32) -> (i32, i32) {
    %c0_i32 = arith.constant 0 : i32
    %c0_i32_0 = arith.constant 0 : i32
    %c0_i32_1 = arith.constant 0 : i32
    return %c0_i32, %c0_i32_0 : i32, i32
  }
  func.func @transform_12(%arg0: i32) -> (i32, i32) {
    %c0_i32 = arith.constant 0 : i32
    %c0_i32_0 = arith.constant 0 : i32
    %c0_i32_1 = arith.constant 0 : i32
    return %c0_i32, %c0_i32_0 : i32, i32
  }
  func.func @transform_13(%arg0: i32) -> (i32, i32, i32) {
    %c0_i32 = arith.constant 0 : i32
    %c0_i32_0 = arith.constant 0 : i32
    %c0_i32_1 = arith.constant 0 : i32
    %c0_i32_2 = arith.constant 0 : i32
    return %c0_i32, %c0_i32_0, %c0_i32_1 : i32, i32, i32
  }
  func.func @transform_14(%arg0: i32) -> (i32, i32) {
    %c0_i32 = arith.constant 0 : i32
    %c0_i32_0 = arith.constant 0 : i32
    %c0_i32_1 = arith.constant 0 : i32
    return %c0_i32, %c0_i32_0 : i32, i32
  }
  func.func @transform_15(%arg0: i32) -> (i32, i32) {
    %c0_i32 = arith.constant 0 : i32
    %c0_i32_0 = arith.constant 0 : i32
    %c0_i32_1 = arith.constant 0 : i32
    return %c0_i32, %c0_i32_0 : i32, i32
  }
  func.func @transform_16(%arg0: i32) -> (i32, i32) {
    %c0_i32 = arith.constant 0 : i32
    %c0_i32_0 = arith.constant 0 : i32
    %c0_i32_1 = arith.constant 0 : i32
    return %c0_i32, %c0_i32_0 : i32, i32
  }
  func.func @transform_17(%arg0: i32) -> (i32, i32) {
    %c0_i32 = arith.constant 0 : i32
    %c0_i32_0 = arith.constant 0 : i32
    %c0_i32_1 = arith.constant 0 : i32
    return %c0_i32, %c0_i32_0 : i32, i32
  }
  func.func @transform_18(%arg0: i32) -> (i32, i32, i32) {
    %c0_i32 = arith.constant 0 : i32
    %c0_i32_0 = arith.constant 0 : i32
    %c0_i32_1 = arith.constant 0 : i32
    %c0_i32_2 = arith.constant 0 : i32
    return %c0_i32, %c0_i32_0, %c0_i32_1 : i32, i32, i32
  }
  func.func @transform_19(%arg0: i32) -> (i32, i32) {
    %c0_i32 = arith.constant 0 : i32
    %c0_i32_0 = arith.constant 0 : i32
    %c0_i32_1 = arith.constant 0 : i32
    return %c0_i32, %c0_i32_0 : i32, i32
  }
  func.func @transform_20(%arg0: i32) -> (i32, i32) {
    %c0_i32 = arith.constant 0 : i32
    %c0_i32_0 = arith.constant 0 : i32
    %c0_i32_1 = arith.constant 0 : i32
    return %c0_i32, %c0_i32_0 : i32, i32
  }
  func.func @transform_21(%arg0: i32) -> (i32, i32, i32) {
    %c0_i32 = arith.constant 0 : i32
    %c0_i32_0 = arith.constant 0 : i32
    %c0_i32_1 = arith.constant 0 : i32
    %c0_i32_2 = arith.constant 0 : i32
    return %c0_i32, %c0_i32_0, %c0_i32_1 : i32, i32, i32
  }
  func.func @transform_22(%arg0: i32) -> (i32, i32) {
    %c0_i32 = arith.constant 0 : i32
    %c0_i32_0 = arith.constant 0 : i32
    %c0_i32_1 = arith.constant 0 : i32
    return %c0_i32, %c0_i32_0 : i32, i32
  }
  func.func @transform_23(%arg0: i32) -> (i32, i32) {
    %c0_i32 = arith.constant 0 : i32
    %c0_i32_0 = arith.constant 0 : i32
    %c0_i32_1 = arith.constant 0 : i32
    return %c0_i32, %c0_i32_0 : i32, i32
  }
  func.func @transform_24(%arg0: i32) -> (i32, i32) {
    %c0_i32 = arith.constant 0 : i32
    %c0_i32_0 = arith.constant 0 : i32
    %c0_i32_1 = arith.constant 0 : i32
    return %c0_i32, %c0_i32_0 : i32, i32
  }
  func.func @transform_25(%arg0: i32) -> (i32, i32) {
    %c0_i32 = arith.constant 0 : i32
    %c0_i32_0 = arith.constant 0 : i32
    %c0_i32_1 = arith.constant 0 : i32
    return %c0_i32, %c0_i32_0 : i32, i32
  }
  func.func @transform_26(%arg0: i32) -> (i32, i32) {
    %c0_i32 = arith.constant 0 : i32
    %c0_i32_0 = arith.constant 0 : i32
    %c0_i32_1 = arith.constant 0 : i32
    return %c0_i32, %c0_i32_0 : i32, i32
  }
  func.func @transform_27(%arg0: i32) -> (i32, i32) {
    %c0_i32 = arith.constant 0 : i32
    %c0_i32_0 = arith.constant 0 : i32
    %c0_i32_1 = arith.constant 0 : i32
    return %c0_i32, %c0_i32_0 : i32, i32
  }
  func.func @transform_28(%arg0: i32) -> (i32, i32, i32) {
    %c0_i32 = arith.constant 0 : i32
    %c0_i32_0 = arith.constant 0 : i32
    %c0_i32_1 = arith.constant 0 : i32
    return %arg0, %c0_i32, %c0_i32_0 : i32, i32, i32
  }
}

</mosaic_0001>

<bundles_post_ra>
// kernel: tpu_custom_call.1
= control target key start
LH: loop header
LB: loop body
LE: loop exit
PB: predicated region body
PF: predicated region fallthrough
CT: control target
= control target key end

     0   :  { %s8919_s0 = inlined_call_operand.hbm [shape: f32[2,16,256], index: 0, kind: input, shape index: {}]   ;;  %s8920_s1 = inlined_call_operand.hbm [shape: bf16[4,16], index: 1, kind: input, shape index: {}]   ;;  %s8921_s2 = inlined_call_operand.vmem [shape: f32[4,1], index: 2, kind: input, shape index: {}]   ;;  %s8922_s3 = inlined_call_operand.hbm [shape: bf16[4,16], index: 3, kind: input, shape index: {}]   ;;  %s8923_s4 = inlined_call_operand.vmem [shape: f32[4,1], index: 4, kind: input, shape index: {}]   ;;  %s8924_s5 = inlined_call_operand.vmem [shape: f32[9,256], index: 5, kind: input, shape index: {}]   ;;  %s8925_s6 = inlined_call_operand.vmem [shape: bf16[72,4], index: 6, kind: input, shape index: {}]   ;;  %s8926_s7 = inlined_call_operand.vmem [shape: f32[4,1], index: 7, kind: input, shape index: {}]   ;;  %s8927_s8 = inlined_call_operand.vmem [shape: bf16[256,16], index: 8, kind: input, shape index: {}]   ;;  %s8928_s9 = inlined_call_operand.vmem [shape: bf16[16,2304], index: 9, kind: input, shape index: {}]   ;;  %s8929_s10 = inlined_call_operand.vmem [shape: bf16[9,4,4], index: 10, kind: input, shape index: {}]   ;;  %s8930_s11 = inlined_call_operand.vmem [shape: bf16[256,64], index: 11, kind: input, shape index: {}]   ;;  %s8931_s12 = inlined_call_operand.vmem [shape: bf16[64,2304], index: 12, kind: input, shape index: {}]   ;;  %s8932_s13 = inlined_call_operand.vmem [shape: bf16[9,4,4], index: 13, kind: input, shape index: {}]   ;;  %s8933_s14 = inlined_call_operand.vmem [shape: bf16[72,4], index: 14, kind: input, shape index: {}]   ;;  %s8934_s15 = inlined_call_operand.vmem [shape: f32[4,1], index: 15, kind: input, shape index: {}]   ;;  %s8935_s16 = inlined_call_operand.vmem [shape: bf16[256,96], index: 16, kind: input, shape index: {}]   ;;  %s8936_s17 = inlined_call_operand.vmem [shape: bf16[96,768], index: 17, kind: input, shape index: {}]   ;;  %s8937_s18 = inlined_call_operand.vmem [shape: bf16[3,4,4], index: 18, kind: input, shape index: {}]   ;;  %s8938_s19 = inlined_call_operand.vmem [shape: bf16[256,96], index: 19, kind: input, shape index: {}]   ;;  %s8939_s20 = inlined_call_operand.hbm [shape: bf16[96,768], index: 20, kind: input, shape index: {}]   ;;  %s8940_s21 = inlined_call_operand.vmem [shape: bf16[3,4,4], index: 21, kind: input, shape index: {}]   ;;  %s8941_s22 = inlined_call_operand.vmem [shape: f32[4,1], index: 22, kind: input, shape index: {}]   ;;  %s8942_s23 = inlined_call_operand.vmem [shape: bf16[72,4], index: 23, kind: input, shape index: {}]   ;;  %s8943_s24 = inlined_call_operand.vmem [shape: f32[4,1], index: 24, kind: input, shape index: {}]   ;;  %s8944_s25 = inlined_call_operand.vmem [shape: bf16[16,4], index: 25, kind: input, shape index: {}]   ;;  %s8945_s26 = inlined_call_operand.vmem [shape: bf16[16,4], index: 26, kind: input, shape index: {}]   ;;  %s8946_s27 = inlined_call_operand.vmem [shape: f32[16,1], index: 27, kind: input, shape index: {}]   ;;  %s8947_s28 = inlined_call_operand.hbm [shape: f32[2,16,256], index: 28, kind: output, shape index: {}]  }
   0x1   :  { %8991 = sst [smem:[#allocation17_spill]] %s8919_s0 }
   0x2   :  { %8992 = sst [smem:[#allocation18_spill]] %s8920_s1 }
   0x3   :  { %8993 = sst [smem:[#allocation19_spill]] %s8921_s2 }
   0x4   :  { %8994 = sst [smem:[#allocation20_spill]] %s8922_s3 }
   0x5   :  { %8995 = sst [smem:[#allocation21_spill]] %s8923_s4 }
   0x6   :  { %8996 = sst [smem:[#allocation22_spill]] %s8924_s5 }
   0x7   :  { %8997 = sst [smem:[#allocation23_spill]] %s8925_s6 }
   0x8   :  { %8998 = sst [smem:[#allocation24_spill]] %s8926_s7 }
   0x9   :  { %8999 = sst [smem:[#allocation25_spill]] %s8927_s8 }
   0xa   :  { %9000 = sst [smem:[#allocation26_spill]] %s8928_s9 }
   0xb   :  { %9001 = sst [smem:[#allocation27_spill]] %s8929_s10 }
   0xc   :  { %9002 = sst [smem:[#allocation28_spill]] %s8930_s11 }
   0xd   :  { %9003 = sst [smem:[#allocation29_spill]] %s8931_s12 }
   0xe   :  { %9004 = sst [smem:[#allocation30_spill]] %s8932_s13 }
   0xf   :  { %9005 = sst [smem:[#allocation31_spill]] %s8933_s14 }
  0x10   :  { %9006 = sst [smem:[#allocation32_spill]] %s8934_s15 }
  0x11   :  { %9007 = sst [smem:[#allocation33_spill]] %s8935_s16 }
  0x12   :  { %9008 = sst [smem:[#allocation34_spill]] %s8939_s20 }
  0x13   :  { %9009 = sst [smem:[#allocation35_spill]] %s8940_s21 }
  0x14   :  { %9010 = sst [smem:[#allocation36_spill]] %s8941_s22 }
  0x15   :  { %9011 = sst [smem:[#allocation37_spill]] %s8942_s23 }
  0x16   :  { %9012 = sst [smem:[#allocation38_spill]] %s8943_s24 }
  0x17   :  { %9013 = sst [smem:[#allocation39_spill]] %s8944_s25 }
  0x18   :  { %9014 = sst [smem:[#allocation40_spill]] %s8945_s26 }
  0x19   :  { %9015 = sst [smem:[#allocation41_spill]] %s8946_s27 }
  0x1a   :  { %9016 = sst [smem:[#allocation42_spill]] %s8947_s28 }
  0x1b   :  { %33 = vsyncpa [#allocation3], 0 }
  0x1c   :  { %35 = vsyncpa [#allocation3 + $0x1], 0 }
  0x1d   :  { %36 = vsyncpa [#allocation6], 0 }
  0x1e   :  { %37 = vsyncpa [#allocation9], 0 }
  0x1f   :  { %38 = vsyncpa [#allocation4], 0 }
  0x20   :  { %40 = vsyncpa [#allocation4 + $0x1], 0  ;;  %s7298_s8 = smov 0   ;;  %s7300_s5 = smov 0  }
  0x21   :  { %s7302_s9 = smov 0   ;;  %s7304_s30 = smov 0  }
  0x22 LB: > { %9017 = sst [smem:[#allocation15_spill]] %s7120_s8  ;;  %s7319_s3 = sadd.s32 4294967295, %s7132_s30   ;;  %s7132_s30 = sphi %s7304_s30, %s9078_s30   ;;  %s7128_s9 = sphi %s7302_s9, %s9077_s9   ;;  %s7124_s5 = sphi %s7300_s5, %s9076_s5   ;;  %s7120_s8 = sphi %s7298_s8, %s9075_s8  }
  0x23   : > { %s6044_s6 = sadd.s32 4294967294, %s7132_s30   ;;  %p66_p0 = scmp.ne.s32.totalorder %s7124_s5, %s7120_s8 }
  0x24   : > { %p8962_p1 = scmp.eq.s32.totalorder %s7319_s3, 0  ;;  %p663_p3 = scmp.eq.s32.totalorder %s6044_s6, 1 }
  0x25   : > { %p6045_p5 = scmp.ge.s32.totalorder %s7132_s30, 1  ;;  %p670_p7 = scmp.lt.s32.totalorder %s7132_s30, 3 }
  0x26   : > { %p7328_p4 = por %p8962_p1, %p66_p0  ;;  %p7333_p6 = por %p663_p3, %p66_p0 }
  0x27   : > { %p7338_p8 = pnand %p6045_p5, %p670_p7  ;;  %s7134_s29 = smov [#allocation5]  }
  0x28   : > { %s9018_s10 = scalar_select %p7328_p4, 1, 0 }
  0x29   : > { %s9019_s0 = scalar_select %p7333_p6, 1, 0 }
  0x2a   : > { %s9021_s11 = scalar_select %p7338_p8, 1, 0 }
  0x2b   : > { %9020 = sst [smem:[#allocation16_spill]] %s9019_s0  ;;  %s683_s2 = sshll.u32 %s7134_s29, 4  ;;  %s684_s2 = int_to_ptr.vmem [resolvable:$true] %s683_s2 }
  0x2c   : > { %p6537_p10 = pneg %p7338_p8  ;;  %s7135_s7 = smov [#allocation7]  }
  0x2d   : > { %s697_s12 = sshll.u32 %s7135_s7, 4  ;;  %s7136_s4 = smov [#allocation8]   ;;  %s7351_s12 = int_to_ptr.vmem [resolvable:$true] %s697_s12 }
  0x2e   : > { %p7347_p11 = pnand %p6537_p10, %p8962_p1  ;;  %s755_s6 = sshll.u32 %s7136_s4, 4  ;;  %s7353_s6 = int_to_ptr.vmem [resolvable:$true] %s755_s6 }
  0x2f   : > { %s9023_s8 = sld [smem:[#allocation18_spill]] }
  0x30   : > { %p7363_p13 = pneg %p7347_p11 }
  0x35   : > { %s9024_s28 = smov %s9023_s8  ;;  %s6944_s25 = scalar_lea.hbm %s9023_s8, 32 }
  0x36   : > { %p6945_p12 = scmp.ne.s32.totalorder %s9024_s28, %s6944_s25  ;;  %p6951_p5 = scmp.lt.u32.totalorder %s6944_s25, %s9024_s28 }
  0x38   : > { %p6947_p0 = pnand %p7363_p13, %p6945_p12 }
  0x3a   : > { %p6948_p3 = pneg %p6947_p0 }
  0x3c   : > { %p6953_p7 = pnand %p6951_p5, %p6948_p3 }
  0x3e   : > { %6956 = shalt.err (!%p6953_p7)
}
  0x3f   : > { %s6957_s8 = scalar_lea.vmem %s684_s2, 32  ;;  %p6965_p2 = scmp.lt.s32.totalorder %s684_s2, %s684_s2 }
  0x40   : > { %p6958_p10 = scmp.ne.s32.totalorder %s684_s2, %s6957_s8  ;;  %p6966_p6 = scmp.lt.s32.totalorder %s6957_s8, %s6957_s8 }
  0x42   : > { %p6960_p9 = pnand %p6958_p10, %p7363_p13  ;;  %p6967_p4 = por %p6966_p6, %p6965_p2 }
  0x44   : > { %p6961_p1 = pneg %p6960_p9 }
  0x46   : > { %p6968_p8 = pnand %p6967_p4, %p6961_p1 }
  0x48   : > { %6971 = shalt.err (!%p6968_p8)
}
  0x49   : > { %6540 = dma.hbm_to_vmem [thread:$0]  (!%p7347_p11), %s9024_s28, 32, %s684_s2, [#allocation6]  }
  0x4a   : > { %s9026_s0 = sld [smem:[#allocation20_spill]] }
  0x50   : > { %s6972_s29 = scalar_lea.hbm %s9026_s0, 32 }
  0x51   : > { %p6973_p9 = scmp.ne.s32.totalorder %s9026_s0, %s6972_s29  ;;  %p6979_p1 = scmp.lt.u32.totalorder %s6972_s29, %s9026_s0 }
  0x53   : > { %p6975_p12 = pnand %p6973_p9, %p7363_p13 }
  0x55   : > { %p6976_p2 = pneg %p6975_p12 }
  0x57   : > { %p6981_p4 = pnand %p6979_p1, %p6976_p2 }
  0x59   : > { %6984 = shalt.err (!%p6981_p4)
}
  0x5a   : > { %s6985_s2 = scalar_lea.vmem %s7351_s12, 32  ;;  %p6993_p3 = scmp.lt.s32.totalorder %s7351_s12, %s7351_s12 }
  0x5b   : > { %p6986_p6 = scmp.ne.s32.totalorder %s7351_s12, %s6985_s2  ;;  %p6994_p5 = scmp.lt.s32.totalorder %s6985_s2, %s6985_s2 }
  0x5d   : > { %p6988_p8 = pnand %p6986_p6, %p7363_p13  ;;  %p6995_p7 = por %p6994_p5, %p6993_p3 }
  0x5f   : > { %p6989_p0 = pneg %p6988_p8 }
  0x61   : > { %p6996_p10 = pnand %p6995_p7, %p6989_p0 }
  0x63   : > { %6999 = shalt.err (!%p6996_p10)
}
  0x64   : > { %6543 = dma.hbm_to_vmem [thread:$0]  (!%p7347_p11), %s9026_s0, 32, %s7351_s12, [#allocation6]  }
  0x65   : > { %s9027_s20 = sld [smem:[#allocation34_spill]] }
  0x6b   : > { %s7000_s15 = scalar_lea.hbm %s9027_s20, 4608 }
  0x6c   : > { %p7001_p9 = scmp.ne.s32.totalorder %s9027_s20, %s7000_s15  ;;  %p7007_p1 = scmp.lt.u32.totalorder %s7000_s15, %s9027_s20 }
  0x6e   : > { %p7003_p12 = pnand %p7001_p9, %p7363_p13 }
  0x70   : > { %p7004_p2 = pneg %p7003_p12 }
  0x72   : > { %p7009_p4 = pnand %p7007_p1, %p7004_p2 }
  0x74   : > { %7012 = shalt.err (!%p7009_p4)
}
  0x75   : > { %s7013_s12 = scalar_lea.vmem %s7353_s6, 4608  ;;  %p7021_p3 = scmp.lt.s32.totalorder %s7353_s6, %s7353_s6 }
  0x76   : > { %p7014_p6 = scmp.ne.s32.totalorder %s7353_s6, %s7013_s12  ;;  %p7022_p5 = scmp.lt.s32.totalorder %s7013_s12, %s7013_s12 }
  0x78   : > { %p7016_p8 = pnand %p7014_p6, %p7363_p13  ;;  %p7023_p7 = por %p7022_p5, %p7021_p3 }
  0x7a   : > { %p7017_p0 = pneg %p7016_p8 }
  0x7c   : > { %p7024_p10 = pnand %p7023_p7, %p7017_p0 }
  0x7e   : > { %7027 = shalt.err (!%p7024_p10)
}
  0x7f   : > { %s7137_s2 = smov 384   ;;  %s7138_s7 = smov 24  }
  0x80   : > { %6546 = dma.hbm_to_vmem [thread:$0]  (!%p7347_p11), %s9027_s20, 4608, %s7353_s6, [#allocation9], %s7137_s2, %s7137_s2, %s7138_s7  }
  0x81   : > { %s7426_s26 = sadd.s32 1, %s7132_s30   ;;  %s53_s15 = sadd.s32 1, %s7128_s9 }
  0x82   : > { %s50_s27 = ssub.s32 %s7132_s30, %s7426_s26  ;;  %p60_p9 = scmp.ne.s32.totalorder %s7128_s9, %s7124_s5 }
  0x83   : > { %p51_p13 = scmp.eq.s32.totalorder %s50_s27, 0  ;;  %p61_p12 = scmp.eq.s32.totalorder %s7132_s30, 0 }
  0x84   : > { %p6558_p2 = scmp.lt.s32.totalorder %s7132_s30, 2  ;;  %p9028_p4 = scmp.eq.s32.totalorder %s7319_s3, 1 }
  0x85   : > { %s7436_s25 = scalar_select %p51_p13, %s7128_s9, %s53_s15  }
  0x86   : > { %p62_p1 = por %p61_p12, %p60_p9  ;;  %p7440_p6 = por %p9028_p4, %p60_p9 }
  0x87   : > { %s790_s1 = sand.u32 1, %s7128_s9   ;;  %s6425_s4 = sshll.u32 %s7132_s30, 9 }
  0x88   : > { %s6050_s6 = sshll.u32 %s790_s1, 5  ;;  %s9030_s2 = sld [smem:[#allocation17_spill]] }
  0x89   : > { %s794_s21 = scalar_lea.vmem [#allocation2], %s6050_s6  ;;  %p7451_p11 = pnand %p6558_p2, %p62_p1 }
  0x8a   : > { %s801_s23 = sshll.u32 %s794_s21, 4  ;;  %s7457_s15 = scalar_lea.sflag [#allocation3], %s790_s1  ;;  %s7455_s23 = int_to_ptr.vmem [resolvable:$true] %s801_s23 }
  0x8b   : > { %p7030_p0 = pneg %p7451_p11 }
  0x8e   : > { %s7449_s7 = scalar_lea.hbm %s9030_s2, %s6425_s4  ;;  %s7033_s8 = scalar_lea.hbm %s9030_s2, 1024 }
  0x8f   : > { %s7028_s0 = scalar_lea.hbm %s7449_s7, 512  ;;  %p7034_p7 = scmp.lt.u32.totalorder %s7449_s7, %s9030_s2 }
  0x90   : > { %p7029_p8 = scmp.ne.s32.totalorder %s7449_s7, %s7028_s0  ;;  %p7035_p10 = scmp.lt.u32.totalorder %s7033_s8, %s7028_s0 }
  0x91   : > { %p7037_p9 = scmp.lt.u32.totalorder %s7028_s0, %s7449_s7 }
  0x92   : > { %p7031_p3 = pnand %p7030_p0, %p7029_p8  ;;  %p7036_p13 = por %p7035_p10, %p7034_p7 }
  0x94   : > { %p7032_p5 = pneg %p7031_p3  ;;  %p7038_p12 = por %p7037_p9, %p7036_p13 }
  0x96   : > { %p7039_p2 = pnand %p7038_p12, %p7032_p5 }
  0x98   : > { %7042 = shalt.err (!%p7039_p2)
}
  0x99   : > { %s7043_s1 = scalar_lea.vmem %s7455_s23, 512  ;;  %s7139_s4 = smov [#allocation2]  }
  0x9a   : > { %p7044_p1 = scmp.ne.s32.totalorder %s7455_s23, %s7043_s1  ;;  %s7048_s6 = sshll.u32 %s7139_s4, 4  ;;  %s7049_s6 = int_to_ptr.vmem [resolvable:$false] %s7048_s6 }
  0x9b   : > { %s7050_s12 = scalar_lea.vmem %s7049_s6, 1024  ;;  %p7051_p3 = scmp.lt.s32.totalorder %s7455_s23, %s7049_s6 }
  0x9c   : > { %p7046_p4 = pnand %p7044_p1, %p7030_p0  ;;  %p7052_p7 = scmp.lt.s32.totalorder %s7050_s12, %s7043_s1 }
  0x9e   : > { %p7047_p8 = pneg %p7046_p4  ;;  %p7053_p10 = por %p7052_p7, %p7051_p3 }
  0xa0   : > { %p7054_p13 = pnand %p7053_p10, %p7047_p8 }
  0xa2   : > { %7057 = shalt.err (!%p7054_p13)
}
  0xa3   : > { %s7140_s0 = smov 256   ;;  %s7141_s8 = smov 16  }
  0xa4   : > { %6550 = dma.hbm_to_vmem [thread:$0]  (!%p7451_p11), %s7449_s7, 512, %s7455_s23, %s7457_s15, %s7140_s0, %s7140_s0, %s7141_s8  }
  0xa5   : > { %p9032_p0 = scmp.ne.s32.totalorder %s9021_s11, 0 }
  0xa6   : > { %s7488_s21 = sand.u32 (!%p9032_p0), 1, %s7124_s5   ;;  %p9033_p5 = scmp.ne.s32.totalorder (!%p9032_p0), %s9018_s10, 0 }
  0xa7   : > { %813 = sbr.rel (%p9032_p0) target bundleno = 3512 (0xdb8), region = 132  ;;  %s8968_s1 = sshll.u32 (!%p9032_p0), %s7488_s21, 5 }
  0xa8   : > { %s816_s4 = scalar_lea.sflag (!%p9032_p0), [#allocation3], %s7488_s21  ;;  %s7494_s6 = scalar_lea.vmem (!%p9032_p0), [#allocation2], %s8968_s1 }
  0xae   : > { %7103 = dma.done.wait (%p9033_p5), %s816_s4, 512  }
  0xaf   : > { %7105 = vsyncadd (%p9033_p5), %s816_s4, 4294966784  ;;  %p9034_p11 = scmp.eq.s32.totalorder %s7319_s3, 0 }
  0xb1   : > { %7107 = dma.done.wait (%p9034_p11), [#allocation6], 64   ;;  %p9035_p9 = pmov %p9034_p11 }
  0xb3   : > { %7109 = vsyncadd (%p9035_p9), [#allocation6], 4294967232  ;;  %p9036_p12 = pmov %p9035_p9 }
  0xb4   : > { %p9037_p2 = pmov %p9035_p9 }
  0xb5   : > { %7111 = dma.done.wait (%p9036_p12), [#allocation9], 4608  }
  0xb6   : > { %7113 = vsyncadd (%p9037_p2), [#allocation9], 4294962688  ;;  %v7142_v0 = vmov 0   ;;  %v906_v1 = vld [vmem:[%s7494_s6 + $0x8] sm:$0xff]  ;;  %v908_v2 = vld [vmem:[%s7494_s6 + $0x18] sm:$0xff]  ;;  %vm922_vm0 = vcmask 130048  }
  0xb7   : > { %958 = vmatprep.mubr.bf16.mxu0 %v7142_v0  ;;  %6612 = vset.pattern.permute.xlu0 %v7142_v0  ;;  %v905_v3 = vld [vmem:[%s7494_s6] sm:$0xff]  ;;  %v914_v4 = vpack.c.bf16 %v908_v2, %v906_v1  ;;  %v907_v5 = vld [vmem:[%s7494_s6 + $0x10] sm:$0xff]  ;;  %s9038_s7 = sld [smem:[#allocation19_spill]]  ;;  %vm1074_vm1 = vcmask 1041408   ;;  %s9039_s15 = sld [smem:[#allocation25_spill]]  ;;  %vm1058_vm2 = vcmask 31744  }
  0xb8   : > { %1011 = vmatprep.mubr.bf16.mxu1 %v7142_v0  ;;  %6613 = vset.pattern.permute.xlu1 %v7142_v0  ;;  %v913_v7 = vpack.c.bf16 %v907_v5, %v905_v3  ;;  %v915_v8 = vld [vmem:[#allocation5] sm:$0x3]  ;;  %v969_v9 = vld [vmem:[#allocation7] sm:$0x3]  ;;  %s9040_s8 = sld [smem:[#allocation23_spill]]  ;;  %s9042_s2 = sld [smem:[#allocation26_spill]] }
  0xb9   : > { %926 = vmatprep.subr.bf16.mxu0 %v914_v4  ;;  %979 = vmatprep.subr.bf16.mxu1 %v914_v4  ;;  %s8983_s11 = smov 17   ;;  %s8973_s23 = smov 1   ;;  %vm3077_vm11 = vcmask 523264   ;;  %vm4574_vm12 = vcmask 785408  }
  0xba   : > { %927 = vmatpush1.bf16.msra.mxu0 %v913_v7  ;;  %980 = vmatpush1.bf16.msra.mxu1 %v913_v7  ;;  %s8971_s1 = smov 127   ;;  %s8985_s27 = smov 113  }
  0xbb   : > { %s8977_s12 = smov 112   ;;  %s8981_s0 = smov 111  }
  0xbc   : > { %s9044_s24 = sld [smem:[#allocation38_spill]]  ;;  %s9050_s22 = sld [smem:[#allocation36_spill]] }
  0xbd   : > { %v916_v6 = vld [vmem:[%s9038_s7] sm:$0xf]  ;;  %6059 = vmatmul.mubr.msk.bf16.vlgmr.msra.gmra.mrb[0].mxu0 %vm922_vm0, %v915_v8  ;;  %6060 = vmatmul.mubr.msk.bf16.vlgmr.msra.gmra.mrb[0].mxu1 %vm922_vm0, %v969_v9  ;;  %v6618_v25 = vld [vmem:[%s9039_s15 + $0x48] sm:$0xff]   ;;  %v6621_v27 = vld [vmem:[%s9039_s15 + $0x50] sm:$0xff]   ;;  %s8979_s7 = smov 16   ;;  %s9051_s13 = sld [smem:[#allocation30_spill]] }
  0xbe   : > { %919 = vperm.xlu0 %6612, %v916_v6   ;;  %1113 = vmatprep.mubr.bf16.mxu0 %v7142_v0  ;;  %v6616_v21 = vld [vmem:[%s9039_s15 + $0x40] sm:$0xff]   ;;  %s9041_s4 = smov %s9040_s8  ;;  %v6619_v26 = vld [vmem:[%s9039_s15 + $0x8] sm:$0xff]   ;;  %v6622_v29 = vld [vmem:[%s9039_s15 + $0x10] sm:$0xff]   ;;  %s9052_s16 = sld [smem:[#allocation33_spill]] }
  0xbf   : > { %1638 = vmatprep.mubr.bf16.mxu1 %v7142_v0  ;;  %v6614_v23 = vld [vmem:[%s9040_s8] sm:$0xff]   ;;  %v6615_v28 = vld [vmem:[%s9041_s4 + $0x8] sm:$0xff]   ;;  %v6623_v30 = vld [vmem:[%s9039_s15 + $0x58] sm:$0xff]   ;;  %s9053_s14 = sld [smem:[#allocation31_spill]]  ;;  %s9061_s8 = sld [smem:[#allocation37_spill]] }
  0xc0   : > { %v6617_v24 = vld [vmem:[%s9039_s15] sm:$0xff]   ;;  %v6624_v31 = vld [vmem:[%s9039_s15 + $0x18] sm:$0xff]   ;;  %v6620_v33 = vld [vmem:[%s9041_s4 + $0x10] sm:$0xff]   ;;  %s9065_s20 = sld [smem:[#allocation32_spill]] }
  0xc1   : > { %v6626_v32 = vld [vmem:[%s9039_s15 + $0x60] sm:$0xff]   ;;  %v6628_v35 = vld [vmem:[%s9039_s15 + $0x68] sm:$0xff]   ;;  %v6631_v37 = vld [vmem:[%s9039_s15 + $0x70] sm:$0xff]  }
  0xc2   : > { %v6627_v34 = vld [vmem:[%s9039_s15 + $0x20] sm:$0xff]   ;;  %v6629_v36 = vld [vmem:[%s9039_s15 + $0x28] sm:$0xff]   ;;  %v6625_v38 = vld [vmem:[%s9041_s4 + $0x18] sm:$0xff]  }
  0xc3   : > { %v6632_v39 = vld [vmem:[%s9039_s15 + $0x30] sm:$0xff]   ;;  %v6633_v40 = vld [vmem:[%s9039_s15 + $0x78] sm:$0xff]   ;;  %v6630_v42 = vld [vmem:[%s9041_s4 + $0x20] ss:$0 sps:$4 sm:$0xff]   ;;  %s8975_s4 = smov 15  }
  0xc4   : > { %v6634_v41 = vld [vmem:[%s9039_s15 + $0x38] sm:$0xff]   ;;  %v6637_v43 = vld [vmem:[%s9042_s2 + $0x4] ss:$72 sps:$4 sm:$0xff]   ;;  %v6635_v45 = vld [vmem:[%s9042_s2] ss:$72 sps:$4 sm:$0xff]   ;;  %s6426_s15 = sshll.u32 %s7319_s3, 9 }
  0xc5   : > { %v6640_v44 = vld [vmem:[%s9042_s2 + $0xc] ss:$72 sps:$4 sm:$0xff]   ;;  %v6638_v46 = vld [vmem:[%s9042_s2 + $0x8] ss:$72 sps:$4 sm:$0xff]   ;;  %1606 = vmatprep.subr.bf16.mxu1 %v6637_v43  ;;  %v6646_v48 = vld [vmem:[%s9042_s2 + $0x1c] ss:$72 sps:$4 sm:$0xff]  }
  0xc6   : > { %1607 = vmatpush1.bf16.msra.mxu1 %v6635_v45  ;;  %v6643_v47 = vld [vmem:[%s9042_s2 + $0x14] ss:$72 sps:$4 sm:$0xff]   ;;  %s5929_s3 = scalar_lea.sflag [#allocation4], %s7488_s21 }
  0xc7   : > { %1688 = vmatprep.subr.bf16.mxu1 %v6643_v47 }
 0x13d   : > { %v920_v10 = vpop.permute.xlu0 %919 }
 0x190   : > { %v960_v11 = vpop.f32.mrb[0].mxu0  ;;  %v7638_v61 = vpop.f32.mrb[0].mxu1 }
 0x191   : > { %v961_v12 = vadd.f32 %v960_v11, %v920_v10  ;;  %v962_v13 = vpop.f32.mrb[1].mxu0  ;;  %v7640_v62 = vpop.f32.mrb[1].mxu1  ;;  %v5768_v11 = vld [vmem:[%s9044_s24] sm:$0xf] }
 0x192   : > { %v963_v14 = vadd.f32 %v962_v13, %v920_v10  ;;  %v964_v15 = vpop.f32.mrb[2].mxu0  ;;  %v1017_v1 = vpop.f32.mrb[2].mxu1 }
 0x193   : > { %v967_v16 = vmax.f32 %v961_v12, 0.0  ;;  %v965_v17 = vpop.f32.mrb[3].mxu0  ;;  %v1018_v3 = vpop.f32.mrb[3].mxu1 }
 0x194   : > { %v968_v18 = vmax.f32 %v963_v14, 0.0  ;;  %v6641_v17 = vld [vmem:[%s9042_s2 + $0x10] ss:$72 sps:$4 sm:$0xff]  }
 0x195   : > { %v7523_v19 = vpack.c.bf16 %v967_v16, %v967_v16 }
 0x196   : > { %v7525_v20 = vpack.c.bf16 %v968_v18, %v968_v18  ;;  %v6644_v18 = vld [vmem:[%s9042_s2 + $0x18] ss:$72 sps:$4 sm:$0xff]  }
 0x197   : > { %v1076_v22 = vsel %vm1074_vm1, %v7523_v19, 0 }
 0x198   : > { %6066 = vmatprep.subr.msk.bf16.mxu0 %vm1074_vm1, %v7525_v20 }
 0x199   : > { %1082 = vmatpush1.bf16.msra.mxu0 %v1076_v22  ;;  %v6649_v22 = vld [vmem:[%s9042_s2 + $0x24] ss:$72 sps:$4 sm:$0xff]  }
 0x19a   : > { %6427 = vmatprep.subr.bf16.mxu0 %v6616_v21 }
 0x19c   : > { %6067 = vmatmul.mubr.msk.bf16.vlgmr.msra.gmra.mrb[4].mxu0 %vm1058_vm2, %v6614_v23  ;;  %v6652_v23 = vld [vmem:[%s9042_s2 + $0x2c] ss:$72 sps:$4 sm:$0xff]  }
 0x19d   : > { %1123 = vmatprep.mubr.bf16.mxu0 %v7142_v0  ;;  %6428 = vmatpush3.bf16.msra.mxu0 %v6617_v24  ;;  %v6647_v24 = vld [vmem:[%s9042_s2 + $0x20] ss:$72 sps:$4 sm:$0xff]  }
 0x19e   : > { %6429 = vmatprep.subr.bf16.mxu0 %v6618_v25  ;;  %v6650_v25 = vld [vmem:[%s9042_s2 + $0x28] ss:$72 sps:$4 sm:$0xff]  }
 0x1a1   : > { %6430 = vmatpush3.bf16.msra.mxu0 %v6619_v26  ;;  %v6655_v26 = vld [vmem:[%s9042_s2 + $0x34] ss:$72 sps:$4 sm:$0xff]  }
 0x1a2   : > { %6431 = vmatprep.subr.bf16.mxu0 %v6621_v27  ;;  %v6658_v27 = vld [vmem:[%s9042_s2 + $0x3c] ss:$72 sps:$4 sm:$0xff]  }
 0x1a4   : > { %6068 = vmatmul.mubr.msk.bf16.gmra.mrb[8].mxu0 %vm1058_vm2, %v6615_v28  ;;  %v6653_v28 = vld [vmem:[%s9042_s2 + $0x30] ss:$72 sps:$4 sm:$0xff]  }
 0x1a5   : > { %1133 = vmatprep.mubr.bf16.mxu0 %v7142_v0  ;;  %6432 = vmatpush3.bf16.msra.mxu0 %v6622_v29  ;;  %v6656_v29 = vld [vmem:[%s9042_s2 + $0x38] ss:$72 sps:$4 sm:$0xff]  }
 0x1a6   : > { %6433 = vmatprep.subr.bf16.mxu0 %v6623_v30  ;;  %v6661_v30 = vld [vmem:[%s9042_s2 + $0x44] ss:$72 sps:$4 sm:$0xff]  }
 0x1a9   : > { %6434 = vmatpush3.bf16.msra.mxu0 %v6624_v31  ;;  %v6659_v31 = vld [vmem:[%s9042_s2 + $0x40] ss:$72 sps:$4 sm:$0xff]   ;;  %s9054_s2 = smov 113  }
 0x1aa   : > { %6435 = vmatprep.subr.bf16.mxu0 %v6626_v32 }
 0x1ac   : > { %6069 = vmatmul.mubr.msk.bf16.gmra.mrb[12].mxu0 %vm1058_vm2, %v6620_v33 }
 0x1ad   : > { %1143 = vmatprep.mubr.bf16.mxu0 %v7142_v0  ;;  %6436 = vmatpush3.bf16.msra.mxu0 %v6627_v34 }
 0x1ae   : > { %6437 = vmatprep.subr.bf16.mxu0 %v6628_v35 }
 0x1b1   : > { %6438 = vmatpush3.bf16.msra.mxu0 %v6629_v36 }
 0x1b2   : > { %6439 = vmatprep.subr.bf16.mxu0 %v6631_v37 }
 0x1b4   : > { %6070 = vmatmul.mubr.msk.bf16.gmra.mrb[16].mxu0 %vm1058_vm2, %v6625_v38 }
 0x1b5   : > { %1153 = vmatprep.mubr.bf16.mxu0 %v7142_v0  ;;  %6440 = vmatpush3.bf16.msra.mxu0 %v6632_v39 }
 0x1b6   : > { %6441 = vmatprep.subr.bf16.mxu0 %v6633_v40 }
 0x1b9   : > { %6442 = vmatpush3.bf16.msra.mxu0 %v6634_v41 }
 0x1ba   : > { %1647 = vmatprep.subr.bf16.mxu0 %v6640_v44 }
 0x1bc   : > { %6071 = vmatmul.mubr.msk.bf16.gmra.mrb[20].mxu0 %vm1058_vm2, %v6630_v42 }
 0x1bd   : > { %1486 = vmatprep.mubr.bf16.mxu0 %v7525_v20 }
 0x1c4   : > { %1487 = vmatmul.mubr.bf16.vlgmr.msra.gmra.mrb[24].mxu0 %v7523_v19 }
 0x1c5   : > { %1679 = vmatprep.mubr.bf16.mxu0 %v7142_v0  ;;  %1648 = vmatpush1.bf16.msra.mxu0 %v6638_v46 }
 0x1c6   : > { %1729 = vmatprep.subr.bf16.mxu0 %v6646_v48 }
 0x26f   : > { %v1115_v49 = vpop.f32.mrb[4].mxu0 }
 0x270   : > { %1162 = vrot.lane.b32.xlu0 %v1115_v49, %s8983_s11  ;;  %v1117_v50 = vpop.f32.mrb[5].mxu0 }
 0x271   : > { %1164 = vrot.lane.b32.xlu1 %v1117_v50, %s8983_s11  ;;  %v1119_v51 = vpop.f32.mrb[6].mxu0  ;;  %s9045_s11 = sld [smem:[#allocation27_spill]] }
 0x272   : > { %v1121_v52 = vpop.f32.mrb[7].mxu0 }
 0x274   : > { %1183 = vrot.lane.b32.xlu0 %v1121_v52, %s8979_s7 }
 0x275   : > { %1181 = vrot.lane.b32.xlu1 %v1119_v51, %s8979_s7  ;;  %s9058_s7 = smov 1  }
 0x277   : > { %v1125_v53 = vpop.f32.mrb[8].mxu0  ;;  %v6117_v46 = vld [vmem:[%s9045_s11 + $0x2] sm:$0x3]  ;;  %v1993_v47 = vld [vmem:[%s9045_s11] sm:$0x3] }
 0x278   : > { %v1127_v54 = vpop.f32.mrb[9].mxu0  ;;  %v6122_v3 = vld [vmem:[%s9045_s11 + $0x4] sm:$0x3] }
 0x279   : > { %1200 = vrot.lane.b32.xlu1 %v1125_v53, %s8975_s4  ;;  %1202 = vrot.lane.b32.xlu0 %v1127_v54, %s8975_s4  ;;  %v1129_v55 = vpop.f32.mrb[10].mxu0  ;;  %s9066_s4 = sld [smem:[#allocation41_spill]] }
 0x27a   : > { %v1131_v56 = vpop.f32.mrb[11].mxu0 }
 0x27d   : > { %1219 = vrot.lane.b32.xlu1 %v1129_v55, %s8973_s23  ;;  %1221 = vrot.lane.b32.xlu0 %v1131_v56, %s8973_s23  ;;  %s9057_s23 = smov 15  }
 0x27f   : > { %v7632_v57 = vpop.f32.mrb[12].mxu0 }
 0x280   : > { %v7634_v58 = vpop.f32.mrb[13].mxu0 }
 0x281   : > { %v1139_v59 = vpop.f32.mrb[14].mxu0 }
 0x282   : > { %1250 = vrot.lane.b32.xlu1 %v1139_v59, %s8971_s1  ;;  %v1141_v60 = vpop.f32.mrb[15].mxu0 }
 0x283   : > { %1252 = vrot.lane.b32.xlu0 %v1141_v60, %s8971_s1  ;;  %s9043_s1 = sld [smem:[#allocation21_spill]] }
 0x287   : > { %v1145_v63 = vpop.f32.mrb[16].mxu0 }
 0x288   : > { %1269 = vrot.lane.b32.xlu1 %v1145_v63, %s8985_s27  ;;  %v1147_v2 = vpop.f32.mrb[17].mxu0 }
 0x289   : > { %1271 = vrot.lane.b32.xlu0 %v1147_v2, %s8985_s27  ;;  %v1149_v4 = vpop.f32.mrb[18].mxu0  ;;  %v970_v10 = vld [vmem:[%s9043_s1] sm:$0xf]  ;;  %s9046_s1 = sld [smem:[#allocation28_spill]]  ;;  %s9047_s27 = sld [smem:[#allocation29_spill]] }
 0x28a   : > { %v1151_v5 = vpop.f32.mrb[19].mxu0 }
 0x28c   : > { %1288 = vrot.lane.b32.xlu1 %v1149_v4, %s8977_s12  ;;  %v6125_v4 = vld [vmem:[%s9045_s11 + $0x6] sm:$0x3] }
 0x28d   : > { %1290 = vrot.lane.b32.xlu0 %v1151_v5, %s8977_s12  ;;  %s9059_s12 = smov 127  }
 0x28f   : > { %v1155_v6 = vpop.f32.mrb[20].mxu0 }
 0x290   : > { %1307 = vrot.lane.b32.xlu1 %v1155_v6, %s8981_s0  ;;  %v1157_v7 = vpop.f32.mrb[21].mxu0 }
 0x291   : > { %1309 = vrot.lane.b32.xlu0 %v1157_v7, %s8981_s0  ;;  %v1159_v8 = vpop.f32.mrb[22].mxu0  ;;  %s9048_s0 = sld [smem:[#allocation22_spill]] }
 0x292   : > { %v1160_v9 = vpop.f32.mrb[23].mxu0 }
 0x295   : > { %973 = vperm.xlu0 %6612, %v970_v10  }
 0x297   : > { %v6443_v12 = vpop.f32.mrb[24].mxu0 }
 0x298   : > { %v6444_v13 = vpop.f32.mrb[25].mxu0 }
 0x299   : > { %v6445_v14 = vadd.f32 %v6444_v13, %v6443_v12  ;;  %5771 = vperm.xlu0 %6612, %v5768_v11   ;;  %v6446_v15 = vpop.f32.mrb[26].mxu0 }
 0x29a   : > { %v6447_v16 = vpop.f32.mrb[27].mxu0 }
 0x29b   : > { %v1494_v21 = vpack.c.bf16 %v6445_v14, %v6445_v14 }
 0x29d   : > { %6108 = vmatmul.mubr.msk.bf16.vlgmr.msra.gmra.mrb[4].mxu1 %vm922_vm0, %v1494_v21  ;;  %6109 = vmatmul.mubr.msk.bf16.vlgmr.msra.gmra.mrb[28].mxu0 %vm922_vm0, %v1494_v21 }
 0x29e   : > { %1689 = vmatpush1.bf16.msra.mxu1 %v6641_v17  ;;  %1730 = vmatpush1.bf16.msra.mxu0 %v6644_v18 }
 0x29f   : > { %1720 = vmatprep.mubr.bf16.mxu1 %v7142_v0  ;;  %1761 = vmatprep.mubr.bf16.mxu0 %v7142_v0 }
 0x2a0   : > { %1770 = vmatprep.subr.bf16.mxu1 %v6649_v22  ;;  %1811 = vmatprep.subr.bf16.mxu0 %v6652_v23  ;;  %v6131_v22 = vld [vmem:[%s9045_s11 + $0xa] sm:$0x3] }
 0x2a5   : > { %6110 = vmatmul.mubr.msk.bf16.vlgmr.msra.gmra.mrb[8].mxu1 %vm922_vm0, %v1494_v21  ;;  %6111 = vmatmul.mubr.msk.bf16.vlgmr.msra.gmra.mrb[32].mxu0 %vm922_vm0, %v1494_v21 }
 0x2a6   : > { %1771 = vmatpush1.bf16.msra.mxu1 %v6647_v24  ;;  %1812 = vmatpush1.bf16.msra.mxu0 %v6650_v25 }
 0x2a7   : > { %1802 = vmatprep.mubr.bf16.mxu1 %v7142_v0  ;;  %1843 = vmatprep.mubr.bf16.mxu0 %v7142_v0 }
 0x2a8   : > { %1852 = vmatprep.subr.bf16.mxu1 %v6655_v26  ;;  %1893 = vmatprep.subr.bf16.mxu0 %v6658_v27 }
 0x2ad   : > { %6112 = vmatmul.mubr.msk.bf16.vlgmr.msra.gmra.mrb[12].mxu1 %vm922_vm0, %v1494_v21  ;;  %6113 = vmatmul.mubr.msk.bf16.vlgmr.msra.gmra.mrb[36].mxu0 %vm922_vm0, %v1494_v21 }
 0x2ae   : > { %1853 = vmatpush1.bf16.msra.mxu1 %v6653_v28  ;;  %1894 = vmatpush1.bf16.msra.mxu0 %v6656_v29 }
 0x2af   : > { %1884 = vmatprep.mubr.bf16.mxu1 %v7142_v0  ;;  %1925 = vmatprep.mubr.bf16.mxu0 %v7142_v0 }
 0x2b0   : > { %1934 = vmatprep.subr.bf16.mxu1 %v6661_v30 }
 0x2b5   : > { %6114 = vmatmul.mubr.msk.bf16.vlgmr.msra.gmra.mrb[16].mxu1 %vm922_vm0, %v1494_v21  ;;  %6115 = vmatmul.mubr.msk.bf16.vlgmr.msra.gmra.mrb[40].mxu0 %vm922_vm0, %v1494_v21 }
 0x2b6   : > { %1935 = vmatpush1.bf16.msra.mxu1 %v6659_v31  ;;  %1966 = vmatprep.mubr.bf16.mxu1 %v7142_v0 }
 0x2b7   : > { %2037 = vmatprep.mubr.bf16.mxu0 %v7142_v0 }
 0x2bd   : > { %6116 = vmatmul.mubr.msk.bf16.vlgmr.msra.gmra.mrb[20].mxu1 %vm922_vm0, %v1494_v21  ;;  %v6128_v21 = vld [vmem:[%s9045_s11 + $0x8] sm:$0x3] }
 0x2be   : > { %2087 = vmatprep.mubr.bf16.mxu1 %v7142_v0 }
 0x370   : > { %v1640_v32 = vpop.f32.mrb[4].mxu1  ;;  %v1681_v33 = vpop.f32.mrb[28].mxu0 }
 0x371   : > { %v1975_v34 = vpack.c.bf16 %v1640_v32, %v1640_v32  ;;  %v1977_v35 = vpack.c.bf16 %v1681_v33, %v1681_v33  ;;  %v1642_v36 = vpop.f32.mrb[5].mxu1  ;;  %v1683_v37 = vpop.f32.mrb[29].mxu0  ;;  %v6662_v33 = vld [vmem:[%s9046_s1 + $0x40] sm:$0xff]  }
 0x372   : > { %v1976_v38 = vpack.c.bf16 %v1642_v36, %v1642_v36  ;;  %v1978_v39 = vpack.c.bf16 %v1683_v37, %v1683_v37  ;;  %v1644_v40 = vpop.f32.mrb[6].mxu1  ;;  %v1685_v41 = vpop.f32.mrb[30].mxu0 }
 0x373   : > { %v2050_v42 = vsel %vm1074_vm1, %v1975_v34, 0  ;;  %v2000_v43 = vsel %vm1074_vm1, %v1977_v35, 0  ;;  %v1645_v44 = vpop.f32.mrb[7].mxu1  ;;  %v1686_v45 = vpop.f32.mrb[31].mxu0  ;;  %v6663_v40 = vld [vmem:[%s9046_s1] sm:$0xff]   ;;  %v6664_v41 = vld [vmem:[%s9046_s1 + $0x48] sm:$0xff]  }
 0x374   : > { %6118 = vmatprep.subr.msk.bf16.mxu0 %vm1074_vm1, %v1978_v39  ;;  %6120 = vmatprep.subr.msk.bf16.mxu1 %vm1074_vm1, %v1976_v38  ;;  %v6134_v38 = vld [vmem:[%s9045_s11 + $0xc] sm:$0x3]  ;;  %v6137_v39 = vld [vmem:[%s9045_s11 + $0xe] sm:$0x3] }
 0x375   : > { %2006 = vmatpush1.bf16.msra.mxu0 %v2000_v43  ;;  %2056 = vmatpush1.bf16.msra.mxu1 %v2050_v42  ;;  %v6665_v45 = vld [vmem:[%s9046_s1 + $0x8] sm:$0xff]  }
 0x378   : > { %v1722_v48 = vpop.f32.mrb[8].mxu1  ;;  %v1763_v49 = vpop.f32.mrb[32].mxu0  ;;  %6119 = vmatmul.mubr.msk.bf16.vlgmr.msra.gmra.mrb[44].mxu0 %vm1058_vm2, %v6117_v46  ;;  %6121 = vmatmul.mubr.msk.bf16.vlgmr.msra.gmra.mrb[24].mxu1 %vm1058_vm2, %v1993_v47 }
 0x379   : > { %v1979_v50 = vpack.c.bf16 %v1722_v48, %v1722_v48  ;;  %v1981_v51 = vpack.c.bf16 %v1763_v49, %v1763_v49  ;;  %v1724_v52 = vpop.f32.mrb[9].mxu1  ;;  %v1765_v53 = vpop.f32.mrb[33].mxu0  ;;  %2139 = vmatprep.mubr.bf16.mxu0 %v7142_v0  ;;  %2193 = vmatprep.mubr.bf16.mxu1 %v7142_v0  ;;  %v6666_v48 = vld [vmem:[%s9046_s1 + $0x50] sm:$0xff]  }
 0x37a   : > { %v1980_v54 = vpack.c.bf16 %v1724_v52, %v1724_v52  ;;  %v1982_v55 = vpack.c.bf16 %v1765_v53, %v1765_v53  ;;  %v1726_v56 = vpop.f32.mrb[10].mxu1  ;;  %v1767_v59 = vpop.f32.mrb[34].mxu0  ;;  %v6668_v52 = vld [vmem:[%s9046_s1 + $0x58] sm:$0xff]  }
 0x37b   : > { %v2102_v60 = vsel %vm1074_vm1, %v1979_v50, 0  ;;  %v2156_v63 = vsel %vm1074_vm1, %v1981_v51, 0  ;;  %v1727_v1 = vpop.f32.mrb[11].mxu1  ;;  %v1768_v2 = vpop.f32.mrb[35].mxu0  ;;  %v6667_v51 = vld [vmem:[%s9046_s1 + $0x10] sm:$0xff]   ;;  %v6669_v53 = vld [vmem:[%s9046_s1 + $0x18] sm:$0xff]  }
 0x37c   : > { %6123 = vmatprep.subr.msk.bf16.mxu0 %vm1074_vm1, %v1980_v54  ;;  %6126 = vmatprep.subr.msk.bf16.mxu1 %vm1074_vm1, %v1982_v55  ;;  %v6670_v54 = vld [vmem:[%s9046_s1 + $0x60] sm:$0xff]   ;;  %v6672_v56 = vld [vmem:[%s9046_s1 + $0x68] sm:$0xff]   ;;  %v6676_v1 = vld [vmem:[%s9046_s1 + $0x78] sm:$0xff]  }
 0x37d   : > { %2108 = vmatpush1.bf16.msra.mxu0 %v2102_v60  ;;  %2162 = vmatpush1.bf16.msra.mxu1 %v2156_v63  ;;  %v6671_v55 = vld [vmem:[%s9046_s1 + $0x20] sm:$0xff]   ;;  %v6673_v59 = vld [vmem:[%s9046_s1 + $0x28] sm:$0xff]   ;;  %v6674_v60 = vld [vmem:[%s9046_s1 + $0x70] sm:$0xff]  }
 0x37e   : > { %v6675_v63 = vld [vmem:[%s9046_s1 + $0x30] sm:$0xff]   ;;  %v6677_v2 = vld [vmem:[%s9046_s1 + $0x38] sm:$0xff]   ;;  %s9069_s1 = sshll.u32 %s7488_s21, 5 }
 0x380   : > { %v1804_v5 = vpop.f32.mrb[12].mxu1  ;;  %v1845_v6 = vpop.f32.mrb[36].mxu0  ;;  %6124 = vmatmul.mubr.msk.bf16.vlgmr.msra.gmra.mrb[48].mxu0 %vm1058_vm2, %v6122_v3  ;;  %6127 = vmatmul.mubr.msk.bf16.vlgmr.msra.gmra.mrb[28].mxu1 %vm1058_vm2, %v6125_v4  ;;  %v6678_v3 = vld [vmem:[%s9047_s27] ss:$72 sps:$4 sm:$0xff]   ;;  %v6680_v4 = vld [vmem:[%s9047_s27 + $0x4] ss:$72 sps:$4 sm:$0xff]  }
 0x381   : > { %v1983_v7 = vpack.c.bf16 %v1804_v5, %v1804_v5  ;;  %v1985_v8 = vpack.c.bf16 %v1845_v6, %v1845_v6  ;;  %v1806_v9 = vpop.f32.mrb[13].mxu1  ;;  %v1847_v10 = vpop.f32.mrb[37].mxu0  ;;  %2247 = vmatprep.mubr.bf16.mxu0 %v7142_v0  ;;  %2301 = vmatprep.mubr.bf16.mxu1 %v7142_v0  ;;  %v6681_v5 = vld [vmem:[%s9047_s27 + $0x10] ss:$72 sps:$4 sm:$0xff]   ;;  %v6683_v6 = vld [vmem:[%s9047_s27 + $0x14] ss:$72 sps:$4 sm:$0xff]  }
 0x382   : > { %v1984_v11 = vpack.c.bf16 %v1806_v9, %v1806_v9  ;;  %v1986_v12 = vpack.c.bf16 %v1847_v10, %v1847_v10  ;;  %v1808_v13 = vpop.f32.mrb[14].mxu1  ;;  %v1849_v14 = vpop.f32.mrb[38].mxu0  ;;  %v6687_v9 = vld [vmem:[%s9047_s27 + $0xa0] ss:$72 sps:$4 sm:$0xff]   ;;  %v6692_v10 = vld [vmem:[%s9047_s27 + $0x124] ss:$72 sps:$4 sm:$0xff]  }
 0x383   : > { %v2210_v15 = vsel %vm1074_vm1, %v1983_v7, 0  ;;  %v2264_v16 = vsel %vm1074_vm1, %v1985_v8, 0  ;;  %v1809_v17 = vpop.f32.mrb[15].mxu1  ;;  %v1850_v18 = vpop.f32.mrb[39].mxu0  ;;  %v6689_v7 = vld [vmem:[%s9047_s27 + $0xa4] ss:$72 sps:$4 sm:$0xff]  }
 0x384   : > { %6129 = vmatprep.subr.msk.bf16.mxu0 %vm1074_vm1, %v1984_v11  ;;  %6132 = vmatprep.subr.msk.bf16.mxu1 %vm1074_vm1, %v1986_v12  ;;  %v6684_v8 = vld [vmem:[%s9047_s27 + $0x90] ss:$72 sps:$4 sm:$0xff]   ;;  %v6695_v11 = vld [vmem:[%s9047_s27 + $0x134] ss:$72 sps:$4 sm:$0xff]   ;;  %v6690_v12 = vld [vmem:[%s9047_s27 + $0x120] ss:$72 sps:$4 sm:$0xff]  }
 0x385   : > { %2216 = vmatpush1.bf16.msra.mxu0 %v2210_v15  ;;  %2270 = vmatpush1.bf16.msra.mxu1 %v2264_v16  ;;  %v6693_v13 = vld [vmem:[%s9047_s27 + $0x130] ss:$72 sps:$4 sm:$0xff]   ;;  %v6698_v14 = vld [vmem:[%s9047_s27 + $0x1b4] ss:$72 sps:$4 sm:$0xff]   ;;  %v6701_v15 = vld [vmem:[%s9047_s27 + $0x1c4] ss:$72 sps:$4 sm:$0xff]  }
 0x386   : > { %v6696_v16 = vld [vmem:[%s9047_s27 + $0x1b0] ss:$72 sps:$4 sm:$0xff]   ;;  %v6699_v17 = vld [vmem:[%s9047_s27 + $0x1c0] ss:$72 sps:$4 sm:$0xff]   ;;  %v6704_v18 = vld [vmem:[%s9047_s27 + $0xc] ss:$72 sps:$4 sm:$0xff]  }
 0x388   : > { %v1886_v23 = vpop.f32.mrb[16].mxu1  ;;  %v1927_v24 = vpop.f32.mrb[40].mxu0  ;;  %6130 = vmatmul.mubr.msk.bf16.vlgmr.msra.gmra.mrb[52].mxu0 %vm1058_vm2, %v6128_v21  ;;  %6133 = vmatmul.mubr.msk.bf16.vlgmr.msra.gmra.mrb[32].mxu1 %vm1058_vm2, %v6131_v22  ;;  %v6707_v21 = vld [vmem:[%s9047_s27 + $0x24] ss:$72 sps:$4 sm:$0xff]  }
 0x389   : > { %v1987_v25 = vpack.c.bf16 %v1886_v23, %v1886_v23  ;;  %v1989_v26 = vpack.c.bf16 %v1927_v24, %v1927_v24  ;;  %v1888_v27 = vpop.f32.mrb[17].mxu1  ;;  %v1929_v28 = vpop.f32.mrb[41].mxu0  ;;  %2355 = vmatprep.mubr.bf16.mxu0 %v7142_v0  ;;  %2409 = vmatprep.mubr.bf16.mxu1 %v7142_v0 }
 0x38a   : > { %v1988_v29 = vpack.c.bf16 %v1888_v27, %v1888_v27  ;;  %v1990_v30 = vpack.c.bf16 %v1929_v28, %v1929_v28  ;;  %v1890_v31 = vpop.f32.mrb[18].mxu1  ;;  %v1931_v32 = vpop.f32.mrb[42].mxu0 }
 0x38b   : > { %v2318_v34 = vsel %vm1074_vm1, %v1987_v25, 0  ;;  %v2372_v35 = vsel %vm1074_vm1, %v1989_v26, 0  ;;  %v1891_v36 = vpop.f32.mrb[19].mxu1  ;;  %v1932_v37 = vpop.f32.mrb[43].mxu0 }
 0x38c   : > { %6135 = vmatprep.subr.msk.bf16.mxu0 %vm1074_vm1, %v1988_v29  ;;  %6138 = vmatprep.subr.msk.bf16.mxu1 %vm1074_vm1, %v1990_v30  ;;  %v1165_v22 = vpop.permute.xlu1 %1164  ;;  %v1163_v23 = vpop.permute.xlu0 %1162  ;;  %v1166_v30 = vlaneseq }
 0x38d   : > { %2324 = vmatpush1.bf16.msra.mxu0 %v2318_v34  ;;  %2378 = vmatpush1.bf16.msra.mxu1 %v2372_v35 }
 0x38e   : > { %6449 = vmatprep.subr.bf16.mxu1 %v6662_v33 }
 0x390   : > { %v1968_v42 = vpop.f32.mrb[20].mxu1  ;;  %6136 = vmatmul.mubr.msk.bf16.vlgmr.msra.gmra.mrb[56].mxu0 %vm1058_vm2, %v6134_v38  ;;  %6139 = vmatmul.mubr.msk.bf16.vlgmr.msra.gmra.mrb[36].mxu1 %vm1058_vm2, %v6137_v39  ;;  %v1182_v24 = vpop.permute.xlu1 %1181  ;;  %v7881_v38 = vshrl.u32 %v1166_v30, 7 }
 0x391   : > { %v1991_v43 = vpack.c.bf16 %v1968_v42, %v1968_v42  ;;  %v1970_v44 = vpop.f32.mrb[21].mxu1  ;;  %6450 = vmatpush3.bf16.msra.mxu1 %v6663_v40  ;;  %2636 = vmatprep.mubr.bf16.mxu1 %v7525_v20  ;;  %v6140_v20 = vld [vmem:[%s9045_s11 + $0x10] sm:$0x3]  ;;  %v1184_v25 = vpop.permute.xlu0 %1183  ;;  %s9049_s11 = sld [smem:[#allocation24_spill]] }
 0x392   : > { %v1992_v46 = vpack.c.bf16 %v1970_v44, %v1970_v44  ;;  %v1972_v47 = vpop.f32.mrb[22].mxu1  ;;  %6451 = vmatprep.subr.bf16.mxu1 %v6664_v41  ;;  %2463 = vmatprep.mubr.bf16.mxu0 %v7142_v0  ;;  %v7883_v44 = vand.u32 127, %v1166_v30 }
 0x393   : > { %v2426_v49 = vsel %vm1074_vm1, %v1991_v43, 0  ;;  %v1973_v50 = vpop.f32.mrb[23].mxu1  ;;  %v7890_v47 = vld [vmem:[%s9048_s0] sm:$0xff] }
 0x394   : > { %6141 = vmatprep.subr.msk.bf16.mxu0 %vm1074_vm1, %v1992_v46  ;;  %v1201_v26 = vpop.permute.xlu1 %1200  ;;  %v1190_v46 = vsub.s32 1, %v7881_v38  ;;  %vm1185_vm3 = vcmp.lt.s32.totalorder %v7883_v44, 16  ;;  %vm1168_vm4 = vcmp.lt.s32.totalorder %v7883_v44, 17  ;;  %vm1204_vm5 = vcmp.lt.s32.totalorder %v7883_v44, 15 }
 0x395   : > { %2432 = vmatpush1.bf16.msra.mxu0 %v2426_v49  ;;  %6452 = vmatpush3.bf16.msra.mxu1 %v6665_v45  ;;  %v1203_v27 = vpop.permute.xlu0 %1202  ;;  %v1173_v45 = vsub.s32 0, %v7881_v38  ;;  %vm1223_vm6 = vcmp.lt.s32.totalorder %v7883_v44, 1  ;;  %vm1254_vm7 = vcmp.lt.s32.totalorder %v7883_v44, 127  ;;  %vm1273_vm8 = vcmp.lt.s32.totalorder %v7883_v44, 113 }
 0x396   : > { %6453 = vmatprep.subr.bf16.mxu1 %v6666_v48  ;;  %3081 = vmatprep.subr.bf16.mxu0 %v6680_v4  ;;  %v1209_v48 = vsub.s32 2, %v7881_v38  ;;  %vm1292_vm9 = vcmp.lt.s32.totalorder %v7883_v44, 112  ;;  %vm1311_vm10 = vcmp.lt.s32.totalorder %v7883_v44, 111 }
 0x398   : > { %6142 = vmatmul.mubr.msk.bf16.vlgmr.msra.gmra.mrb[60].mxu0 %vm1058_vm2, %v6140_v20  ;;  %v7875_v28 = vpop.permute.xlu1 %1219  ;;  %v1240_v20 = vsub.s32 4, %v7881_v38 }
 0x399   : > { %6454 = vmatpush3.bf16.msra.mxu1 %v6667_v51  ;;  %3113 = vmatprep.mubr.bf16.mxu0 %v7142_v0  ;;  %v1222_v29 = vpop.permute.xlu0 %1221  ;;  %v7901_v51 = vrot.slane %v7890_v47, %v1173_v45 }
 0x39a   : > { %6455 = vmatprep.subr.bf16.mxu1 %v6668_v52  ;;  %3082 = vmatpush1.bf16.msra.mxu0 %v6678_v3  ;;  %v1187_v3 = vsel %vm1185_vm3, %v1184_v25, %v1182_v24 }
 0x39c   : > { %v7877_v31 = vpop.permute.xlu1 %1250 }
 0x39d   : > { %6456 = vmatpush3.bf16.msra.mxu1 %v6669_v53  ;;  %v7879_v32 = vpop.permute.xlu0 %1252 }
 0x39e   : > { %6457 = vmatprep.subr.bf16.mxu1 %v6670_v54  ;;  %v7906_v54 = vld [vmem:[%s9048_s0 + $0x8] sm:$0xff] }
 0x3a0   : > { %v7894_v49 = vpop.permute.xlu1 %1269 }
 0x3a1   : > { %6458 = vmatpush3.bf16.msra.mxu1 %v6671_v55  ;;  %v7896_v50 = vpop.permute.xlu0 %1271  ;;  %v7909_v55 = vrot.slane %v7890_v47, %v1190_v46 }
 0x3a2   : > { %6459 = vmatprep.subr.bf16.mxu1 %v6672_v56  ;;  %v1228_v56 = vsub.s32 3, %v7881_v38 }
 0x3a5   : > { %6460 = vmatpush3.bf16.msra.mxu1 %v6673_v59 }
 0x3a6   : > { %6461 = vmatprep.subr.bf16.mxu1 %v6674_v60 }
 0x3a9   : > { %6462 = vmatpush3.bf16.msra.mxu1 %v6675_v63 }
 0x3aa   : > { %6463 = vmatprep.subr.bf16.mxu1 %v6676_v1  ;;  %v7914_v1 = vrot.slane %v7906_v54, %v1173_v45 }
 0x3ad   : > { %6464 = vmatpush3.bf16.msra.mxu1 %v6677_v2  ;;  %v7917_v2 = vrot.slane %v7906_v54, %v1190_v46 }
 0x3ae   : > { %3163 = vmatprep.subr.bf16.mxu1 %v6683_v6 }
 0x3b0   : > { %2637 = vmatmul.mubr.bf16.vlgmr.msra.gmra.mrb[40].mxu1 %v7523_v19  ;;  %v6686_v19 = vld [vmem:[%s9047_s27 + $0x94] ss:$72 sps:$4 sm:$0xff]  }
 0x3b1   : > { %3195 = vmatprep.mubr.bf16.mxu1 %v7142_v0  ;;  %3164 = vmatpush1.bf16.msra.mxu1 %v6681_v5 }
 0x3b2   : > { %3083 = vmatprep.subr.bf16.mxu0 %v6686_v19  ;;  %3165 = vmatprep.subr.bf16.mxu1 %v6689_v7  ;;  %v1186_v19 = vsel %vm1185_vm3, %v1182_v24, %v1184_v25  ;;  %v7924_v7 = vrot.slane %v7890_v47, %v1209_v48  ;;  %v7947_v25 = vrot.slane %v7906_v54, %v1228_v56 }
 0x3b3   : > { %3084 = vmatpush1.bf16.msra.mxu0 %v6684_v8  ;;  %v1197_v24 = vmul.f32 %v7917_v2, %v1186_v19 }
 0x3b4   : > { %3085 = vmatprep.subr.bf16.mxu0 %v6692_v10 }
 0x3b5   : > { %3166 = vmatpush1.bf16.msra.mxu1 %v6687_v9 }
 0x3b6   : > { %3167 = vmatprep.subr.bf16.mxu1 %v6695_v11  ;;  %v1170_v11 = vsel %vm1168_vm4, %v1165_v22, %v1163_v23 }
 0x3b7   : > { %3086 = vmatpush1.bf16.msra.mxu0 %v6690_v12  ;;  %v7930_v12 = vrot.slane %v7906_v54, %v1209_v48 }
 0x3b8   : > { %3087 = vmatprep.subr.bf16.mxu0 %v6698_v14 }
 0x3b9   : > { %3168 = vmatpush1.bf16.msra.mxu1 %v6693_v13  ;;  %v1206_v13 = vsel %vm1204_vm5, %v1203_v27, %v1201_v26 }
 0x3ba   : > { %3169 = vmatprep.subr.bf16.mxu1 %v6701_v15  ;;  %v1169_v15 = vsel %vm1168_vm4, %v1163_v23, %v1165_v22  ;;  %v1225_v22 = vsel %vm1223_vm6, %v1222_v29, %v7875_v28  ;;  %v1179_v23 = vmul.f32 %v7901_v51, %v1170_v11  ;;  %v1215_v30 = vmul.f32 %v7924_v7, %v1206_v13 }
 0x3bb   : > { %3088 = vmatpush1.bf16.msra.mxu0 %v6696_v16  ;;  %v1196_v16 = vmul.f32 %v7909_v55, %v1187_v3 }
 0x3bc   : > { %3122 = vmatprep.subr.bf16.mxu0 %v6704_v18  ;;  %v7940_v18 = vrot.slane %v7890_v47, %v1228_v56 }
 0x3bd   : > { %3170 = vmatpush1.bf16.msra.mxu1 %v6699_v17  ;;  %v1205_v17 = vsel %vm1204_vm5, %v1201_v26, %v1203_v27  ;;  %v1224_v26 = vsel %vm1223_vm6, %v7875_v28, %v1222_v29  ;;  %v1259_v27 = vsub.s32 5, %v7881_v38  ;;  %v1278_v28 = vsub.s32 6, %v7881_v38 }
 0x3be   : > { %3245 = vmatprep.subr.bf16.mxu1 %v6707_v21  ;;  %v7943_v21 = vrot.slane %v7890_v47, %v1240_v20  ;;  %v1235_v48 = vmul.f32 %v7947_v25, %v1224_v26 }
 0x3bf   : > { %v7988_v13 = vrot.slane %v7906_v54, %v1278_v28 }
 0x44b   : > { %v2039_v33 = vpop.f32.mrb[44].mxu0  ;;  %v2089_v34 = vpop.f32.mrb[24].mxu1 }
 0x44c   : > { %v2090_v35 = vadd.f32 %v2089_v34, %v2039_v33  ;;  %v2041_v36 = vpop.f32.mrb[45].mxu0  ;;  %v2091_v37 = vpop.f32.mrb[25].mxu1 }
 0x44d   : > { %v2092_v39 = vadd.f32 %v2091_v37, %v2041_v36  ;;  %v2093_v40 = vpop.f32.mrb[26].mxu1  ;;  %v2043_v41 = vpop.f32.mrb[46].mxu0  ;;  %v1180_v36 = vmul.f32 %v7914_v1, %v1169_v15  ;;  %v1216_v37 = vmul.f32 %v7930_v12, %v1205_v17 }
 0x44e   : > { %v2094_v42 = vpop.f32.mrb[27].mxu1  ;;  %v2044_v43 = vpop.f32.mrb[47].mxu0  ;;  %v1198_v41 = vadd.f32 %v1196_v16, %v1179_v23  ;;  %v1275_v16 = vsel %vm1273_vm8, %v7896_v50, %v7894_v49 }
 0x44f   : > { %v1289_v33 = vpop.permute.xlu1 %1288  ;;  %v1291_v34 = vpop.permute.xlu0 %1290  ;;  %v1234_v42 = vmul.f32 %v7940_v18, %v1225_v22  ;;  %v1199_v46 = vadd.f32 %v1197_v24, %v1180_v36 }
 0x453   : > { %v2141_v52 = vpop.f32.mrb[48].mxu0  ;;  %v2195_v53 = vpop.f32.mrb[28].mxu1 }
 0x454   : > { %v2148_v59 = vadd.f32 %v2141_v52, %v2090_v35  ;;  %v2143_v60 = vpop.f32.mrb[49].mxu0  ;;  %v2197_v63 = vpop.f32.mrb[29].mxu1  ;;  %v7959_v35 = vrot.slane %v7906_v54, %v1240_v20  ;;  %v1297_v20 = vsub.s32 7, %v7881_v38  ;;  %v1255_v38 = vsel %vm1254_vm7, %v7877_v31, %v7879_v32 }
 0x455   : > { %v2149_v4 = vadd.f32 %v2143_v60, %v2092_v39  ;;  %v2199_v5 = vpop.f32.mrb[30].mxu1  ;;  %v2145_v6 = vpop.f32.mrb[50].mxu0  ;;  %v7969_v60 = vrot.slane %v7890_v47, %v1259_v27 }
 0x456   : > { %v2202_v8 = vadd.f32 %v2195_v53, %v2148_v59  ;;  %v2200_v9 = vpop.f32.mrb[31].mxu1  ;;  %v2146_v10 = vpop.f32.mrb[51].mxu0  ;;  %v1217_v59 = vadd.f32 %v1215_v30, %v1198_v41  ;;  %v1218_v5 = vadd.f32 %v1216_v37, %v1199_v46  ;;  %v7973_v6 = vrot.slane %v7906_v54, %v1259_v27 }
 0x457   : > { %v2203_v14 = vadd.f32 %v2197_v63, %v2149_v4  ;;  %v1256_v9 = vsel %vm1254_vm7, %v7879_v32, %v7877_v31  ;;  %v7984_v10 = vrot.slane %v7890_v47, %v1278_v28  ;;  %v7995_v15 = vrot.slane %v7890_v47, %v1297_v20  ;;  %v1308_v17 = vpop.permute.xlu1 %1307  ;;  %v1310_v24 = vpop.permute.xlu0 %1309 }
 0x458   : > { %v1237_v11 = vadd.f32 %v1235_v48, %v1218_v5  ;;  %v1246_v31 = vmul.f32 %v7943_v21, %v7632_v57  ;;  %v1265_v32 = vmul.f32 %v7969_v60, %v1255_v38  ;;  %v1247_v22 = vmul.f32 %v7959_v35, %v7634_v58 }
 0x459   : > { %v1266_v47 = vmul.f32 %v7973_v6, %v1256_v9  ;;  %v8009_v23 = vrot.slane %v7906_v54, %v1297_v20  ;;  %v1293_v57 = vsel %vm1292_vm9, %v1289_v33, %v1291_v34  ;;  %v6072_v54 = vld [vmem:[%s9048_s0 + $0x10] ss:$0 sm:$0xff]  ;;  %v1312_v41 = vsel %vm1311_vm10, %v1308_v17, %v1310_v24 }
 0x45a   : > { %v1249_v58 = vadd.f32 %v1247_v22, %v1237_v11 }
 0x45b   : > { %v2249_v39 = vpop.f32.mrb[52].mxu0  ;;  %v2303_v40 = vpop.f32.mrb[32].mxu1 }
 0x45c   : > { %v2256_v29 = vadd.f32 %v2249_v39, %v2202_v8  ;;  %v2251_v43 = vpop.f32.mrb[53].mxu0  ;;  %v2305_v45 = vpop.f32.mrb[33].mxu1  ;;  %v1236_v8 = vadd.f32 %v1234_v42, %v1217_v59 }
 0x45d   : > { %v2257_v52 = vadd.f32 %v2251_v43, %v2203_v14  ;;  %v2307_v53 = vpop.f32.mrb[34].mxu1  ;;  %v2253_v56 = vpop.f32.mrb[54].mxu0  ;;  %v1274_v14 = vsel %vm1273_vm8, %v7894_v49, %v7896_v50  ;;  %v1294_v50 = vsel %vm1292_vm9, %v1291_v34, %v1289_v33  ;;  %v6073_v33 = vld [vmem:[%s9048_s0 + $0x18] ss:$0 sm:$0xff]  ;;  %v1313_v34 = vsel %vm1311_vm10, %v1310_v24, %v1308_v17 }
 0x45e   : > { %v2310_v63 = vadd.f32 %v2303_v40, %v2256_v29  ;;  %v2308_v3 = vpop.f32.mrb[35].mxu1  ;;  %v2254_v4 = vpop.f32.mrb[55].mxu0  ;;  %v1248_v27 = vadd.f32 %v1246_v31, %v1236_v8  ;;  %v1284_v49 = vmul.f32 %v7984_v10, %v1274_v14  ;;  %v1285_v40 = vmul.f32 %v7988_v13, %v1275_v16 }
 0x45f   : > { %v2311_v19 = vadd.f32 %v2305_v45, %v2257_v52  ;;  %v1303_v45 = vmul.f32 %v7995_v15, %v1293_v57  ;;  %v1268_v52 = vadd.f32 %v1266_v47, %v1249_v58  ;;  %v1304_v53 = vmul.f32 %v8009_v23, %v1294_v50  ;;  %v6711_v58 = vld [vmem:[%s9047_s27 + $0xb0] ss:$72 sps:$4 sm:$0xff]  }
 0x460   : > { %v1267_v43 = vadd.f32 %v1265_v32, %v1248_v27  ;;  %v1323_v4 = vmul.f32 %v6073_v33, %v1313_v34  ;;  %v6702_v27 = vld [vmem:[%s9047_s27 + $0x8] ss:$72 sps:$4 sm:$0xff]   ;;  %v6728_v33 = vld [vmem:[%s9047_s27 + $0x1c] ss:$72 sps:$4 sm:$0xff]  }
 0x461   : > { %v1287_v3 = vadd.f32 %v1285_v40, %v1268_v52  ;;  %v6716_v40 = vld [vmem:[%s9047_s27 + $0x12c] ss:$72 sps:$4 sm:$0xff]  }
 0x462   : > { %v1286_v59 = vadd.f32 %v1284_v49, %v1267_v43  ;;  %v6705_v49 = vld [vmem:[%s9047_s27 + $0x20] ss:$72 sps:$4 sm:$0xff]   ;;  %v6731_v34 = vld [vmem:[%s9047_s27 + $0x34] ss:$72 sps:$4 sm:$0xff]   ;;  %v6737_v52 = vld [vmem:[%s9047_s27 + $0xc4] ss:$72 sps:$4 sm:$0xff]  }
 0x463   : > { %v2357_v30 = vpop.f32.mrb[56].mxu0  ;;  %v2411_v26 = vpop.f32.mrb[36].mxu1  ;;  %v1306_v38 = vadd.f32 %v1304_v53, %v1287_v3  ;;  %v6720_v43 = vld [vmem:[%s9047_s27 + $0x1b8] ss:$72 sps:$4 sm:$0xff]   ;;  %v6732_v53 = vld [vmem:[%s9047_s27 + $0xa8] ss:$72 sps:$4 sm:$0xff]  }
 0x464   : > { %v2364_v36 = vadd.f32 %v2357_v30, %v2310_v63  ;;  %v2359_v37 = vpop.f32.mrb[57].mxu0  ;;  %v2413_v39 = vpop.f32.mrb[37].mxu1  ;;  %v1322_v63 = vmul.f32 %v6072_v54, %v1312_v41  ;;  %v1305_v5 = vadd.f32 %v1303_v45, %v1286_v59  ;;  %v6719_v54 = vld [vmem:[%s9047_s27 + $0x144] ss:$72 sps:$4 sm:$0xff]   ;;  %v6714_v41 = vld [vmem:[%s9047_s27 + $0x128] ss:$72 sps:$4 sm:$0xff]  }
 0x465   : > { %v2365_v42 = vadd.f32 %v2359_v37, %v2311_v19  ;;  %v2415_v28 = vpop.f32.mrb[38].mxu1  ;;  %v2361_v29 = vpop.f32.mrb[58].mxu0  ;;  %v1325_v14 = vadd.f32 %v1323_v4, %v1306_v38  ;;  %v6713_v37 = vld [vmem:[%s9047_s27 + $0xb4] ss:$72 sps:$4 sm:$0xff]   ;;  %v6723_v45 = vld [vmem:[%s9047_s27 + $0x1d0] ss:$72 sps:$4 sm:$0xff]  }
 0x466   : > { %v2418_v46 = vadd.f32 %v2411_v26, %v2364_v36  ;;  %v2416_v48 = vpop.f32.mrb[39].mxu1  ;;  %v2362_v20 = vpop.f32.mrb[59].mxu0  ;;  %v1324_v8 = vadd.f32 %v1322_v63, %v1305_v5  ;;  %v6710_v36 = vld [vmem:[%s9047_s27 + $0x9c] ss:$72 sps:$4 sm:$0xff]   ;;  %v6738_v3 = vld [vmem:[%s9047_s27 + $0x138] ss:$72 sps:$4 sm:$0xff]  }
 0x467   : > { %v2419_v56 = vadd.f32 %v2413_v39, %v2365_v42  ;;  %v6708_v39 = vld [vmem:[%s9047_s27 + $0x98] ss:$72 sps:$4 sm:$0xff]   ;;  %v6722_v28 = vld [vmem:[%s9047_s27 + $0x1bc] ss:$72 sps:$4 sm:$0xff]   ;;  %v6734_v20 = vld [vmem:[%s9047_s27 + $0xac] ss:$72 sps:$4 sm:$0xff]  }
 0x468   : > { %v6717_v42 = vld [vmem:[%s9047_s27 + $0x140] ss:$72 sps:$4 sm:$0xff]   ;;  %v6725_v29 = vld [vmem:[%s9047_s27 + $0x1d4] ss:$72 sps:$4 sm:$0xff]   ;;  %v6729_v48 = vld [vmem:[%s9047_s27 + $0x30] ss:$72 sps:$4 sm:$0xff]  }
 0x469   : > { %v6740_v59 = vld [vmem:[%s9047_s27 + $0x13c] ss:$72 sps:$4 sm:$0xff]   ;;  %v6741_v4 = vld [vmem:[%s9047_s27 + $0x150] ss:$72 sps:$4 sm:$0xff]   ;;  %v6746_v5 = vld [vmem:[%s9047_s27 + $0x1cc] ss:$72 sps:$4 sm:$0xff]  }
 0x46a   : > { %v6743_v63 = vld [vmem:[%s9047_s27 + $0x154] ss:$72 sps:$4 sm:$0xff]   ;;  %v6749_v38 = vld [vmem:[%s9047_s27 + $0x1e4] ss:$72 sps:$4 sm:$0xff]  }
 0x46b   : > { %v2465_v19 = vpop.f32.mrb[60].mxu0 }
 0x46c   : > { %v2472_v9 = vadd.f32 %v2465_v19, %v2418_v46  ;;  %v2467_v11 = vpop.f32.mrb[61].mxu0  ;;  %v6726_v46 = vld [vmem:[%s9047_s27 + $0x18] ss:$72 sps:$4 sm:$0xff]   ;;  %v6744_v19 = vld [vmem:[%s9047_s27 + $0x1c8] ss:$72 sps:$4 sm:$0xff]  }
 0x46d   : > { %v2473_v31 = vadd.f32 %v2467_v11, %v2419_v56  ;;  %v2469_v32 = vpop.f32.mrb[62].mxu0  ;;  %v6735_v56 = vld [vmem:[%s9047_s27 + $0xc0] ss:$72 sps:$4 sm:$0xff]   ;;  %v6755_v11 = vld [vmem:[%s9047_s27 + $0x44] ss:$72 sps:$4 sm:$0xff]  }
 0x46e   : > { %v8029_v16 = vadd.f32 %v2472_v9, %v1324_v8  ;;  %v2470_v17 = vpop.f32.mrb[63].mxu0  ;;  %v6747_v8 = vld [vmem:[%s9047_s27 + $0x1e0] ss:$72 sps:$4 sm:$0xff]   ;;  %v6752_v9 = vld [vmem:[%s9047_s27 + $0x2c] ss:$72 sps:$4 sm:$0xff]  }
 0x46f   : > { %v8031_v24 = vadd.f32 %v2473_v31, %v1325_v14  ;;  %v6750_v14 = vld [vmem:[%s9047_s27 + $0x28] ss:$72 sps:$4 sm:$0xff]   ;;  %v6758_v32 = vld [vmem:[%s9047_s27 + $0xbc] ss:$72 sps:$4 sm:$0xff]  }
 0x470   : > { %v6753_v31 = vld [vmem:[%s9047_s27 + $0x40] ss:$72 sps:$4 sm:$0xff]   ;;  %v6761_v17 = vld [vmem:[%s9047_s27 + $0xd4] ss:$72 sps:$4 sm:$0xff]  }
 0x483   : > { %v6465_v22 = vpop.f32.mrb[40].mxu1 }
 0x484   : > { %v6466_v47 = vpop.f32.mrb[41].mxu1 }
 0x485   : > { %v6467_v57 = vadd.f32 %v6466_v47, %v6465_v22  ;;  %v6468_v30 = vpop.f32.mrb[42].mxu1  ;;  %v6756_v22 = vld [vmem:[%s9047_s27 + $0xb8] ss:$72 sps:$4 sm:$0xff]  }
 0x486   : > { %v6469_v26 = vpop.f32.mrb[43].mxu1  ;;  %v6759_v47 = vld [vmem:[%s9047_s27 + $0xd0] ss:$72 sps:$4 sm:$0xff]   ;;  %v6767_v30 = vld [vmem:[%s9047_s27 + $0x164] ss:$72 sps:$4 sm:$0xff]  }
 0x487   : > { %v8039_v50 = vpack.c.bf16 %v6467_v57, %v6467_v57  ;;  %v6764_v57 = vld [vmem:[%s9047_s27 + $0x14c] ss:$72 sps:$4 sm:$0xff]   ;;  %v6762_v26 = vld [vmem:[%s9047_s27 + $0x148] ss:$72 sps:$4 sm:$0xff]  }
 0x489   : > { %6231 = vmatmul.mubr.msk.bf16.vlgmr.msra.gmra.mrb[64].mxu0 %vm3077_vm11, %v8039_v50  ;;  %6233 = vmatmul.mubr.msk.bf16.vlgmr.msra.gmra.mrb[44].mxu1 %vm3077_vm11, %v8039_v50 }
 0x48a   : > { %3123 = vmatpush1.bf16.msra.mxu0 %v6702_v27  ;;  %3246 = vmatpush1.bf16.msra.mxu1 %v6705_v49  ;;  %v6765_v27 = vld [vmem:[%s9047_s27 + $0x160] ss:$72 sps:$4 sm:$0xff]   ;;  %v6770_v49 = vld [vmem:[%s9047_s27 + $0x1dc] ss:$72 sps:$4 sm:$0xff]  }
 0x48b   : > { %3124 = vmatprep.subr.bf16.mxu0 %v6710_v36  ;;  %3247 = vmatprep.subr.bf16.mxu1 %v6713_v37  ;;  %v6773_v36 = vld [vmem:[%s9047_s27 + $0x1f4] ss:$72 sps:$4 sm:$0xff]   ;;  %v6768_v37 = vld [vmem:[%s9047_s27 + $0x1d8] ss:$72 sps:$4 sm:$0xff]  }
 0x48c   : > { %3154 = vmatprep.mubr.bf16.mxu0 %v7142_v0  ;;  %3277 = vmatprep.mubr.bf16.mxu1 %v7142_v0 }
 0x48e   : > { %3125 = vmatpush1.bf16.msra.mxu0 %v6708_v39  ;;  %3248 = vmatpush1.bf16.msra.mxu1 %v6711_v58  ;;  %v6771_v39 = vld [vmem:[%s9047_s27 + $0x1f0] ss:$72 sps:$4 sm:$0xff]   ;;  %v6776_v58 = vld [vmem:[%s9047_s27 + $0x3c] ss:$72 sps:$4 sm:$0xff]  }
 0x48f   : > { %3126 = vmatprep.subr.bf16.mxu0 %v6716_v40  ;;  %3249 = vmatprep.subr.bf16.mxu1 %v6719_v54  ;;  %v6774_v40 = vld [vmem:[%s9047_s27 + $0x38] ss:$72 sps:$4 sm:$0xff]   ;;  %v6779_v54 = vld [vmem:[%s9047_s27 + $0xcc] ss:$72 sps:$4 sm:$0xff]  }
 0x492   : > { %3127 = vmatpush1.bf16.msra.mxu0 %v6714_v41  ;;  %3250 = vmatpush1.bf16.msra.mxu1 %v6717_v42  ;;  %v6777_v41 = vld [vmem:[%s9047_s27 + $0xc8] ss:$72 sps:$4 sm:$0xff]   ;;  %v6782_v42 = vld [vmem:[%s9047_s27 + $0x15c] ss:$72 sps:$4 sm:$0xff]  }
 0x493   : > { %3128 = vmatprep.subr.bf16.mxu0 %v6722_v28  ;;  %3251 = vmatprep.subr.bf16.mxu1 %v6725_v29  ;;  %v6780_v28 = vld [vmem:[%s9047_s27 + $0x158] ss:$72 sps:$4 sm:$0xff]   ;;  %v6785_v29 = vld [vmem:[%s9047_s27 + $0x1ec] ss:$72 sps:$4 sm:$0xff]  }
 0x496   : > { %3129 = vmatpush1.bf16.msra.mxu0 %v6720_v43  ;;  %3252 = vmatpush1.bf16.msra.mxu1 %v6723_v45  ;;  %v6783_v43 = vld [vmem:[%s9047_s27 + $0x1e8] ss:$72 sps:$4 sm:$0xff]   ;;  %v3951_v45 = vld [vmem:[%s9049_s11] sm:$0xf]  ;;  %s9055_s11 = smov 17  }
 0x497   : > { %3204 = vmatprep.subr.bf16.mxu0 %v6728_v33  ;;  %3327 = vmatprep.subr.bf16.mxu1 %v6731_v34  ;;  %v5540_v33 = vld [vmem:[%s9050_s22] sm:$0xf]  ;;  %s9060_s22 = sld [smem:[#allocation35_spill]] }
 0x498   : > { %3954 = vperm.xlu1 %6613, %v3951_v45  }
 0x499   : > { %6232 = vmatmul.mubr.msk.bf16.vlgmr.msra.gmra.mrb[68].mxu0 %vm3077_vm11, %v8039_v50  ;;  %6235 = vmatmul.mubr.msk.bf16.vlgmr.msra.gmra.mrb[48].mxu1 %vm3077_vm11, %v8039_v50 }
 0x49a   : > { %3205 = vmatpush1.bf16.msra.mxu0 %v6726_v46  ;;  %3328 = vmatpush1.bf16.msra.mxu1 %v6729_v48 }
 0x49b   : > { %3206 = vmatprep.subr.bf16.mxu0 %v6734_v20  ;;  %3329 = vmatprep.subr.bf16.mxu1 %v6737_v52 }
 0x49c   : > { %3236 = vmatprep.mubr.bf16.mxu0 %v7142_v0  ;;  %3359 = vmatprep.mubr.bf16.mxu1 %v7142_v0 }
 0x49d   : > { %5543 = vperm.xlu1 %6613, %v5540_v33  }
 0x49e   : > { %3207 = vmatpush1.bf16.msra.mxu0 %v6732_v53  ;;  %3330 = vmatpush1.bf16.msra.mxu1 %v6735_v56 }
 0x49f   : > { %3208 = vmatprep.subr.bf16.mxu0 %v6740_v59  ;;  %3331 = vmatprep.subr.bf16.mxu1 %v6743_v63 }
 0x4a2   : > { %3209 = vmatpush1.bf16.msra.mxu0 %v6738_v3  ;;  %3332 = vmatpush1.bf16.msra.mxu1 %v6741_v4  ;;  %v6245_v4 = vld [vmem:[%s9051_s13 + $0x4] sm:$0x3] }
 0x4a3   : > { %3210 = vmatprep.subr.bf16.mxu0 %v6746_v5  ;;  %3333 = vmatprep.subr.bf16.mxu1 %v6749_v38 }
 0x4a6   : > { %3211 = vmatpush1.bf16.msra.mxu0 %v6744_v19  ;;  %3334 = vmatpush1.bf16.msra.mxu1 %v6747_v8 }
 0x4a7   : > { %3286 = vmatprep.subr.bf16.mxu0 %v6752_v9  ;;  %3409 = vmatprep.subr.bf16.mxu1 %v6755_v11 }
 0x4a9   : > { %6234 = vmatmul.mubr.msk.bf16.vlgmr.msra.gmra.mrb[72].mxu0 %vm3077_vm11, %v8039_v50  ;;  %6237 = vmatmul.mubr.msk.bf16.vlgmr.msra.gmra.mrb[52].mxu1 %vm3077_vm11, %v8039_v50 }
 0x4aa   : > { %3287 = vmatpush1.bf16.msra.mxu0 %v6750_v14  ;;  %3410 = vmatpush1.bf16.msra.mxu1 %v6753_v31 }
 0x4ab   : > { %3288 = vmatprep.subr.bf16.mxu0 %v6758_v32  ;;  %3411 = vmatprep.subr.bf16.mxu1 %v6761_v17 }
 0x4ac   : > { %3318 = vmatprep.mubr.bf16.mxu0 %v7142_v0  ;;  %3441 = vmatprep.mubr.bf16.mxu1 %v7142_v0 }
 0x4ae   : > { %3289 = vmatpush1.bf16.msra.mxu0 %v6756_v22  ;;  %3412 = vmatpush1.bf16.msra.mxu1 %v6759_v47 }
 0x4af   : > { %3290 = vmatprep.subr.bf16.mxu0 %v6764_v57  ;;  %3413 = vmatprep.subr.bf16.mxu1 %v6767_v30 }
 0x4b2   : > { %3291 = vmatpush1.bf16.msra.mxu0 %v6762_v26  ;;  %3414 = vmatpush1.bf16.msra.mxu1 %v6765_v27 }
 0x4b3   : > { %3292 = vmatprep.subr.bf16.mxu0 %v6770_v49  ;;  %3415 = vmatprep.subr.bf16.mxu1 %v6773_v36  ;;  %v6240_v49 = vld [vmem:[%s9051_s13 + $0x2] sm:$0x3]  ;;  %v6251_v36 = vld [vmem:[%s9051_s13 + $0x8] sm:$0x3] }
 0x4b6   : > { %3293 = vmatpush1.bf16.msra.mxu0 %v6768_v37  ;;  %3416 = vmatpush1.bf16.msra.mxu1 %v6771_v39  ;;  %v3468_v39 = vld [vmem:[%s9051_s13] sm:$0x3] }
 0x4b7   : > { %3368 = vmatprep.subr.bf16.mxu0 %v6776_v58 }
 0x4b9   : > { %6236 = vmatmul.mubr.msk.bf16.vlgmr.msra.gmra.mrb[76].mxu0 %vm3077_vm11, %v8039_v50  ;;  %6239 = vmatmul.mubr.msk.bf16.vlgmr.msra.gmra.mrb[56].mxu1 %vm3077_vm11, %v8039_v50 }
 0x4ba   : > { %3369 = vmatpush1.bf16.msra.mxu0 %v6774_v40  ;;  %3400 = vmatprep.mubr.bf16.mxu0 %v7142_v0 }
 0x4bb   : > { %3370 = vmatprep.subr.bf16.mxu0 %v6779_v54  ;;  %3614 = vmatprep.mubr.bf16.mxu1 %v7142_v0 }
 0x4be   : > { %3371 = vmatpush1.bf16.msra.mxu0 %v6777_v41 }
 0x4bf   : > { %3372 = vmatprep.subr.bf16.mxu0 %v6782_v42 }
 0x4c2   : > { %3373 = vmatpush1.bf16.msra.mxu0 %v6780_v28 }
 0x4c3   : > { %3374 = vmatprep.subr.bf16.mxu0 %v6785_v29 }
 0x4c6   : > { %3375 = vmatpush1.bf16.msra.mxu0 %v6783_v43 }
 0x4c9   : > { %6238 = vmatmul.mubr.msk.bf16.vlgmr.msra.gmra.mrb[80].mxu0 %vm3077_vm11, %v8039_v50 }
 0x4ca   : > { %3512 = vmatprep.mubr.bf16.mxu0 %v7142_v0 }
 0x55c   : > { %v3115_v34 = vpop.f32.mrb[64].mxu0  ;;  %v3197_v46 = vpop.f32.mrb[44].mxu1 }
 0x55d   : > { %v3454_v48 = vpack.c.bf16 %v3197_v46, %v3197_v46  ;;  %v3117_v20 = vpop.f32.mrb[65].mxu0  ;;  %v3199_v52 = vpop.f32.mrb[45].mxu1  ;;  %v3450_v26 = vpack.c.bf16 %v3115_v34, %v3115_v34 }
 0x55e   : > { %v3455_v53 = vpack.c.bf16 %v3199_v52, %v3199_v52  ;;  %v3119_v56 = vpop.f32.mrb[66].mxu0  ;;  %v3201_v50 = vpop.f32.mrb[46].mxu1  ;;  %v3451_v27 = vpack.c.bf16 %v3117_v20, %v3117_v20  ;;  %v6248_v52 = vld [vmem:[%s9051_s13 + $0x6] sm:$0x3] }
 0x55f   : > { %v3577_v59 = vsel %vm1074_vm1, %v3454_v48, 0  ;;  %v3120_v63 = vpop.f32.mrb[67].mxu0  ;;  %v3202_v3 = vpop.f32.mrb[47].mxu1  ;;  %v3525_v37 = vsel %vm1074_vm1, %v3450_v26, 0 }
 0x560   : > { %6246 = vmatprep.subr.msk.bf16.mxu1 %vm1074_vm1, %v3455_v53  ;;  %v6257_v53 = vld [vmem:[%s9051_s13 + $0xc] sm:$0x3] }
 0x561   : > { %3583 = vmatpush1.bf16.msra.mxu1 %v3577_v59 }
 0x564   : > { %6247 = vmatmul.mubr.msk.bf16.vlgmr.msra.gmra.mrb[60].mxu1 %vm1058_vm2, %v6245_v4 }
 0x565   : > { %3722 = vmatprep.mubr.bf16.mxu1 %v7142_v0 }
 0x56c   : > { %v3156_v5 = vpop.f32.mrb[68].mxu0  ;;  %v3279_v38 = vpop.f32.mrb[48].mxu1 }
 0x56d   : > { %v3452_v19 = vpack.c.bf16 %v3156_v5, %v3156_v5  ;;  %v3458_v8 = vpack.c.bf16 %v3279_v38, %v3279_v38  ;;  %v3158_v9 = vpop.f32.mrb[69].mxu0  ;;  %v3281_v11 = vpop.f32.mrb[49].mxu1 }
 0x56e   : > { %v3453_v14 = vpack.c.bf16 %v3158_v9, %v3158_v9  ;;  %v3459_v31 = vpack.c.bf16 %v3281_v11, %v3281_v11  ;;  %v3160_v32 = vpop.f32.mrb[70].mxu0  ;;  %v3283_v17 = vpop.f32.mrb[50].mxu1 }
 0x56f   : > { %v3475_v22 = vsel %vm1074_vm1, %v3452_v19, 0  ;;  %v3685_v47 = vsel %vm1074_vm1, %v3458_v8, 0  ;;  %v3161_v57 = vpop.f32.mrb[71].mxu0  ;;  %v3284_v30 = vpop.f32.mrb[51].mxu1  ;;  %v6254_v32 = vld [vmem:[%s9051_s13 + $0xa] sm:$0x3] }
 0x570   : > { %6241 = vmatprep.subr.msk.bf16.mxu0 %vm1074_vm1, %v3453_v14  ;;  %6252 = vmatprep.subr.msk.bf16.mxu1 %vm1074_vm1, %v3459_v31  ;;  %v6263_v17 = vld [vmem:[%s9051_s13 + $0x10] sm:$0x3] }
 0x571   : > { %3481 = vmatpush1.bf16.msra.mxu0 %v3475_v22  ;;  %3691 = vmatpush1.bf16.msra.mxu1 %v3685_v47 }
 0x572   : > { %6243 = vmatprep.subr.msk.bf16.mxu0 %vm1074_vm1, %v3451_v27 }
 0x574   : > { %6242 = vmatmul.mubr.msk.bf16.vlgmr.msra.gmra.mrb[84].mxu0 %vm1058_vm2, %v6240_v49  ;;  %6253 = vmatmul.mubr.msk.bf16.vlgmr.msra.gmra.mrb[64].mxu1 %vm1058_vm2, %v6251_v36  ;;  %v6260_v36 = vld [vmem:[%s9051_s13 + $0xe] sm:$0x3]  ;;  %s9056_s13 = smov 16  }
 0x575   : > { %3531 = vmatpush1.bf16.msra.mxu0 %v3525_v37  ;;  %3562 = vmatprep.mubr.bf16.mxu0 %v7142_v0 }
 0x576   : > { %3830 = vmatprep.mubr.bf16.mxu1 %v7142_v0 }
 0x57c   : > { %v3238_v58 = vpop.f32.mrb[72].mxu0  ;;  %v3361_v40 = vpop.f32.mrb[52].mxu1  ;;  %6244 = vmatmul.mubr.msk.bf16.vlgmr.msra.gmra.mrb[88].mxu0 %vm1058_vm2, %v3468_v39 }
 0x57d   : > { %v3456_v54 = vpack.c.bf16 %v3238_v58, %v3238_v58  ;;  %v3462_v41 = vpack.c.bf16 %v3361_v40, %v3361_v40  ;;  %v3240_v42 = vpop.f32.mrb[73].mxu0  ;;  %v3363_v28 = vpop.f32.mrb[53].mxu1  ;;  %3668 = vmatprep.mubr.bf16.mxu0 %v7142_v0 }
 0x57e   : > { %v3457_v29 = vpack.c.bf16 %v3240_v42, %v3240_v42  ;;  %v3463_v43 = vpack.c.bf16 %v3363_v28, %v3363_v28  ;;  %v3242_v45 = vpop.f32.mrb[74].mxu0  ;;  %v3365_v33 = vpop.f32.mrb[54].mxu1 }
 0x57f   : > { %v3631_v34 = vsel %vm1074_vm1, %v3456_v54, 0  ;;  %v3793_v46 = vsel %vm1074_vm1, %v3462_v41, 0  ;;  %v3243_v48 = vpop.f32.mrb[75].mxu0  ;;  %v3366_v20 = vpop.f32.mrb[55].mxu1 }
 0x580   : > { %6249 = vmatprep.subr.msk.bf16.mxu0 %vm1074_vm1, %v3457_v29  ;;  %6258 = vmatprep.subr.msk.bf16.mxu1 %vm1074_vm1, %v3463_v43 }
 0x581   : > { %3637 = vmatpush1.bf16.msra.mxu0 %v3631_v34  ;;  %3799 = vmatpush1.bf16.msra.mxu1 %v3793_v46 }
 0x584   : > { %6250 = vmatmul.mubr.msk.bf16.vlgmr.msra.gmra.mrb[92].mxu0 %vm1058_vm2, %v6248_v52  ;;  %6259 = vmatmul.mubr.msk.bf16.vlgmr.msra.gmra.mrb[68].mxu1 %vm1058_vm2, %v6257_v53 }
 0x585   : > { %3776 = vmatprep.mubr.bf16.mxu0 %v7142_v0  ;;  %3938 = vmatprep.mubr.bf16.mxu1 %v7142_v0 }
 0x58c   : > { %v3320_v56 = vpop.f32.mrb[76].mxu0  ;;  %v3443_v50 = vpop.f32.mrb[56].mxu1 }
 0x58d   : > { %v3460_v59 = vpack.c.bf16 %v3320_v56, %v3320_v56  ;;  %v3466_v63 = vpack.c.bf16 %v3443_v50, %v3443_v50  ;;  %v3322_v3 = vpop.f32.mrb[77].mxu0  ;;  %v3445_v4 = vpop.f32.mrb[57].mxu1 }
 0x58e   : > { %v3461_v5 = vpack.c.bf16 %v3322_v3, %v3322_v3  ;;  %v3467_v38 = vpack.c.bf16 %v3445_v4, %v3445_v4  ;;  %v3324_v19 = vpop.f32.mrb[78].mxu0  ;;  %v3447_v8 = vpop.f32.mrb[58].mxu1 }
 0x58f   : > { %v3739_v9 = vsel %vm1074_vm1, %v3460_v59, 0  ;;  %v3901_v11 = vsel %vm1074_vm1, %v3466_v63, 0  ;;  %v3325_v14 = vpop.f32.mrb[79].mxu0  ;;  %v3448_v31 = vpop.f32.mrb[59].mxu1 }
 0x590   : > { %6255 = vmatprep.subr.msk.bf16.mxu0 %vm1074_vm1, %v3461_v5  ;;  %6264 = vmatprep.subr.msk.bf16.mxu1 %vm1074_vm1, %v3467_v38 }
 0x591   : > { %3745 = vmatpush1.bf16.msra.mxu0 %v3739_v9  ;;  %3907 = vmatpush1.bf16.msra.mxu1 %v3901_v11 }
 0x594   : > { %6256 = vmatmul.mubr.msk.bf16.vlgmr.msra.gmra.mrb[96].mxu0 %vm1058_vm2, %v6254_v32  ;;  %6265 = vmatmul.mubr.msk.bf16.vlgmr.msra.gmra.mrb[72].mxu1 %vm1058_vm2, %v6263_v17 }
 0x595   : > { %3884 = vmatprep.mubr.bf16.mxu0 %v7142_v0  ;;  %4078 = vmatprep.mubr.bf16.mxu1 %v7142_v0 }
 0x59c   : > { %v3402_v22 = vpop.f32.mrb[80].mxu0 }
 0x59d   : > { %v3464_v47 = vpack.c.bf16 %v3402_v22, %v3402_v22  ;;  %v3404_v57 = vpop.f32.mrb[81].mxu0 }
 0x59e   : > { %v3465_v30 = vpack.c.bf16 %v3404_v57, %v3404_v57  ;;  %v3406_v26 = vpop.f32.mrb[82].mxu0 }
 0x59f   : > { %v3847_v27 = vsel %vm1074_vm1, %v3464_v47, 0  ;;  %v3407_v49 = vpop.f32.mrb[83].mxu0 }
 0x5a0   : > { %6261 = vmatprep.subr.msk.bf16.mxu0 %vm1074_vm1, %v3465_v30 }
 0x5a1   : > { %3853 = vmatpush1.bf16.msra.mxu0 %v3847_v27 }
 0x5a4   : > { %6262 = vmatmul.mubr.msk.bf16.vlgmr.msra.gmra.mrb[100].mxu0 %vm1058_vm2, %v6260_v36 }
 0x5a5   : > { %4048 = vmatprep.mubr.bf16.mxu0 %v7142_v0 }
 0x637   : > { %v3616_v37 = vpop.f32.mrb[60].mxu1 }
 0x638   : > { %v3618_v39 = vpop.f32.mrb[61].mxu1 }
 0x639   : > { %v3620_v58 = vpop.f32.mrb[62].mxu1 }
 0x63a   : > { %v3621_v40 = vpop.f32.mrb[63].mxu1 }
 0x647   : > { %v3514_v54 = vpop.f32.mrb[84].mxu0  ;;  %v3724_v41 = vpop.f32.mrb[64].mxu1 }
 0x648   : > { %v3516_v42 = vpop.f32.mrb[85].mxu0  ;;  %v3726_v28 = vpop.f32.mrb[65].mxu1 }
 0x649   : > { %v3518_v29 = vpop.f32.mrb[86].mxu0  ;;  %v3728_v43 = vpop.f32.mrb[66].mxu1 }
 0x64a   : > { %v3519_v45 = vpop.f32.mrb[87].mxu0  ;;  %v3729_v33 = vpop.f32.mrb[67].mxu1 }
 0x64b   : > { %v3955_v33 = vpop.permute.xlu1 %3954 }
 0x64f   : > { %v3564_v34 = vpop.f32.mrb[88].mxu0 }
 0x650   : > { %v3565_v46 = vadd.f32 %v3564_v34, %v3514_v54  ;;  %v3566_v48 = vpop.f32.mrb[89].mxu0 }
 0x651   : > { %v3567_v20 = vadd.f32 %v3566_v48, %v3516_v42  ;;  %v3568_v52 = vpop.f32.mrb[90].mxu0 }
 0x652   : > { %v3623_v53 = vadd.f32 %v3616_v37, %v3565_v46  ;;  %v3569_v56 = vpop.f32.mrb[91].mxu0 }
 0x653   : > { %v3624_v50 = vadd.f32 %v3618_v39, %v3567_v20 }
 0x657   : > { %v3670_v59 = vpop.f32.mrb[92].mxu0  ;;  %v3832_v63 = vpop.f32.mrb[68].mxu1 }
 0x658   : > { %v3677_v3 = vadd.f32 %v3670_v59, %v3623_v53  ;;  %v3672_v4 = vpop.f32.mrb[93].mxu0  ;;  %v3834_v5 = vpop.f32.mrb[69].mxu1 }
 0x659   : > { %v3678_v38 = vadd.f32 %v3672_v4, %v3624_v50  ;;  %v3674_v19 = vpop.f32.mrb[94].mxu0  ;;  %v3836_v8 = vpop.f32.mrb[70].mxu1  ;;  %v6787_v50 = vld [vmem:[%s9052_s16 + $0x40] sm:$0xff]   ;;  %v6789_v4 = vld [vmem:[%s9052_s16 + $0x48] sm:$0xff]  }
 0x65a   : > { %v3731_v9 = vadd.f32 %v3724_v41, %v3677_v3  ;;  %v3675_v11 = vpop.f32.mrb[95].mxu0  ;;  %v3837_v14 = vpop.f32.mrb[71].mxu1  ;;  %v6788_v3 = vld [vmem:[%s9052_s16] sm:$0xff]   ;;  %v6792_v19 = vld [vmem:[%s9052_s16 + $0x50] sm:$0xff]  }
 0x65b   : > { %v3732_v31 = vadd.f32 %v3726_v28, %v3678_v38  ;;  %v6790_v38 = vld [vmem:[%s9052_s16 + $0x8] sm:$0xff]   ;;  %v6793_v11 = vld [vmem:[%s9052_s16 + $0x10] sm:$0xff]   ;;  %v6794_v14 = vld [vmem:[%s9052_s16 + $0x58] sm:$0xff]  }
 0x667   : > { %v3778_v32 = vpop.f32.mrb[96].mxu0  ;;  %v3940_v17 = vpop.f32.mrb[72].mxu1 }
 0x668   : > { %v3785_v22 = vadd.f32 %v3778_v32, %v3731_v9  ;;  %v3780_v47 = vpop.f32.mrb[97].mxu0  ;;  %v3942_v57 = vpop.f32.mrb[73].mxu1  ;;  %v6805_v9 = vld [vmem:[%s9053_s14 + $0x8] sm:$0xff]   ;;  %v6795_v32 = vld [vmem:[%s9052_s16 + $0x18] sm:$0xff]  }
 0x669   : > { %v3786_v30 = vadd.f32 %v3780_v47, %v3732_v31  ;;  %v3782_v26 = vpop.f32.mrb[98].mxu0  ;;  %v3944_v27 = vpop.f32.mrb[74].mxu1  ;;  %v6797_v47 = vld [vmem:[%s9052_s16 + $0x20] sm:$0xff]  }
 0x66a   : > { %v3839_v49 = vadd.f32 %v3832_v63, %v3785_v22  ;;  %v3783_v36 = vpop.f32.mrb[99].mxu0  ;;  %v3945_v37 = vpop.f32.mrb[75].mxu1  ;;  %v6806_v22 = vld [vmem:[%s9053_s14 + $0x10] sm:$0xff]  }
 0x66b   : > { %v3840_v39 = vadd.f32 %v3834_v5, %v3786_v30  ;;  %v974_v63 = vpop.permute.xlu0 %973  ;;  %v6799_v30 = vld [vmem:[%s9052_s16 + $0x28] sm:$0xff]   ;;  %v6800_v26 = vld [vmem:[%s9052_s16 + $0x70] sm:$0xff]   ;;  %v6802_v36 = vld [vmem:[%s9052_s16 + $0x78] sm:$0xff]  }
 0x66c   : > { %v1016_v5 = vadd.f32 %v7640_v62, %v974_v63  ;;  %v6791_v62 = vld [vmem:[%s9053_s14 + $0x20] ss:$0 sps:$4 sm:$0xff]   ;;  %v6801_v27 = vld [vmem:[%s9052_s16 + $0x30] sm:$0xff]   ;;  %v6803_v37 = vld [vmem:[%s9052_s16 + $0x38] sm:$0xff]  }
 0x66e   : > { %v1021_v8 = vmax.f32 %v1016_v5, 0.0  ;;  %v6845_v5 = vld [vmem:[%s8936_s17 + $0x14] ss:$24 sps:$4 sm:$0xff]  }
 0x670   : > { %v8336_v31 = vpack.c.bf16 %v1021_v8, %v1021_v8 }
 0x677   : > { %v3886_v58 = vpop.f32.mrb[100].mxu0 }
 0x678   : > { %v3893_v40 = vadd.f32 %v3886_v58, %v3839_v49  ;;  %v3888_v54 = vpop.f32.mrb[101].mxu0  ;;  %v1014_v49 = vadd.f32 %v7638_v61, %v974_v63  ;;  %v6807_v61 = vld [vmem:[%s8936_s17] ss:$24 sps:$4 sm:$0xff]  }
 0x679   : > { %v3894_v42 = vadd.f32 %v3888_v54, %v3840_v39  ;;  %v3890_v41 = vpop.f32.mrb[102].mxu0  ;;  %v6810_v54 = vld [vmem:[%s8936_s17 + $0x8] ss:$24 sps:$4 sm:$0xff]  }
 0x67a   : > { %v3947_v29 = vadd.f32 %v3940_v17, %v3893_v40  ;;  %v3891_v43 = vpop.f32.mrb[103].mxu0  ;;  %v6796_v17 = vld [vmem:[%s9052_s16 + $0x60] sm:$0xff]   ;;  %v1020_v39 = vmax.f32 %v1014_v49, 0.0  ;;  %v6815_v41 = vld [vmem:[%s8936_s17 + $0x34] ss:$24 sps:$4 sm:$0xff]  }
 0x67b   : > { %v3948_v28 = vadd.f32 %v3942_v57, %v3894_v42  ;;  %v6798_v57 = vld [vmem:[%s9052_s16 + $0x68] sm:$0xff]   ;;  %v6809_v40 = vld [vmem:[%s8936_s17 + $0x4] ss:$24 sps:$4 sm:$0xff]   ;;  %s9062_s16 = smov %s9061_s8 }
 0x67c   : > { %v3949_v45 = vadd.f32 %v3947_v29, %v8029_v16  ;;  %v6786_v16 = vld [vmem:[%s9053_s14 + $0x18] sm:$0xff]   ;;  %v8375_v58 = vpack.c.bf16 %v1020_v39, %v1020_v39  ;;  %v6812_v42 = vld [vmem:[%s8936_s17 + $0xc] ss:$24 sps:$4 sm:$0xff]   ;;  %v6813_v43 = vld [vmem:[%s8936_s17 + $0x30] ss:$24 sps:$4 sm:$0xff]  }
 0x67d   : > { %v3950_v34 = vadd.f32 %v3948_v28, %v8031_v24  ;;  %v6804_v24 = vld [vmem:[%s9053_s14] sm:$0xff]   ;;  %v6818_v29 = vld [vmem:[%s8936_s17 + $0x3c] ss:$24 sps:$4 sm:$0xff]   ;;  %v6816_v28 = vld [vmem:[%s8936_s17 + $0x38] ss:$24 sps:$4 sm:$0xff]   ;;  %s9068_s14 = sld [smem:[#allocation39_spill]] }
 0x67e   : > { %v3957_v46 = vadd.f32 %v3955_v33, %v3949_v45  ;;  %v6821_v45 = vld [vmem:[%s8936_s17 + $0x64] ss:$24 sps:$4 sm:$0xff]   ;;  %v6834_v63 = vld [vmem:[%s8936_s17 + $0xc8] ss:$24 sps:$4 sm:$0xff]  }
 0x67f   : > { %v3958_v48 = vadd.f32 %v3955_v33, %v3950_v34  ;;  %v6824_v33 = vld [vmem:[%s8936_s17 + $0x6c] ss:$24 sps:$4 sm:$0xff]   ;;  %v6819_v34 = vld [vmem:[%s8936_s17 + $0x60] ss:$24 sps:$4 sm:$0xff]  }
 0x680   : > { %v3959_v20 = vmax.f32 %v3957_v46, 0.0  ;;  %v6822_v46 = vld [vmem:[%s8936_s17 + $0x68] ss:$24 sps:$4 sm:$0xff]  }
 0x681   : > { %v3960_v52 = vmax.f32 %v3958_v48, 0.0  ;;  %v6827_v48 = vld [vmem:[%s8936_s17 + $0x94] ss:$24 sps:$4 sm:$0xff]  }
 0x682   : > { %v3961_v53 = vpack.c.bf16 %v3959_v20, %v3959_v20  ;;  %v6830_v20 = vld [vmem:[%s8936_s17 + $0x9c] ss:$24 sps:$4 sm:$0xff]  }
 0x683   : > { %v3962_v56 = vpack.c.bf16 %v3960_v52, %v3960_v52  ;;  %v6825_v52 = vld [vmem:[%s8936_s17 + $0x90] ss:$24 sps:$4 sm:$0xff]  }
 0x684   : > { %v4011_v59 = vsel %vm1074_vm1, %v3961_v53, 0  ;;  %v6828_v53 = vld [vmem:[%s8936_s17 + $0x98] ss:$24 sps:$4 sm:$0xff]  }
 0x685   : > { %6271 = vmatprep.subr.msk.bf16.mxu0 %vm1074_vm1, %v3962_v56  ;;  %6515 = vmatprep.subr.msk.bf16.mxu1 %vm1074_vm1, %v3962_v56  ;;  %v6833_v56 = vld [vmem:[%s8936_s17 + $0xc4] ss:$24 sps:$4 sm:$0xff]  }
 0x686   : > { %4017 = vmatpush1.bf16.msra.mxu0 %v4011_v59  ;;  %6516 = vmatpush1.bf16.msra.mxu1 %v4011_v59  ;;  %v6831_v59 = vld [vmem:[%s8936_s17 + $0xc0] ss:$24 sps:$4 sm:$0xff]  }
 0x687   : > { %6471 = vmatprep.subr.bf16.mxu1 %v6787_v50  ;;  %4578 = vmatprep.subr.bf16.mxu0 %v6809_v40  ;;  %v6836_v50 = vld [vmem:[%s8936_s17 + $0xcc] ss:$24 sps:$4 sm:$0xff]  }
 0x689   : > { %6275 = vmatmul.mubr.msk.bf16.vlgmr.msra.gmra.mrb[76].mxu1 %vm1058_vm2, %v6786_v16  ;;  %6272 = vmatmul.mubr.msk.bf16.vlgmr.msra.gmra.mrb[104].mxu0 %vm1058_vm2, %v6804_v24  ;;  %v6839_v16 = vld [vmem:[%s8936_s17 + $0xf4] ss:$24 sps:$4 sm:$0xff]   ;;  %v6837_v24 = vld [vmem:[%s8936_s17 + $0xf0] ss:$24 sps:$4 sm:$0xff]  }
 0x68a   : > { %6472 = vmatpush3.bf16.msra.mxu1 %v6788_v3  ;;  %4088 = vmatprep.mubr.bf16.mxu1 %v7142_v0  ;;  %v6842_v3 = vld [vmem:[%s8936_s17 + $0xfc] ss:$24 sps:$4 sm:$0xff]  }
 0x68b   : > { %6473 = vmatprep.subr.bf16.mxu1 %v6789_v4  ;;  %4058 = vmatprep.mubr.bf16.mxu0 %v7142_v0  ;;  %v6840_v4 = vld [vmem:[%s8936_s17 + $0xf8] ss:$24 sps:$4 sm:$0xff]  }
 0x68c   : > { %4579 = vmatpush1.bf16.msra.mxu0 %v6807_v61 }
 0x68d   : > { %4580 = vmatprep.subr.bf16.mxu0 %v6815_v41 }
 0x68e   : > { %6474 = vmatpush3.bf16.msra.mxu1 %v6790_v38 }
 0x68f   : > { %6475 = vmatprep.subr.bf16.mxu1 %v6792_v19 }
 0x690   : > { %4581 = vmatpush1.bf16.msra.mxu0 %v6813_v43  ;;  %v6843_v43 = vld [vmem:[%s8936_s17 + $0x10] ss:$24 sps:$4 sm:$0xff]  }
 0x691   : > { %6276 = vmatmul.mubr.msk.bf16.gmra.mrb[80].mxu1 %vm1058_vm2, %v6791_v62  ;;  %6273 = vmatmul.mubr.msk.bf16.gmra.mrb[108].mxu0 %vm1058_vm2, %v6805_v9 }
 0x692   : > { %6476 = vmatpush3.bf16.msra.mxu1 %v6793_v11  ;;  %4349 = vmatprep.mubr.bf16.mxu1 %v8336_v31 }
 0x693   : > { %6477 = vmatprep.subr.bf16.mxu1 %v6794_v14  ;;  %4068 = vmatprep.mubr.bf16.mxu0 %v7142_v0 }
 0x694   : > { %4582 = vmatprep.subr.bf16.mxu0 %v6821_v45  ;;  %v6848_v45 = vld [vmem:[%s8936_s17 + $0x44] ss:$24 sps:$4 sm:$0xff]  }
 0x695   : > { %4583 = vmatpush1.bf16.msra.mxu0 %v6819_v34  ;;  %v6851_v34 = vld [vmem:[%s8936_s17 + $0x74] ss:$24 sps:$4 sm:$0xff]  }
 0x696   : > { %6478 = vmatpush3.bf16.msra.mxu1 %v6795_v32  ;;  %4584 = vmatprep.subr.bf16.mxu0 %v6827_v48  ;;  %v6854_v48 = vld [vmem:[%s8936_s17 + $0xa4] ss:$24 sps:$4 sm:$0xff]  }
 0x697   : > { %6479 = vmatprep.subr.bf16.mxu1 %v6796_v17 }
 0x699   : > { %6274 = vmatmul.mubr.msk.bf16.gmra.mrb[112].mxu0 %vm1058_vm2, %v6806_v22 }
 0x69a   : > { %6480 = vmatpush3.bf16.msra.mxu1 %v6797_v47  ;;  %4610 = vmatprep.mubr.bf16.mxu0 %v7142_v0 }
 0x69b   : > { %6481 = vmatprep.subr.bf16.mxu1 %v6798_v57  ;;  %4585 = vmatpush1.bf16.msra.mxu0 %v6825_v52  ;;  %v6857_v52 = vld [vmem:[%s8936_s17 + $0xd4] ss:$24 sps:$4 sm:$0xff]  }
 0x69c   : > { %4586 = vmatprep.subr.bf16.mxu0 %v6833_v56  ;;  %v6860_v56 = vld [vmem:[%s8936_s17 + $0x104] ss:$24 sps:$4 sm:$0xff]  }
 0x69e   : > { %6482 = vmatpush3.bf16.msra.mxu1 %v6799_v30 }
 0x69f   : > { %6483 = vmatprep.subr.bf16.mxu1 %v6800_v26  ;;  %4587 = vmatpush1.bf16.msra.mxu0 %v6831_v59 }
 0x6a0   : > { %4588 = vmatprep.subr.bf16.mxu0 %v6839_v16 }
 0x6a2   : > { %6484 = vmatpush3.bf16.msra.mxu1 %v6801_v27 }
 0x6a3   : > { %6485 = vmatprep.subr.bf16.mxu1 %v6802_v36  ;;  %4589 = vmatpush1.bf16.msra.mxu0 %v6837_v24 }
 0x6a4   : > { %4660 = vmatprep.subr.bf16.mxu0 %v6845_v5 }
 0x6a6   : > { %6486 = vmatpush3.bf16.msra.mxu1 %v6803_v37 }
 0x6a7   : > { %4619 = vmatprep.subr.bf16.mxu1 %v6812_v42 }
 0x6a9   : > { %4350 = vmatmul.mubr.bf16.vlgmr.msra.gmra.mrb[84].mxu1 %v8375_v58 }
 0x6aa   : > { %4651 = vmatprep.mubr.bf16.mxu1 %v7142_v0  ;;  %4620 = vmatpush1.bf16.msra.mxu1 %v6810_v54 }
 0x6ab   : > { %4621 = vmatprep.subr.bf16.mxu1 %v6818_v29 }
 0x6ae   : > { %4622 = vmatpush1.bf16.msra.mxu1 %v6816_v28 }
 0x6af   : > { %4623 = vmatprep.subr.bf16.mxu1 %v6824_v33  ;;  %v6846_v33 = vld [vmem:[%s8936_s17 + $0x40] ss:$24 sps:$4 sm:$0xff]  }
 0x6b2   : > { %4624 = vmatpush1.bf16.msra.mxu1 %v6822_v46  ;;  %v6849_v46 = vld [vmem:[%s8936_s17 + $0x70] ss:$24 sps:$4 sm:$0xff]  }
 0x6b3   : > { %4625 = vmatprep.subr.bf16.mxu1 %v6830_v20  ;;  %v6852_v20 = vld [vmem:[%s8936_s17 + $0xa0] ss:$24 sps:$4 sm:$0xff]  }
 0x6b6   : > { %4626 = vmatpush1.bf16.msra.mxu1 %v6828_v53  ;;  %v6855_v53 = vld [vmem:[%s8936_s17 + $0xd0] ss:$24 sps:$4 sm:$0xff]  }
 0x6b7   : > { %4627 = vmatprep.subr.bf16.mxu1 %v6836_v50  ;;  %v6858_v50 = vld [vmem:[%s8936_s17 + $0x100] ss:$24 sps:$4 sm:$0xff]  }
 0x6ba   : > { %4628 = vmatpush1.bf16.msra.mxu1 %v6834_v63 }
 0x6bb   : > { %4629 = vmatprep.subr.bf16.mxu1 %v6842_v3 }
 0x6be   : > { %4630 = vmatpush1.bf16.msra.mxu1 %v6840_v4 }
 0x75c   : > { %v4080_v38 = vpop.f32.mrb[76].mxu1  ;;  %v4050_v19 = vpop.f32.mrb[104].mxu0 }
 0x75d   : > { %v8454_v8 = vpop.f32.mrb[77].mxu1  ;;  %4149 = vrot.lane.b32.xlu1 %v4080_v38, %s9054_s2  ;;  %v4052_v62 = vpop.f32.mrb[105].mxu0  ;;  %4097 = vrot.lane.b32.xlu0 %v4050_v19, %s9055_s11 }
 0x75e   : > { %v8458_v9 = vpop.f32.mrb[78].mxu1  ;;  %v4054_v11 = vpop.f32.mrb[106].mxu0 }
 0x75f   : > { %v8460_v14 = vpop.f32.mrb[79].mxu1  ;;  %v4056_v32 = vpop.f32.mrb[107].mxu0 }
 0x761   : > { %4099 = vrot.lane.b32.xlu1 %v4052_v62, %s9055_s11  ;;  %4105 = vrot.lane.b32.xlu0 %v4054_v11, %s9056_s13 }
 0x764   : > { %v8464_v17 = vpop.f32.mrb[80].mxu1  ;;  %v4060_v22 = vpop.f32.mrb[108].mxu0 }
 0x765   : > { %v8466_v47 = vpop.f32.mrb[81].mxu1  ;;  %4107 = vrot.lane.b32.xlu1 %v4056_v32, %s9056_s13  ;;  %v4062_v57 = vpop.f32.mrb[109].mxu0 }
 0x766   : > { %v4094_v30 = vpop.f32.mrb[82].mxu1  ;;  %4117 = vrot.lane.b32.xlu0 %v4062_v57, %s9057_s23  ;;  %v4064_v26 = vpop.f32.mrb[110].mxu0  ;;  %v6332_v57 = vld [vmem:[%s8937_s18 + $0x2] sm:$0x3] }
 0x767   : > { %v4095_v27 = vpop.f32.mrb[83].mxu1  ;;  %v4066_v49 = vpop.f32.mrb[111].mxu0  ;;  %v6861_v30 = vld [vmem:[%s8938_s19 + $0x40] sm:$0xff]  }
 0x768   : > { %v4707_v27 = vld [vmem:[%s8937_s18] sm:$0x3] }
 0x769   : > { %4115 = vrot.lane.b32.xlu1 %v4060_v22, %s9057_s23 }
 0x76a   : > { %4127 = vrot.lane.b32.xlu0 %v4066_v49, %s9058_s7  ;;  %v6862_v49 = vld [vmem:[%s8938_s19] sm:$0xff]  }
 0x76c   : > { %v8472_v36 = vpop.f32.mrb[112].mxu0 }
 0x76d   : > { %4125 = vrot.lane.b32.xlu1 %v4064_v26, %s9058_s7  ;;  %v8475_v37 = vpop.f32.mrb[113].mxu0 }
 0x76e   : > { %v4074_v39 = vpop.f32.mrb[114].mxu0 }
 0x76f   : > { %v4076_v61 = vpop.f32.mrb[115].mxu0 }
 0x770   : > { %4141 = vrot.lane.b32.xlu0 %v4076_v61, %s9059_s12  ;;  %v6864_v61 = vld [vmem:[%s8938_s19 + $0x8] sm:$0xff]  }
 0x771   : > { %4139 = vrot.lane.b32.xlu1 %v4074_v39, %s9059_s12  ;;  %v6863_v39 = vld [vmem:[%s8938_s19 + $0x48] sm:$0xff]  }
 0x77c   : > { %v6487_v40 = vpop.f32.mrb[84].mxu1 }
 0x77d   : > { %v6488_v54 = vpop.f32.mrb[85].mxu1 }
 0x77e   : > { %v6489_v42 = vadd.f32 %v6488_v54, %v6487_v40  ;;  %v6490_v41 = vpop.f32.mrb[86].mxu1  ;;  %v6865_v40 = vld [vmem:[%s8938_s19 + $0x50] sm:$0xff]  }
 0x77f   : > { %v6491_v29 = vpop.f32.mrb[87].mxu1  ;;  %v6866_v54 = vld [vmem:[%s8938_s19 + $0x10] sm:$0xff]  }
 0x780   : > { %v4357_v28 = vpack.c.bf16 %v6489_v42, %v6489_v42  ;;  %v6867_v42 = vld [vmem:[%s8938_s19 + $0x58] sm:$0xff]  }
 0x782   : > { %6329 = vmatmul.mubr.msk.bf16.vlgmr.msra.gmra.mrb[116].mxu0 %vm4574_vm12, %v4357_v28  ;;  %6330 = vmatmul.mubr.msk.bf16.vlgmr.msra.gmra.mrb[88].mxu1 %vm4574_vm12, %v4357_v28 }
 0x783   : > { %4661 = vmatpush1.bf16.msra.mxu0 %v6843_v43  ;;  %4692 = vmatprep.mubr.bf16.mxu0 %v7142_v0  ;;  %v6868_v43 = vld [vmem:[%s8938_s19 + $0x18] sm:$0xff]  }
 0x784   : > { %4662 = vmatprep.subr.bf16.mxu0 %v6848_v45  ;;  %4751 = vmatprep.mubr.bf16.mxu1 %v7142_v0 }
 0x787   : > { %4663 = vmatpush1.bf16.msra.mxu0 %v6846_v33  ;;  %v6869_v33 = vld [vmem:[%s8938_s19 + $0x60] sm:$0xff]  }
 0x788   : > { %4664 = vmatprep.subr.bf16.mxu0 %v6851_v34 }
 0x78b   : > { %4665 = vmatpush1.bf16.msra.mxu0 %v6849_v46 }
 0x78c   : > { %4666 = vmatprep.subr.bf16.mxu0 %v6854_v48  ;;  %v6337_v48 = vld [vmem:[%s8937_s18 + $0x4] sm:$0x3] }
 0x78f   : > { %4667 = vmatpush1.bf16.msra.mxu0 %v6852_v20  ;;  %v6870_v20 = vld [vmem:[%s8938_s19 + $0x20] sm:$0xff]  }
 0x790   : > { %4668 = vmatprep.subr.bf16.mxu0 %v6857_v52  ;;  %v6871_v52 = vld [vmem:[%s8938_s19 + $0x68] sm:$0xff]  }
 0x793   : > { %4669 = vmatpush1.bf16.msra.mxu0 %v6855_v53  ;;  %v6872_v53 = vld [vmem:[%s8938_s19 + $0x28] sm:$0xff]  }
 0x794   : > { %4670 = vmatprep.subr.bf16.mxu0 %v6860_v56  ;;  %v6873_v56 = vld [vmem:[%s8938_s19 + $0x70] sm:$0xff]  }
 0x797   : > { %4671 = vmatpush1.bf16.msra.mxu0 %v6858_v50  ;;  %v6874_v50 = vld [vmem:[%s8938_s19 + $0x30] sm:$0xff]  }
 0x79a   : > { %6331 = vmatmul.mubr.msk.bf16.vlgmr.msra.gmra.mrb[120].mxu0 %vm4574_vm12, %v4357_v28 }
 0x79b   : > { %4853 = vmatprep.mubr.bf16.mxu0 %v7142_v0 }
 0x855   : > { %v4653_v59 = vpop.f32.mrb[88].mxu1  ;;  %v4612_v63 = vpop.f32.mrb[116].mxu0 }
 0x856   : > { %v4703_v16 = vpack.c.bf16 %v4653_v59, %v4653_v59  ;;  %v4614_v24 = vpop.f32.mrb[117].mxu0  ;;  %v4655_v3 = vpop.f32.mrb[89].mxu1  ;;  %v4701_v32 = vpack.c.bf16 %v4612_v63, %v4612_v63  ;;  %v6875_v59 = vld [vmem:[%s8938_s19 + $0x78] sm:$0xff]  }
 0x857   : > { %v4704_v4 = vpack.c.bf16 %v4655_v3, %v4655_v3  ;;  %v4616_v5 = vpop.f32.mrb[118].mxu0  ;;  %v4657_v38 = vpop.f32.mrb[90].mxu1  ;;  %v4702_v22 = vpack.c.bf16 %v4614_v24, %v4614_v24  ;;  %v6876_v63 = vld [vmem:[%s8938_s19 + $0x38] sm:$0xff]   ;;  %v6879_v24 = vld [vmem:[#allocation8 + $0x4] ss:$24 sps:$4 sm:$0xff]  }
 0x858   : > { %v4714_v19 = vsel %vm1074_vm1, %v4703_v16, 0  ;;  %v4617_v62 = vpop.f32.mrb[119].mxu0  ;;  %v4658_v11 = vpop.f32.mrb[91].mxu1  ;;  %v4764_v26 = vsel %vm1074_vm1, %v4701_v32, 0  ;;  %v6877_v16 = vld [vmem:[#allocation8] ss:$24 sps:$4 sm:$0xff]  }
 0x859   : > { %6333 = vmatprep.subr.msk.bf16.mxu1 %vm1074_vm1, %v4704_v4  ;;  %v6880_v3 = vld [vmem:[#allocation8 + $0x10] ss:$24 sps:$4 sm:$0xff]   ;;  %v6882_v4 = vld [vmem:[#allocation8 + $0x14] ss:$24 sps:$4 sm:$0xff]   ;;  %v6886_v62 = vld [vmem:[#allocation8 + $0x40] ss:$24 sps:$4 sm:$0xff]  }
 0x85a   : > { %4720 = vmatpush1.bf16.msra.mxu1 %v4714_v19  ;;  %v6885_v5 = vld [vmem:[#allocation8 + $0x34] ss:$24 sps:$4 sm:$0xff]   ;;  %v6883_v38 = vld [vmem:[#allocation8 + $0x30] ss:$24 sps:$4 sm:$0xff]   ;;  %v6888_v19 = vld [vmem:[#allocation8 + $0x44] ss:$24 sps:$4 sm:$0xff]  }
 0x85b   : > { %6335 = vmatprep.subr.msk.bf16.mxu1 %vm1074_vm1, %v4702_v22  ;;  %v6889_v11 = vld [vmem:[#allocation8 + $0x60] ss:$24 sps:$4 sm:$0xff]   ;;  %v6891_v32 = vld [vmem:[#allocation8 + $0x64] ss:$24 sps:$4 sm:$0xff]   ;;  %v6894_v22 = vld [vmem:[#allocation8 + $0x74] ss:$24 sps:$4 sm:$0xff]  }
 0x85d   : > { %6334 = vmatmul.mubr.msk.bf16.vlgmr.msra.gmra.mrb[92].mxu1 %vm1058_vm2, %v6332_v57  ;;  %v6897_v57 = vld [vmem:[#allocation8 + $0x94] ss:$24 sps:$4 sm:$0xff]  }
 0x85e   : > { %4770 = vmatpush1.bf16.msra.mxu1 %v4764_v26  ;;  %4801 = vmatprep.mubr.bf16.mxu1 %v7142_v0  ;;  %v6895_v26 = vld [vmem:[#allocation8 + $0x90] ss:$24 sps:$4 sm:$0xff]  }
 0x85f   : > { %6493 = vmatprep.subr.bf16.mxu1 %v6861_v30  ;;  %v6900_v30 = vld [vmem:[#allocation8 + $0xa4] ss:$24 sps:$4 sm:$0xff]  }
 0x865   : > { %6336 = vmatmul.mubr.msk.bf16.vlgmr.msra.gmra.mrb[96].mxu1 %vm1058_vm2, %v4707_v27  ;;  %v6898_v27 = vld [vmem:[#allocation8 + $0xa0] ss:$24 sps:$4 sm:$0xff]  }
 0x866   : > { %6494 = vmatpush3.bf16.msra.mxu1 %v6862_v49  ;;  %5024 = vmatprep.mubr.bf16.mxu1 %v8336_v31  ;;  %v6903_v49 = vld [vmem:[#allocation8 + $0xc4] ss:$24 sps:$4 sm:$0xff]  }
 0x867   : > { %6495 = vmatprep.subr.bf16.mxu1 %v6863_v39  ;;  %v6906_v39 = vld [vmem:[#allocation8 + $0xd4] ss:$24 sps:$4 sm:$0xff]  }
 0x86a   : > { %6496 = vmatpush3.bf16.msra.mxu1 %v6864_v61  ;;  %v6901_v61 = vld [vmem:[#allocation8 + $0xc0] ss:$24 sps:$4 sm:$0xff]  }
 0x86b   : > { %6497 = vmatprep.subr.bf16.mxu1 %v6865_v40  ;;  %v6904_v40 = vld [vmem:[#allocation8 + $0xd0] ss:$24 sps:$4 sm:$0xff]  }
 0x86d   : > { %v4694_v31 = vpop.f32.mrb[120].mxu0 }
 0x86e   : > { %v4705_v41 = vpack.c.bf16 %v4694_v31, %v4694_v31  ;;  %v4696_v29 = vpop.f32.mrb[121].mxu0  ;;  %6498 = vmatpush3.bf16.msra.mxu1 %v6866_v54  ;;  %v6909_v54 = vld [vmem:[#allocation8 + $0xf4] ss:$24 sps:$4 sm:$0xff]   ;;  %v6912_v31 = vld [vmem:[#allocation8 + $0x104] ss:$24 sps:$4 sm:$0xff]  }
 0x86f   : > { %v4706_v28 = vpack.c.bf16 %v4696_v29, %v4696_v29  ;;  %v4698_v45 = vpop.f32.mrb[122].mxu0  ;;  %6499 = vmatprep.subr.bf16.mxu1 %v6867_v42  ;;  %v6907_v42 = vld [vmem:[#allocation8 + $0xf0] ss:$24 sps:$4 sm:$0xff]   ;;  %v6915_v29 = vld [vmem:[#allocation8 + $0xc] ss:$24 sps:$4 sm:$0xff]  }
 0x870   : > { %v4816_v34 = vsel %vm1074_vm1, %v4705_v41, 0  ;;  %v4699_v46 = vpop.f32.mrb[123].mxu0  ;;  %v6910_v41 = vld [vmem:[#allocation8 + $0x100] ss:$24 sps:$4 sm:$0xff]  }
 0x871   : > { %6338 = vmatprep.subr.msk.bf16.mxu0 %vm1074_vm1, %v4706_v28 }
 0x872   : > { %4822 = vmatpush1.bf16.msra.mxu0 %v4816_v34  ;;  %6500 = vmatpush3.bf16.msra.mxu1 %v6868_v43 }
 0x873   : > { %6501 = vmatprep.subr.bf16.mxu1 %v6869_v33  ;;  %5252 = vmatprep.subr.bf16.mxu0 %v6879_v24 }
 0x875   : > { %6339 = vmatmul.mubr.msk.bf16.vlgmr.msra.gmra.mrb[124].mxu0 %vm1058_vm2, %v6337_v48 }
 0x876   : > { %6502 = vmatpush3.bf16.msra.mxu1 %v6870_v20  ;;  %5284 = vmatprep.mubr.bf16.mxu0 %v7142_v0 }
 0x877   : > { %6503 = vmatprep.subr.bf16.mxu1 %v6871_v52  ;;  %5253 = vmatpush1.bf16.msra.mxu0 %v6877_v16 }
 0x878   : > { %5254 = vmatprep.subr.bf16.mxu0 %v6885_v5 }
 0x87a   : > { %6504 = vmatpush3.bf16.msra.mxu1 %v6872_v53 }
 0x87b   : > { %6505 = vmatprep.subr.bf16.mxu1 %v6873_v56  ;;  %5255 = vmatpush1.bf16.msra.mxu0 %v6883_v38 }
 0x87c   : > { %5256 = vmatprep.subr.bf16.mxu0 %v6891_v32  ;;  %v6918_v32 = vld [vmem:[#allocation8 + $0x3c] ss:$24 sps:$4 sm:$0xff]  }
 0x87e   : > { %6506 = vmatpush3.bf16.msra.mxu1 %v6874_v50 }
 0x87f   : > { %6507 = vmatprep.subr.bf16.mxu1 %v6875_v59  ;;  %5257 = vmatpush1.bf16.msra.mxu0 %v6889_v11 }
 0x880   : > { %5258 = vmatprep.subr.bf16.mxu0 %v6897_v57  ;;  %v6919_v57 = vld [vmem:[#allocation8 + $0x68] ss:$24 sps:$4 sm:$0xff]  }
 0x882   : > { %6508 = vmatpush3.bf16.msra.mxu1 %v6876_v63 }
 0x883   : > { %5334 = vmatprep.subr.bf16.mxu1 %v6882_v4  ;;  %5259 = vmatpush1.bf16.msra.mxu0 %v6895_v26  ;;  %v6922_v26 = vld [vmem:[#allocation8 + $0x98] ss:$24 sps:$4 sm:$0xff]  }
 0x884   : > { %5260 = vmatprep.subr.bf16.mxu0 %v6903_v49  ;;  %v6925_v49 = vld [vmem:[#allocation8 + $0xc8] ss:$24 sps:$4 sm:$0xff]  }
 0x885   : > { %5025 = vmatmul.mubr.bf16.vlgmr.msra.gmra.mrb[100].mxu1 %v8375_v58  ;;  %v6892_v58 = vld [vmem:[#allocation8 + $0x70] ss:$24 sps:$4 sm:$0xff]  }
 0x886   : > { %5366 = vmatprep.mubr.bf16.mxu1 %v7142_v0  ;;  %5335 = vmatpush1.bf16.msra.mxu1 %v6880_v3 }
 0x887   : > { %5336 = vmatprep.subr.bf16.mxu1 %v6888_v19  ;;  %5261 = vmatpush1.bf16.msra.mxu0 %v6901_v61  ;;  %v6928_v61 = vld [vmem:[#allocation8 + $0xf8] ss:$24 sps:$4 sm:$0xff]  }
 0x888   : > { %5262 = vmatprep.subr.bf16.mxu0 %v6909_v54 }
 0x88a   : > { %5337 = vmatpush1.bf16.msra.mxu1 %v6886_v62  ;;  %v6913_v62 = vld [vmem:[#allocation8 + $0x8] ss:$24 sps:$4 sm:$0xff]  }
 0x88b   : > { %5338 = vmatprep.subr.bf16.mxu1 %v6894_v22  ;;  %5263 = vmatpush1.bf16.msra.mxu0 %v6907_v42  ;;  %v6921_v22 = vld [vmem:[#allocation8 + $0x6c] ss:$24 sps:$4 sm:$0xff]  }
 0x88c   : > { %5293 = vmatprep.subr.bf16.mxu0 %v6915_v29 }
 0x88e   : > { %5339 = vmatpush1.bf16.msra.mxu1 %v6892_v58  ;;  %v6916_v58 = vld [vmem:[#allocation8 + $0x38] ss:$24 sps:$4 sm:$0xff]  }
 0x88f   : > { %5340 = vmatprep.subr.bf16.mxu1 %v6900_v30  ;;  %v6924_v30 = vld [vmem:[#allocation8 + $0x9c] ss:$24 sps:$4 sm:$0xff]  }
 0x892   : > { %5341 = vmatpush1.bf16.msra.mxu1 %v6898_v27  ;;  %v6927_v27 = vld [vmem:[#allocation8 + $0xcc] ss:$24 sps:$4 sm:$0xff]  }
 0x893   : > { %5342 = vmatprep.subr.bf16.mxu1 %v6906_v39  ;;  %v6930_v39 = vld [vmem:[#allocation8 + $0xfc] ss:$24 sps:$4 sm:$0xff]  }
 0x896   : > { %5343 = vmatpush1.bf16.msra.mxu1 %v6904_v40 }
 0x897   : > { %5344 = vmatprep.subr.bf16.mxu1 %v6912_v31 }
 0x89a   : > { %5345 = vmatpush1.bf16.msra.mxu1 %v6910_v41 }
 0x930   : > { %v4753_v43 = vpop.f32.mrb[92].mxu1 }
 0x931   : > { %v4755_v28 = vpop.f32.mrb[93].mxu1 }
 0x932   : > { %v4757_v45 = vpop.f32.mrb[94].mxu1 }
 0x933   : > { %v4758_v33 = vpop.f32.mrb[95].mxu1 }
 0x938   : > { %v4803_v34 = vpop.f32.mrb[96].mxu1 }
 0x939   : > { %v4804_v46 = vadd.f32 %v4803_v34, %v4753_v43  ;;  %v4805_v48 = vpop.f32.mrb[97].mxu1 }
 0x93a   : > { %v4806_v20 = vadd.f32 %v4805_v48, %v4755_v28  ;;  %v4807_v52 = vpop.f32.mrb[98].mxu1 }
 0x93b   : > { %v4808_v53 = vpop.f32.mrb[99].mxu1 }
 0x948   : > { %v4855_v56 = vpop.f32.mrb[124].mxu0 }
 0x949   : > { %v8589_v50 = vadd.f32 %v4855_v56, %v4804_v46  ;;  %v4857_v59 = vpop.f32.mrb[125].mxu0  ;;  %v5381_v46 = vld [vmem:[%s9060_s22] sm:$0x3] }
 0x94a   : > { %v8591_v63 = vadd.f32 %v4857_v59, %v4806_v20  ;;  %v4859_v16 = vpop.f32.mrb[126].mxu0 }
 0x94b   : > { %v4860_v24 = vpop.f32.mrb[127].mxu0 }
 0x958   : > { %v6509_v3 = vpop.f32.mrb[100].mxu1 }
 0x959   : > { %v6510_v4 = vpop.f32.mrb[101].mxu1 }
 0x95a   : > { %v6511_v5 = vadd.f32 %v6510_v4, %v6509_v3  ;;  %v6512_v38 = vpop.f32.mrb[102].mxu1  ;;  %v6395_v4 = vld [vmem:[%s9060_s22 + $0x2] sm:$0x3] }
 0x95b   : > { %v6513_v19 = vpop.f32.mrb[103].mxu1  ;;  %v6400_v38 = vld [vmem:[%s9060_s22 + $0x4] sm:$0x3] }
 0x95c   : > { %v5032_v11 = vpack.c.bf16 %v6511_v5, %v6511_v5 }
 0x95e   : > { %6392 = vmatmul.mubr.msk.bf16.vlgmr.msra.gmra.mrb[128].mxu0 %vm4574_vm12, %v5032_v11  ;;  %6394 = vmatmul.mubr.msk.bf16.vlgmr.msra.gmra.mrb[104].mxu1 %vm4574_vm12, %v5032_v11 }
 0x95f   : > { %5294 = vmatpush1.bf16.msra.mxu0 %v6913_v62  ;;  %5325 = vmatprep.mubr.bf16.mxu0 %v7142_v0 }
 0x960   : > { %5295 = vmatprep.subr.bf16.mxu0 %v6918_v32  ;;  %5475 = vmatprep.mubr.bf16.mxu1 %v7142_v0 }
 0x963   : > { %5296 = vmatpush1.bf16.msra.mxu0 %v6916_v58 }
 0x964   : > { %5297 = vmatprep.subr.bf16.mxu0 %v6921_v22 }
 0x967   : > { %5298 = vmatpush1.bf16.msra.mxu0 %v6919_v57 }
 0x968   : > { %5299 = vmatprep.subr.bf16.mxu0 %v6924_v30 }
 0x96b   : > { %5300 = vmatpush1.bf16.msra.mxu0 %v6922_v26 }
 0x96c   : > { %5301 = vmatprep.subr.bf16.mxu0 %v6927_v27 }
 0x96f   : > { %5302 = vmatpush1.bf16.msra.mxu0 %v6925_v49 }
 0x970   : > { %5303 = vmatprep.subr.bf16.mxu0 %v6930_v39 }
 0x973   : > { %5304 = vmatpush1.bf16.msra.mxu0 %v6928_v61 }
 0x976   : > { %6393 = vmatmul.mubr.msk.bf16.vlgmr.msra.gmra.mrb[132].mxu0 %vm4574_vm12, %v5032_v11 }
 0x977   : > { %5425 = vmatprep.mubr.bf16.mxu0 %v7142_v0 }
 0xa31   : > { %v5286_v40 = vpop.f32.mrb[128].mxu0  ;;  %v5368_v54 = vpop.f32.mrb[104].mxu1 }
 0xa32   : > { %v5375_v42 = vpack.c.bf16 %v5286_v40, %v5286_v40  ;;  %v5288_v31 = vpop.f32.mrb[129].mxu0  ;;  %v5370_v41 = vpop.f32.mrb[105].mxu1  ;;  %v5379_v24 = vpack.c.bf16 %v5368_v54, %v5368_v54 }
 0xa33   : > { %v5376_v29 = vpack.c.bf16 %v5288_v31, %v5288_v31  ;;  %v5290_v43 = vpop.f32.mrb[130].mxu0  ;;  %v5372_v28 = vpop.f32.mrb[106].mxu1  ;;  %v5380_v3 = vpack.c.bf16 %v5370_v41, %v5370_v41 }
 0xa34   : > { %v5438_v45 = vsel %vm1074_vm1, %v5375_v42, 0  ;;  %v5291_v33 = vpop.f32.mrb[131].mxu0  ;;  %v5373_v34 = vpop.f32.mrb[107].mxu1  ;;  %v5490_v5 = vsel %vm1074_vm1, %v5379_v24, 0 }
 0xa35   : > { %6398 = vmatprep.subr.msk.bf16.mxu1 %vm1074_vm1, %v5376_v29  ;;  %v5544_v41 = vpop.permute.xlu1 %5543 }
 0xa36   : > { %5444 = vmatpush1.bf16.msra.mxu1 %v5438_v45 }
 0xa39   : > { %6399 = vmatmul.mubr.msk.bf16.vlgmr.msra.gmra.mrb[108].mxu1 %vm1058_vm2, %v5381_v46 }
 0xa3a   : > { %5637 = vmatprep.mubr.bf16.mxu1 %v7142_v0 }
 0xa49   : > { %v5327_v48 = vpop.f32.mrb[132].mxu0 }
 0xa4a   : > { %v5377_v20 = vpack.c.bf16 %v5327_v48, %v5327_v48  ;;  %v5329_v52 = vpop.f32.mrb[133].mxu0 }
 0xa4b   : > { %v5378_v53 = vpack.c.bf16 %v5329_v52, %v5329_v52  ;;  %v5331_v56 = vpop.f32.mrb[134].mxu0  ;;  %v6934_v52 = vld [vmem:[%s9062_s16 + $0x18] sm:$0xff]  }
 0xa4c   : > { %v5388_v59 = vsel %vm1074_vm1, %v5377_v20, 0  ;;  %v5332_v16 = vpop.f32.mrb[135].mxu0  ;;  %v6931_v20 = vld [vmem:[%s9061_s8] sm:$0xff]  }
 0xa4d   : > { %6396 = vmatprep.subr.msk.bf16.mxu0 %vm1074_vm1, %v5378_v53  ;;  %v6935_v53 = vld [vmem:[%s9062_s16 + $0x20] ss:$0 sps:$4 sm:$0xff]  }
 0xa4e   : > { %5394 = vmatpush1.bf16.msra.mxu0 %v5388_v59 }
 0xa4f   : > { %6401 = vmatprep.subr.msk.bf16.mxu0 %vm1074_vm1, %v5380_v3 }
 0xa51   : > { %6397 = vmatmul.mubr.msk.bf16.vlgmr.msra.gmra.mrb[136].mxu0 %vm1058_vm2, %v6395_v4 }
 0xa52   : > { %5496 = vmatpush1.bf16.msra.mxu0 %v5490_v5  ;;  %5527 = vmatprep.mubr.bf16.mxu0 %v7142_v0 }
 0xa59   : > { %6402 = vmatmul.mubr.msk.bf16.vlgmr.msra.gmra.mrb[140].mxu0 %vm1058_vm2, %v6400_v38 }
 0xa5a   : > { %5832 = vmatprep.mubr.bf16.mxu0 %v7142_v0 }
 0xb0c   : > { %v5477_v19 = vpop.f32.mrb[108].mxu1 }
 0xb0d   : > { %v5479_v62 = vpop.f32.mrb[109].mxu1 }
 0xb0e   : > { %v5481_v11 = vpop.f32.mrb[110].mxu1 }
 0xb0f   : > { %v5482_v32 = vpop.f32.mrb[111].mxu1 }
 0xb24   : > { %v5427_v58 = vpop.f32.mrb[136].mxu0 }
 0xb25   : > { %v5478_v22 = vadd.f32 %v5477_v19, %v5427_v58  ;;  %v5429_v57 = vpop.f32.mrb[137].mxu0 }
 0xb26   : > { %v5480_v30 = vadd.f32 %v5479_v62, %v5429_v57  ;;  %v5431_v26 = vpop.f32.mrb[138].mxu0 }
 0xb27   : > { %v5432_v27 = vpop.f32.mrb[139].mxu0 }
 0xb2c   : > { %v5529_v49 = vpop.f32.mrb[140].mxu0 }
 0xb2d   : > { %v5536_v39 = vadd.f32 %v5529_v49, %v5478_v22  ;;  %v5531_v61 = vpop.f32.mrb[141].mxu0 }
 0xb2e   : > { %v5537_v40 = vadd.f32 %v5531_v61, %v5480_v30  ;;  %v5533_v54 = vpop.f32.mrb[142].mxu0  ;;  %v4179_v61 = vld [vmem:[%s9065_s20] sm:$0xf] }
 0xb2f   : > { %v5538_v42 = vadd.f32 %v5536_v39, %v8589_v50  ;;  %v5534_v31 = vpop.f32.mrb[143].mxu0  ;;  %v6932_v50 = vld [vmem:[%s9062_s16 + $0x8] sm:$0xff]   ;;  %v8689_v54 = vpop.permute.xlu1 %4149 }
 0xb30   : > { %v5539_v29 = vadd.f32 %v5537_v40, %v8591_v63  ;;  %v6933_v63 = vld [vmem:[%s9062_s16 + $0x10] sm:$0xff]   ;;  %v8687_v40 = vpop.permute.xlu0 %5771 }
 0xb31   : > { %v5546_v43 = vadd.f32 %v5544_v41, %v5538_v42 }
 0xb32   : > { %v5547_v28 = vadd.f32 %v5544_v41, %v5539_v29 }
 0xb33   : > { %v5548_v45 = vmax.f32 %v5546_v43, 0.0 }
 0xb34   : > { %v5549_v33 = vmax.f32 %v5547_v28, 0.0 }
 0xb35   : > { %v5550_v34 = vpack.c.bf16 %v5548_v45, %v5548_v45 }
 0xb36   : > { %v5551_v46 = vpack.c.bf16 %v5549_v33, %v5549_v33 }
 0xb37   : > { %v5600_v48 = vsel %vm1074_vm1, %v5550_v34, 0 }
 0xb38   : > { %6408 = vmatprep.subr.msk.bf16.mxu1 %vm1074_vm1, %v5551_v46 }
 0xb39   : > { %5606 = vmatpush1.bf16.msra.mxu1 %v5600_v48 }
 0xb3c   : > { %6409 = vmatmul.mubr.msk.bf16.vlgmr.msra.gmra.mrb[112].mxu1 %vm1058_vm2, %v6931_v20 }
 0xb3d   : > { %5647 = vmatprep.mubr.bf16.mxu1 %v7142_v0 }
 0xb44   : > { %6410 = vmatmul.mubr.msk.bf16.gmra.mrb[116].mxu1 %vm1058_vm2, %v6932_v50 }
 0xb45   : > { %5657 = vmatprep.mubr.bf16.mxu1 %v7142_v0 }
 0xb4c   : > { %6411 = vmatmul.mubr.msk.bf16.gmra.mrb[120].mxu1 %vm1058_vm2, %v6933_v63 }
 0xb4d   : > { %5667 = vmatprep.mubr.bf16.mxu1 %v7142_v0 }
 0xb54   : > { %6412 = vmatmul.mubr.msk.bf16.gmra.mrb[124].mxu1 %vm1058_vm2, %v6934_v52 }
 0xb55   : > { %5677 = vmatprep.mubr.bf16.mxu1 %v7142_v0 }
 0xb5c   : > { %6413 = vmatmul.mubr.msk.bf16.gmra.mrb[128].mxu1 %vm1058_vm2, %v6935_v53 }
 0xc0f   : > { %v5639_v56 = vpop.f32.mrb[112].mxu1 }
 0xc10   : > { %5686 = vrot.lane.b32.xlu0 %v5639_v56, %s9055_s11  ;;  %v5641_v59 = vpop.f32.mrb[113].mxu1 }
 0xc11   : > { %5688 = vrot.lane.b32.xlu1 %v5641_v59, %s9055_s11  ;;  %v5643_v16 = vpop.f32.mrb[114].mxu1  ;;  %s9063_s11 = smov 112  }
 0xc12   : > { %v5645_v24 = vpop.f32.mrb[115].mxu1 }
 0xc14   : > { %5694 = vrot.lane.b32.xlu0 %v5643_v16, %s9056_s13 }
 0xc15   : > { %5696 = vrot.lane.b32.xlu1 %v5645_v24, %s9056_s13 }
 0xc17   : > { %v5649_v3 = vpop.f32.mrb[116].mxu1 }
 0xc18   : > { %5704 = vrot.lane.b32.xlu0 %v5649_v3, %s9057_s23  ;;  %v5651_v4 = vpop.f32.mrb[117].mxu1 }
 0xc19   : > { %5706 = vrot.lane.b32.xlu1 %v5651_v4, %s9057_s23  ;;  %v5653_v5 = vpop.f32.mrb[118].mxu1  ;;  %s9064_s23 = smov 111  }
 0xc1a   : > { %v5655_v38 = vpop.f32.mrb[119].mxu1 }
 0xc1c   : > { %5714 = vrot.lane.b32.xlu0 %v5653_v5, %s9058_s7 }
 0xc1d   : > { %5716 = vrot.lane.b32.xlu1 %v5655_v38, %s9058_s7 }
 0xc1f   : > { %v8656_v19 = vpop.f32.mrb[120].mxu1 }
 0xc20   : > { %v8658_v62 = vpop.f32.mrb[121].mxu1 }
 0xc21   : > { %v5663_v11 = vpop.f32.mrb[122].mxu1 }
 0xc22   : > { %5728 = vrot.lane.b32.xlu0 %v5663_v11, %s9059_s12  ;;  %v5665_v32 = vpop.f32.mrb[123].mxu1 }
 0xc23   : > { %5730 = vrot.lane.b32.xlu1 %v5665_v32, %s9059_s12  ;;  %s9067_s12 = sld [smem:[#allocation40_spill]] }
 0xc27   : > { %v5669_v58 = vpop.f32.mrb[124].mxu1 }
 0xc28   : > { %5738 = vrot.lane.b32.xlu0 %v5669_v58, %s9054_s2  ;;  %v5671_v22 = vpop.f32.mrb[125].mxu1 }
 0xc29   : > { %5740 = vrot.lane.b32.xlu1 %v5671_v22, %s9054_s2  ;;  %v5673_v57 = vpop.f32.mrb[126].mxu1 }
 0xc2a   : > { %v5675_v30 = vpop.f32.mrb[127].mxu1 }
 0xc2c   : > { %5748 = vrot.lane.b32.xlu0 %v5673_v57, %s9063_s11 }
 0xc2d   : > { %5750 = vrot.lane.b32.xlu1 %v5675_v30, %s9063_s11 }
 0xc2f   : > { %v5679_v26 = vpop.f32.mrb[128].mxu1 }
 0xc30   : > { %v5681_v27 = vpop.f32.mrb[129].mxu1 }
 0xc31   : > { %5758 = vrot.lane.b32.xlu1 %v5679_v26, %s9064_s23  ;;  %5760 = vrot.lane.b32.xlu0 %v5681_v27, %s9064_s23  ;;  %v5683_v49 = vpop.f32.mrb[130].mxu1 }
 0xc32   : > { %v5684_v39 = vpop.f32.mrb[131].mxu1 }
 0xc35   : > { %4159 = vrot.lane.b32.xlu1 %v8458_v9, %s9063_s11  ;;  %4151 = vrot.lane.b32.xlu0 %v8454_v8, %s9054_s2  ;;  %v5901_v9 = vld [vmem:[%s9066_s4 + $0x8] sm:$0xff]  ;;  %v5900_v8 = vld [vmem:[%s9066_s4] sm:$0xff]  ;;  %s903_s2 = scalar_lea.vmem [#allocation10], %s9069_s1 }
 0xc36   : > { %s5942_s10 = sshll.u32 %s903_s2, 4  ;;  %s8869_s10 = int_to_ptr.vmem [resolvable:$true] %s5942_s10 }
 0xc39   : > { %4182 = vperm.xlu1 %6613, %v4179_v61   ;;  %4161 = vrot.lane.b32.xlu0 %v8460_v14, %s9063_s11  ;;  %v8691_v14 = vpop.permute.xlu0 %4097 }
 0xc3d   : > { %4171 = vrot.lane.b32.xlu1 %v8466_v47, %s9064_s23  ;;  %4169 = vrot.lane.b32.xlu0 %v8464_v17, %s9064_s23  ;;  %v8693_v47 = vpop.permute.xlu1 %4099  ;;  %v8695_v42 = vpop.permute.xlu0 %4105  ;;  %s9070_s23 = sld [smem:[#allocation42_spill]] }
 0xc41   : > { %5909 = vperm.xlu1 %6613, %v5901_v9   ;;  %5904 = vperm.xlu0 %6612, %v5900_v8   ;;  %v8697_v17 = vpop.permute.xlu1 %4107  ;;  %v8699_v31 = vpop.permute.xlu0 %4117 }
 0xc43   : > { %s8874_s7 = scalar_lea.hbm %s9070_s23, %s6426_s15 }
 0xc45   : > { %v8701_v41 = vpop.permute.xlu1 %4115  ;;  %v8703_v29 = vpop.permute.xlu0 %4127 }
 0xc49   : > { %v8705_v43 = vpop.permute.xlu1 %4125  ;;  %v8707_v28 = vpop.permute.xlu0 %4141 }
 0xc4d   : > { %v8709_v45 = vpop.permute.xlu1 %4139 }
 0xc82   : > { %v5687_v33 = vpop.permute.xlu0 %5686 }
 0xc83   : > { %v5689_v34 = vpop.permute.xlu1 %5688 }
 0xc84   : > { %v5690_v59 = vsel %vm1168_vm4, %v5687_v33, %v5689_v34  ;;  %v5691_v16 = vsel %vm1168_vm4, %v5689_v34, %v5687_v33 }
 0xc85   : > { %v5692_v32 = vmul.f32 %v5691_v16, %v7901_v51  ;;  %v5693_v58 = vmul.f32 %v5690_v59, %v7914_v1 }
 0xc86   : > { %v5695_v46 = vpop.permute.xlu0 %5694 }
 0xc87   : > { %v5697_v48 = vpop.permute.xlu1 %5696 }
 0xc88   : > { %v5698_v63 = vsel %vm1185_vm3, %v5695_v46, %v5697_v48  ;;  %v5699_v52 = vsel %vm1185_vm3, %v5697_v48, %v5695_v46 }
 0xc89   : > { %v5700_v4 = vmul.f32 %v5699_v52, %v7909_v55  ;;  %v5701_v5 = vmul.f32 %v5698_v63, %v7917_v2 }
 0xc8a   : > { %v5705_v20 = vpop.permute.xlu0 %5704 }
 0xc8b   : > { %v5707_v50 = vpop.permute.xlu1 %5706  ;;  %v5702_v26 = vadd.f32 %v5700_v4, %v5692_v32  ;;  %v5703_v27 = vadd.f32 %v5701_v5, %v5693_v58 }
 0xc8c   : > { %v5708_v24 = vsel %vm1204_vm5, %v5705_v20, %v5707_v50  ;;  %v5709_v3 = vsel %vm1204_vm5, %v5707_v50, %v5705_v20 }
 0xc8d   : > { %v5710_v22 = vmul.f32 %v5709_v3, %v7924_v7  ;;  %v5711_v57 = vmul.f32 %v5708_v24, %v7930_v12 }
 0xc8e   : > { %v5715_v53 = vpop.permute.xlu0 %5714 }
 0xc8f   : > { %v5717_v56 = vpop.permute.xlu1 %5716  ;;  %v5712_v9 = vadd.f32 %v5710_v22, %v5702_v26  ;;  %v5713_v8 = vadd.f32 %v5711_v57, %v5703_v27  ;;  %v4102_v26 = vsel %vm1168_vm4, %v8693_v47, %v8691_v14  ;;  %v4109_v27 = vsel %vm1185_vm3, %v8695_v42, %v8697_v17 }
 0xc90   : > { %v5718_v38 = vsel %vm1223_vm6, %v5715_v53, %v5717_v56  ;;  %v5719_v11 = vsel %vm1223_vm6, %v5717_v56, %v5715_v53  ;;  %v5724_v53 = vmul.f32 %v8656_v19, %v7943_v21  ;;  %v5725_v56 = vmul.f32 %v8658_v62, %v7959_v35 }
 0xc91   : > { %v5720_v49 = vmul.f32 %v5719_v11, %v7940_v18  ;;  %v5721_v39 = vmul.f32 %v5718_v38, %v7947_v25 }
 0xc93   : > { %v5722_v48 = vadd.f32 %v5720_v49, %v5712_v9  ;;  %v5723_v20 = vadd.f32 %v5721_v39, %v5713_v8  ;;  %v4110_v49 = vsel %vm1185_vm3, %v8697_v17, %v8695_v42  ;;  %v8786_v42 = vld [vmem:[%s9048_s0 + $0x18] ss:$0 sm:$0xff] }
 0xc94   : > { %v5729_v30 = vpop.permute.xlu0 %5728 }
 0xc95   : > { %v5731_v61 = vpop.permute.xlu1 %5730  ;;  %v5726_v3 = vadd.f32 %v5724_v53, %v5722_v48  ;;  %v5727_v4 = vadd.f32 %v5725_v56, %v5723_v20  ;;  %v4103_v20 = vmul.f32 %v4102_v26, %v7901_v51  ;;  %v4119_v53 = vsel %vm1204_vm5, %v8701_v41, %v8699_v31 }
 0xc96   : > { %v5732_v33 = vsel %vm1254_vm7, %v5729_v30, %v5731_v61  ;;  %v5733_v34 = vsel %vm1254_vm7, %v5731_v61, %v5729_v30  ;;  %v4101_v30 = vsel %vm1168_vm4, %v8691_v14, %v8693_v47  ;;  %v4120_v56 = vsel %vm1204_vm5, %v8699_v31, %v8701_v41 }
 0xc97   : > { %v5734_v59 = vmul.f32 %v5732_v33, %v7969_v60  ;;  %v5735_v16 = vmul.f32 %v5733_v34, %v7973_v6  ;;  %v4130_v31 = vsel %vm1223_vm6, %v8703_v29, %v8705_v43 }
 0xc99   : > { %v5736_v58 = vadd.f32 %v5734_v59, %v5726_v3  ;;  %v5737_v62 = vadd.f32 %v5735_v16, %v5727_v4  ;;  %v4122_v3 = vmul.f32 %v4119_v53, %v7930_v12  ;;  %v4129_v4 = vsel %vm1223_vm6, %v8705_v43, %v8703_v29 }
 0xc9a   : > { %v5739_v46 = vpop.permute.xlu0 %5738  ;;  %v4132_v12 = vmul.f32 %v4129_v4, %v7947_v25  ;;  %v4135_v29 = vmul.f32 %v8472_v36, %v7943_v21  ;;  %v4136_v43 = vmul.f32 %v8475_v37, %v7959_v35  ;;  %v4143_v25 = vsel %vm1254_vm7, %v8709_v45, %v8707_v28 }
 0xc9b   : > { %v5741_v50 = vpop.permute.xlu1 %5740 }
 0xc9c   : > { %v5742_v63 = vsel %vm1273_vm8, %v5739_v46, %v5741_v50  ;;  %v5743_v52 = vsel %vm1273_vm8, %v5741_v50, %v5739_v46  ;;  %v8780_v46 = vld [vmem:[%s9048_s0 + $0x10] ss:$0 sm:$0xff]  ;;  %v4104_v50 = vmul.f32 %v4101_v30, %v7914_v1 }
 0xc9d   : > { %v5744_v5 = vmul.f32 %v5742_v63, %v7984_v10  ;;  %v5745_v38 = vmul.f32 %v5743_v52, %v7988_v13  ;;  %v4111_v63 = vmul.f32 %v4110_v49, %v7909_v55  ;;  %v4112_v52 = vmul.f32 %v4109_v27, %v7917_v2 }
 0xc9e   : > { %v5749_v24 = vpop.permute.xlu0 %5748  ;;  %v4121_v2 = vmul.f32 %v4120_v56, %v7924_v7  ;;  %v4131_v7 = vmul.f32 %v4130_v31, %v7940_v18  ;;  %v4145_v27 = vmul.f32 %v4143_v25, %v7969_v60 }
 0xc9f   : > { %v5751_v11 = vpop.permute.xlu1 %5750  ;;  %v5746_v39 = vadd.f32 %v5744_v5, %v5736_v58  ;;  %v5747_v61 = vadd.f32 %v5745_v38, %v5737_v62  ;;  %v4114_v55 = vadd.f32 %v4112_v52, %v4104_v50  ;;  %v6936_v62 = vld [vmem:[%s9067_s12] sm:$0xff]   ;;  %s7058_s12 = scalar_lea.vmem %s8869_s10, 512 }
 0xca0   : > { %v5752_v32 = vsel %vm1292_vm9, %v5749_v24, %v5751_v11  ;;  %v5753_v19 = vsel %vm1292_vm9, %v5751_v11, %v5749_v24  ;;  %v4113_v24 = vadd.f32 %v4111_v63, %v4103_v20  ;;  %p7059_p1 = scmp.ne.s32.totalorder %s8869_s10, %s7058_s12 }
 0xca1   : > { %v5754_v22 = vmul.f32 %v5752_v32, %v7995_v15  ;;  %v5755_v57 = vmul.f32 %v5753_v19, %v8009_v23  ;;  %v4124_v32 = vadd.f32 %v4122_v3, %v4114_v55  ;;  %v6940_v3 = vld [vmem:[%s7494_s6] sm:$0xff] }
 0xca2   : > { %v4123_v11 = vadd.f32 %v4121_v2, %v4113_v24  ;;  %p7060_p4 = pnand %p7059_p1, %p7440_p6 }
 0xca3   : > { %v5759_v9 = vpop.permute.xlu1 %5758  ;;  %v5761_v8 = vpop.permute.xlu0 %5760  ;;  %v5756_v47 = vadd.f32 %v5754_v22, %v5746_v39  ;;  %v5757_v34 = vadd.f32 %v5755_v57, %v5747_v61  ;;  %v4134_v18 = vadd.f32 %v4132_v12, %v4124_v32  ;;  %v4144_v57 = vsel %vm1254_vm7, %v8707_v28, %v8709_v45  ;;  %v6942_v32 = vld [vmem:[%s7494_s6 + $0x10] sm:$0xff] }
 0xca4   : > { %v5762_v33 = vsel %vm1311_vm10, %v5759_v9, %v5761_v8  ;;  %v5763_v14 = vsel %vm1311_vm10, %v5761_v8, %v5759_v9  ;;  %v4133_v22 = vadd.f32 %v4131_v7, %v4123_v11  ;;  %v4146_v28 = vmul.f32 %v4144_v57, %v7973_v6  ;;  %p7061_p8 = pneg %p7060_p4 }
 0xca5   : > { %v5764_v48 = vmul.f32 %v8780_v46, %v5762_v33  ;;  %v5765_v17 = vmul.f32 %v8786_v42, %v5763_v14  ;;  %v4138_v37 = vadd.f32 %v4136_v43, %v4134_v18 }
 0xca6   : > { %v4137_v36 = vadd.f32 %v4135_v29, %v4133_v22 }
 0xca7   : > { %v5766_v59 = vadd.f32 %v5764_v48, %v5756_v47  ;;  %v5767_v16 = vadd.f32 %v5765_v17, %v5757_v34  ;;  %v4152_v19 = vpop.permute.xlu0 %4151  ;;  %v4160_v30 = vpop.permute.xlu1 %4159  ;;  %v4148_v8 = vadd.f32 %v4146_v28, %v4138_v37 }
 0xca8   : > { %v4153_v21 = vsel %vm1273_vm8, %v8689_v54, %v4152_v19  ;;  %v4154_v35 = vsel %vm1273_vm8, %v4152_v19, %v8689_v54  ;;  %v4147_v9 = vadd.f32 %v4145_v27, %v4137_v36  ;;  %v6943_v19 = vld [vmem:[%s7494_s6 + $0x18] sm:$0xff] }
 0xca9   : > { %v5775_v51 = vadd.f32 %v8687_v40, %v5767_v16  ;;  %v5774_v1 = vadd.f32 %v8687_v40, %v5766_v59  ;;  %v4155_v49 = vmul.f32 %v4153_v21, %v7984_v10  ;;  %v4156_v39 = vmul.f32 %v4154_v35, %v7988_v13 }
 0xcab   : > { %v5777_v41 = vmax.f32 %v5775_v51, 0.0  ;;  %v5776_v5 = vmax.f32 %v5774_v1, 0.0  ;;  %v4162_v26 = vpop.permute.xlu0 %4161  ;;  %v4157_v60 = vadd.f32 %v4155_v49, %v4147_v9  ;;  %v4158_v14 = vadd.f32 %v4156_v39, %v4148_v8 }
 0xcac   : > { %v4163_v45 = vsel %vm1292_vm9, %v4160_v30, %v4162_v26 }
 0xcad   : > { %v5785_v38 = vpack.c.bf16 %v5777_v41, %v5777_v41  ;;  %v5784_v40 = vpack.c.bf16 %v5776_v5, %v5776_v5  ;;  %v4165_v54 = vmul.f32 %v4163_v45, %v7995_v15  ;;  %v6941_v5 = vld [vmem:[%s7494_s6 + $0x8] sm:$0xff]  ;;  %s7151_s6 = smov [#allocation10]  }
 0xcae   : > { %s7062_s20 = sshll.u32 %s7151_s6, 4  ;;  %s7063_s20 = int_to_ptr.vmem [resolvable:$false] %s7062_s20 }
 0xcaf   : > { %6415 = vmatprep.subr.msk.bf16.mxu0 %vm1074_vm1, %v5785_v38  ;;  %v5795_v58 = vsel %vm1074_vm1, %v5784_v40, 0  ;;  %v4170_v6 = vpop.permute.xlu0 %4169  ;;  %v4167_v10 = vadd.f32 %v4165_v54, %v4157_v60  ;;  %s7064_s24 = scalar_lea.vmem %s7063_s20, 1024  ;;  %p7065_p3 = scmp.lt.s32.totalorder %s8869_s10, %s7063_s20 }
 0xcb0   : > { %5801 = vmatpush1.bf16.msra.mxu0 %v5795_v58  ;;  %p7066_p7 = scmp.lt.s32.totalorder %s7064_s24, %s7058_s12 }
 0xcb2   : > { %p7067_p10 = por %p7066_p7, %p7065_p3 }
 0xcb3   : > { %6416 = vmatmul.mubr.msk.bf16.vlgmr.msra.gmra.mrb[144].mxu0 %vm1058_vm2, %v6936_v62 }
 0xcb4   : > { %5889 = vmatprep.mubr.bf16.mxu0 %v7142_v0  ;;  %v4164_v0 = vsel %vm1292_vm9, %v4162_v26, %v4160_v30  ;;  %p7068_p13 = pnand %p7067_p10, %p7061_p8 }
 0xcb5   : > { %v4166_v33 = vmul.f32 %v4164_v0, %v8009_v23 }
 0xcb7   : > { %v4168_v17 = vadd.f32 %v4166_v33, %v4158_v14 }
 0xcb8   : > { %v4183_v61 = vpop.permute.xlu1 %4182 }
 0xcbc   : > { %v4172_v47 = vpop.permute.xlu1 %4171 }
 0xcbd   : > { %v4173_v34 = vsel %vm1311_vm10, %v4170_v6, %v4172_v47  ;;  %v4174_v48 = vsel %vm1311_vm10, %v4172_v47, %v4170_v6 }
 0xcbe   : > { %v4175_v13 = vmul.f32 %v8780_v46, %v4173_v34  ;;  %v4176_v20 = vmul.f32 %v8786_v42, %v4174_v48  ;;  %v6937_v46 = vld [vmem:[%s9068_s14] sm:$0xff]  }
 0xcc0   : > { %v4177_v50 = vadd.f32 %v4175_v13, %v4167_v10  ;;  %v4178_v15 = vadd.f32 %v4176_v20, %v4168_v17  ;;  %v5905_v42 = vpop.permute.xlu0 %5904  ;;  %v5910_v24 = vpop.permute.xlu1 %5909 }
 0xcc2   : > { %v4186_v63 = vadd.f32 %v4183_v61, %v4178_v15  ;;  %v4185_v23 = vadd.f32 %v4183_v61, %v4177_v50 }
 0xcc4   : > { %v4188_v52 = vmax.f32 %v4186_v63, 0.0  ;;  %v4187_v53 = vmax.f32 %v4185_v23, 0.0 }
 0xcc6   : > { %v5781_v56 = vpack.c.bf16 %v4188_v52, %v4188_v52  ;;  %v5780_v59 = vpack.c.bf16 %v4187_v53, %v4187_v53 }
 0xcc8   : > { %6418 = vmatprep.subr.msk.bf16.mxu0 %vm1074_vm1, %v5781_v56  ;;  %v5852_v44 = vsel %vm1074_vm1, %v5780_v59, 0 }
 0xcc9   : > { %5858 = vmatpush1.bf16.msra.mxu0 %v5852_v44 }
 0xccc   : > { %6419 = vmatmul.mubr.msk.bf16.vlgmr.msra.gmra.mrb[144].mxu0 %vm1058_vm2, %v6937_v46 }
 0xd9f   : > { %v5891_v16 = vpop.f32.mrb[144].mxu0 }
 0xda0   : > { %v5912_v51 = vadd.f32 %v5905_v42, %v5891_v16  ;;  %v5893_v1 = vpop.f32.mrb[145].mxu0 }
 0xda1   : > { %v5913_v55 = vadd.f32 %v5905_v42, %v5893_v1  ;;  %v5895_v2 = vpop.f32.mrb[146].mxu0 }
 0xda2   : > { %v5916_v4 = vadd.f32 %v6940_v3, %v5912_v51  ;;  %v5914_v31 = vadd.f32 %v5910_v24, %v5895_v2  ;;  %v5897_v41 = vpop.f32.mrb[147].mxu0 }
 0xda3   : > { %v5917_v38 = vadd.f32 %v6941_v5, %v5913_v55  ;;  %v5915_v40 = vadd.f32 %v5910_v24, %v5897_v41 }
 0xda4   : > { %v5920_v11 = vmax.f32 %v5916_v4, 0.0  ;;  %v5918_v7 = vadd.f32 %v6942_v32, %v5914_v31 }
 0xda5   : > { %v5921_v12 = vmax.f32 %v5917_v38, 0.0  ;;  %v5919_v58 = vadd.f32 %v6943_v19, %v5915_v40 }
 0xda6   : > { %5924 = vst [vmem:[%s903_s2] sm:$0xff] %v5920_v11  ;;  %v5922_v62 = vmax.f32 %v5918_v7, 0.0 }
 0xda7   : > { %5925 = vst [vmem:[%s903_s2 + $0x8] sm:$0xff] %v5921_v12  ;;  %v5923_v29 = vmax.f32 %v5919_v58, 0.0 }
 0xda8   : > { %5926 = vst [vmem:[%s903_s2 + $0x10] sm:$0xff] %v5922_v62 }
 0xda9   : > { %5927 = vst [vmem:[%s903_s2 + $0x18] sm:$0xff] %v5923_v29 }
 0xdaa   : > { %7071 = shalt.err (!%p7068_p13)
}
 0xdab   : > { %s7072_s14 = scalar_lea.hbm %s8874_s7, 512  ;;  %s7076_s15 = scalar_lea.hbm %s9070_s23, 1024 }
 0xdac   : > { %p7073_p0 = scmp.ne.s32.totalorder %s8874_s7, %s7072_s14  ;;  %p7077_p9 = scmp.lt.u32.totalorder %s8874_s7, %s9070_s23 }
 0xdad   : > { %p7078_p12 = scmp.lt.u32.totalorder %s7076_s15, %s7072_s14  ;;  %p7080_p1 = scmp.lt.u32.totalorder %s7072_s14, %s8874_s7 }
 0xdae   : > { %p7074_p5 = pnand %p7073_p0, %p7440_p6 }
 0xdaf   : > { %p7079_p2 = por %p7078_p12, %p7077_p9 }
 0xdb0   : > { %p7075_p11 = pneg %p7074_p5 }
 0xdb1   : > { %p7081_p4 = por %p7080_p1, %p7079_p2 }
 0xdb3   : > { %p7082_p8 = pnand %p7081_p4, %p7075_p11 }
 0xdb5   : > { %7085 = shalt.err (!%p7082_p8)
}
 0xdb6   : > { %s7152_s12 = smov 256  }
 0xdb7   : > { %6535 = dma.vmem_to_hbm [thread:$0]  (%p7440_p6), %s8869_s10, 512, %s8874_s7, %s5929_s3, %s7152_s12, %s7152_s12, %s9056_s13  }
 0xdb8 PF: > { %s9071_s6 = sld [smem:[#allocation15_spill]]  ;;  %s9072_s20 = sld [smem:[#allocation16_spill]] }
 0xdb9   : > { %p9074_p7 = scmp.ge.s32.totalorder %s7132_s30, 2 }
 0xdbe   : > { %s5957_s24 = sand.u32 1, %s9071_s6   ;;  %p9073_p3 = scmp.ne.s32.totalorder %s9072_s20, 0 }
 0xdbf   : > { %s5958_s14 = scalar_lea.sflag [#allocation4], %s5957_s24 }
 0xdc0   : > { %p6552_p10 = pnand %p9074_p7, %p9073_p3 }
 0xdc2   : > { %7115 = dma.done.wait (!%p6552_p10), %s5958_s14, 512  }
 0xdc3   : > { %7117 = vsyncadd (!%p6552_p10), %s5958_s14, 4294966784  ;;  %p43_p13 = scmp.ge.s32.totalorder %s7426_s26, 4   ;;  %s9075_s8 = smov %s7124_s5 }
 0xdc4   : > { %s9076_s5 = smov %s7128_s9  ;;  %s9077_s9 = smov %s7436_s25 }
 0xdc5   : > { %s9078_s30 = smov %s7426_s26  ;;  %45 = sbr.rel (!%p43_p13) target bundleno = 34 (0x22), region = 209 }
 0xdcc   :  { %5963 = vsyncpa [#allocation3], 1 }
 0xdcd   :  { %5965 = vsyncpa [#allocation3 + $0x1], 1 }
 0xdce   :  { %5966 = vsyncpa [#allocation6], 1 }
 0xdcf   :  { %5967 = vsyncpa [#allocation9], 1 }
 0xdd0   :  { %5968 = vsyncpa [#allocation4], 1 }
 0xdd1   :  { %5970 = vsyncpa [#allocation4 + $0x1], 1 }

</bundles_post_ra>
